<compile_context>
chip_gen: v7x
topology: tpu7x:2x2x1
jax: 0.10.0
libtpu: 0.0.40
codegen_flags: <defaults>
</compile_context>

<pallas_src>
import functools
import math

import jax
import jax.numpy as jnp
from jax import lax
from jax.experimental import pallas as pl
from jax.experimental.pallas import tpu as pltpu


# ----------------------------- fused decoder kernel -----------------------------

def _decoder_kernel(x_ref, e_ref, pe_ref, tmask_ref, smask_ref,
                    n1a_ref, n1b_ref, n2a_ref, n2b_ref, n3a_ref, n3b_ref,
                    wqkv_ref, bqkv_ref, wo1_ref, bo1_ref,
                    wq2_ref, bq2_ref, wkv2_ref, bkv2_ref, wo2_ref, bo2_ref,
                    w1_ref, b1_ref, w2_ref, b2_ref,
                    fna_ref, fnb_ref,
                    o_ref, attn_ref,
                    *, heads, eps, embed_scale):
    """One decoder layer for one batch element per grid step.

    Grid = (batch, layer). The output block index is constant along the layer
    axis, so o_ref is the VMEM-resident carried activation x across all layers.
    """
    l = pl.program_id(1)

    # --- layer 0: fused embedding scale + positional encoding (dropout = id) ---
    @pl.when(l == 0)
    def _():
        o_ref[0] = x_ref[0] * embed_scale + pe_ref[...]

    x = o_ref[0]          # (S_t, D) carried activation (VMEM resident)
    e = e_ref[0]          # (S_src, D)
    tmask = tmask_ref[0]  # (S_t, S_t) additive f32 mask (0 / -1e9)
    smask = smask_ref[0]  # (1, S_src) additive f32 mask, broadcasts over rows

    D = x.shape[-1]
    d_k = D // heads
    att_scale = 1.0 / math.sqrt(d_k)

    def layer_norm(v, a, b):
        # torch: alpha*(x-mean)/(std_unbiased + eps) + bias   (exact math, f32)
        mean = jnp.mean(v, axis=-1, keepdims=True)
        var = jnp.sum((v - mean) ** 2, axis=-1, keepdims=True) / (v.shape[-1] - 1)
        return a * (v - mean) / (jnp.sqrt(var) + eps) + b

    def bdot(a, w_bf16):
        # bf16 MXU matmul with f32 accumulation.
        return jnp.dot(a.astype(jnp.bfloat16), w_bf16,
                       preferred_element_type=jnp.float32)

    def attend(q, k, v, add_mask):
        # q: (S_t, D), k/v: (S_k, D). Per-head attention; each head's context
        # is written lane-dense into the persistent VMEM scratch slab (no
        # jnp.concatenate -> no cross-lane relayout).
        # TODO(synk): add flash-style blocking over S_k for realistic seq lens.
        for h in range(heads):
            lo = h * d_k
            qh = q[:, lo:lo + d_k].astype(jnp.bfloat16)
            kh = k[:, lo:lo + d_k].astype(jnp.bfloat16)
            vh = v[:, lo:lo + d_k].astype(jnp.bfloat16)
            s = lax.dot_general(qh, kh, (((1,), (1,)), ((), ())),
                                preferred_element_type=jnp.float32)
            s = s * att_scale + add_mask
            s = s - jnp.max(s, axis=-1, keepdims=True)
            p = jnp.exp(s)
            p = p * pl.reciprocal(jnp.sum(p, axis=-1, keepdims=True), approx=True)
            attn_ref[:, lo:lo + d_k] = jnp.dot(p.astype(jnp.bfloat16), vh,
                                               preferred_element_type=jnp.float32)
        return attn_ref[...]   # (S_t, D)

    # ---- sublayer 1: pre-norm self-attention + residual ----
    x2 = layer_norm(x, n1a_ref[0], n1b_ref[0])
    qkv = bdot(x2, wqkv_ref[0]) + bqkv_ref[0]               # (S_t, 3D)
    a1 = attend(qkv[:, 0:D], qkv[:, D:2 * D], qkv[:, 2 * D:3 * D], tmask)
    x = x + bdot(a1, wo1_ref[0]) + bo1_ref[0]

    # ---- sublayer 2: pre-norm cross-attention over e_outputs + residual ----
    x2 = layer_norm(x, n2a_ref[0], n2b_ref[0])
    q = bdot(x2, wq2_ref[0]) + bq2_ref[0]                   # (S_t, D)
    kv = bdot(e, wkv2_ref[0]) + bkv2_ref[0]                 # (S_src, 2D)
    a2 = attend(q, kv[:, 0:D], kv[:, D:2 * D], smask)
    x = x + bdot(a2, wo2_ref[0]) + bo2_ref[0]

    # ---- sublayer 3: pre-norm FFN (ReLU) + residual ----
    x2 = layer_norm(x, n3a_ref[0], n3b_ref[0])
    h = jnp.maximum(bdot(x2, w1_ref[0]) + b1_ref[0], 0.0)
    x = x + bdot(h, w2_ref[0]) + b2_ref[0]

    o_ref[0] = x

    # ---- final Norm fused into the last layer step ----
    @pl.when(l == pl.num_programs(1) - 1)
    def _():
        o_ref[0] = layer_norm(o_ref[0], fna_ref[...], fnb_ref[...])


def decoder_forward(params, trg, e_outputs, src_mask, trg_mask, heads):
    embed = params["embed"]
    D = embed.shape[1]
    # Embedding gather is a pure table lookup left to XLA; everything dense
    # afterwards runs inside the single fused Pallas call.
    x = jnp.take(embed, trg, axis=0)                        # (B, S_t, D)
    B, S_t, _ = x.shape
    S_src = e_outputs.shape[1]

    L = params["layers"]
    n_layers = L["wqkv"].shape[0]
    d_ff = L["w1"].shape[-1]

    pe = params["pe"][:S_t]                                 # (S_t, D), shared

    # Additive (0 / -1e9) masks, built once and DMA'd once per batch element
    # (constant block index along the layer grid axis).
    tmask_add = jnp.where(trg_mask.reshape(B, S_t, S_t) == 0,
                          jnp.float32(-1e9), jnp.float32(0.0))
    smask_add = jnp.where(src_mask.reshape(B, 1, S_src) == 0,
                          jnp.float32(-1e9), jnp.float32(0.0))

    kern = functools.partial(_decoder_kernel, heads=heads, eps=1e-6,
                             embed_scale=math.sqrt(D))

    def per_b(shape):       # per-batch block, constant along the layer axis
        return pl.BlockSpec(shape, lambda b, l: (b, 0, 0))

    def per_l(shape):       # per-layer stacked weights, pipelined along l
        return pl.BlockSpec(shape, lambda b, l: (l, 0, 0))

    def shared(shape):      # shared 2-D block (PE table, final norm params)
        return pl.BlockSpec(shape, lambda b, l: (0, 0))

    # Rough cost hint so XLA schedules the gather / mask setup around the call.
    flops_layer = (2 * S_t * D * 3 * D          # fused QKV
                   + 4 * S_t * S_t * D          # self attention (QK^T + PV)
                   + 6 * S_t * D * D            # wo1, wq2, wo2
                   + 2 * S_src * D * 2 * D      # fused cross KV
                   + 4 * S_t * S_src * D        # cross attention
                   + 4 * S_t * D * d_ff)        # FFN
    weight_bytes_layer = 2 * (3 * D * D + 3 * D * D + 2 * D * D + 2 * D * d_ff)
    cost = pl.CostEstimate(
        flops=int(B * n_layers * flops_layer),
        transcendentals=int(B * n_layers * heads * (S_t * S_t + S_t * S_src)),
        bytes_accessed=int(B * n_layers * weight_bytes_layer
                           + 4 * B * (2 * S_t * D + S_src * D + S_t * S_t + S_src)))

    # TODO(synk): for B == 1 (or odd B) on v7x, add a second "parallel" axis
    # (e.g. S_t row blocks) so both TensorCores get work.
    return pl.pallas_call(
        kern,
        out_shape=jax.ShapeDtypeStruct((B, S_t, D), jnp.float32),
        grid=(B, n_layers),
        in_specs=[
            per_b((1, S_t, D)),                 # x (embedded tokens)
            per_b((1, S_src, D)),               # e_outputs
            shared((S_t, D)),                   # positional encoding table
            per_b((1, S_t, S_t)),               # additive trg mask
            per_b((1, 1, S_src)),               # additive src mask
            per_l((1, 1, D)), per_l((1, 1, D)),             # norm1 alpha, bias
            per_l((1, 1, D)), per_l((1, 1, D)),             # norm2 alpha, bias
            per_l((1, 1, D)), per_l((1, 1, D)),             # norm3 alpha, bias
            per_l((1, D, 3 * D)), per_l((1, 1, 3 * D)),     # fused Wqkv, bqkv
            per_l((1, D, D)), per_l((1, 1, D)),             # Wo (self), bo
            per_l((1, D, D)), per_l((1, 1, D)),             # Wq (cross), bq
            per_l((1, D, 2 * D)), per_l((1, 1, 2 * D)),     # fused Wkv (cross), bkv
            per_l((1, D, D)), per_l((1, 1, D)),             # Wo (cross), bo
            per_l((1, D, d_ff)), per_l((1, 1, d_ff)),       # FFN w1, b1
            per_l((1, d_ff, D)), per_l((1, 1, D)),          # FFN w2, b2
            shared((1, D)), shared((1, D)),                 # final norm alpha, bias
        ],
        out_specs=per_b((1, S_t, D)),           # carried x, VMEM-resident over l
        scratch_shapes=[pltpu.VMEM((S_t, D), jnp.float32)],  # attention context slab
        compiler_params=pltpu.CompilerParams(
            dimension_semantics=("parallel", "arbitrary"),
            vmem_limit_bytes=32 * 1024 * 1024),
        cost_estimate=cost,
    )(
        x, e_outputs, pe, tmask_add, smask_add,
        L["n1a"], L["n1b"], L["n2a"], L["n2b"], L["n3a"], L["n3b"],
        L["wqkv"], L["bqkv"], L["wo1"], L["bo1"],
        L["wq2"], L["bq2"], L["wkv2"], L["bkv2"], L["wo2"], L["bo2"],
        L["w1"], L["b1"], L["w2"], L["b2"],
        params["norm_a"], params["norm_b"],
    )


# ----------------------------- parameter construction -----------------------------

def make_pe_table(max_seq_len, d_model):
    # Replicates the reference PositionalEncoder table (including its exponent quirk).
    pos = jnp.arange(max_seq_len, dtype=jnp.float32)[:, None]
    i_even = jnp.arange(0, d_model, 2, dtype=jnp.float32)
    sin_part = jnp.sin(pos / jnp.power(10000.0, (2.0 * i_even) / d_model))
    cos_part = jnp.cos(pos / jnp.power(10000.0, (2.0 * (i_even + 1.0)) / d_model))
    pe = jnp.zeros((max_seq_len, d_model), jnp.float32)
    pe = pe.at[:, 0::2].set(sin_part)
    pe = pe.at[:, 1::2].set(cos_part)
    return pe


def _lin_init(key, d_in, d_out):
    kw, kb = jax.random.split(key)
    bound = 1.0 / math.sqrt(d_in)
    w = jax.random.uniform(kw, (d_in, d_out), jnp.float32, -bound, bound)
    b = jax.random.uniform(kb, (d_out,), jnp.float32, -bound, bound)
    return w, b


def init_params(key, vocab_size, d_model, max_seq_len, N, d_ff):
    D = d_model
    params = {}
    key, k_emb = jax.random.split(key)
    params["embed"] = jax.random.normal(k_emb, (vocab_size, D), jnp.float32)
    params["pe"] = make_pe_table(max_seq_len, D)

    names = ["n1a", "n1b", "n2a", "n2b", "n3a", "n3b",
             "wqkv", "bqkv", "wo1", "bo1",
             "wq2", "bq2", "wkv2", "bkv2", "wo2", "bo2",
             "w1", "b1", "w2", "b2"]
    acc = {n: [] for n in names}
    for _ in range(N):
        key, *ks = jax.random.split(key, 11)
        wq1, bq1 = _lin_init(ks[0], D, D)
        wk1, bk1 = _lin_init(ks[1], D, D)
        wv1, bv1 = _lin_init(ks[2], D, D)
        wo1, bo1 = _lin_init(ks[3], D, D)
        wq2, bq2 = _lin_init(ks[4], D, D)
        wk2, bk2 = _lin_init(ks[5], D, D)
        wv2, bv2 = _lin_init(ks[6], D, D)
        wo2, bo2 = _lin_init(ks[7], D, D)
        w1, b1 = _lin_init(ks[8], D, d_ff)
        w2, b2 = _lin_init(ks[9], d_ff, D)
        ones = jnp.ones((1, D), jnp.float32)
        zeros = jnp.zeros((1, D), jnp.float32)
        acc["n1a"].append(ones); acc["n1b"].append(zeros)
        acc["n2a"].append(ones); acc["n2b"].append(zeros)
        acc["n3a"].append(ones); acc["n3b"].append(zeros)
        acc["wqkv"].append(jnp.concatenate([wq1, wk1, wv1], axis=1).astype(jnp.bfloat16))
        acc["bqkv"].append(jnp.concatenate([bq1, bk1, bv1])[None, :])
        acc["wo1"].append(wo1.astype(jnp.bfloat16)); acc["bo1"].append(bo1[None, :])
        acc["wq2"].append(wq2.astype(jnp.bfloat16)); acc["bq2"].append(bq2[None, :])
        acc["wkv2"].append(jnp.concatenate([wk2, wv2], axis=1).astype(jnp.bfloat16))
        acc["bkv2"].append(jnp.concatenate([bk2, bv2])[None, :])
        acc["wo2"].append(wo2.astype(jnp.bfloat16)); acc["bo2"].append(bo2[None, :])
        acc["w1"].append(w1.astype(jnp.bfloat16)); acc["b1"].append(b1[None, :])
        acc["w2"].append(w2.astype(jnp.bfloat16)); acc["b2"].append(b2[None, :])

    # Stack every per-layer tensor with a leading layer axis (pipelined by the
    # layer grid dimension inside the fused kernel).
    params["layers"] = {k: jnp.stack(v, axis=0) for k, v in acc.items()}
    params["norm_a"] = jnp.ones((1, D), jnp.float32)
    params["norm_b"] = jnp.zeros((1, D), jnp.float32)
    return params


# --------------------------------- main ------------------------------------

if __name__ == "__main__":
    vocab_size, d_model, max_seq_len = 50, 32, 16
    N, heads, dropout = 2, 4, 0.1
    d_ff = 2048  # FeedForward default d_ff in the PyTorch reference

    B, S_t, S_src = 2, 8, 12

    key = jax.random.PRNGKey(0)
    kp, k1, k2 = jax.random.split(key, 3)
    params = init_params(kp, vocab_size, d_model, max_seq_len, N, d_ff)

    trg = jax.random.randint(k1, (B, S_t), 0, vocab_size, dtype=jnp.int32)
    e_outputs = jax.random.normal(k2, (B, S_src, d_model), jnp.float32)

    # src_mask: (B, 1, S_src) pad mask (second sequence has 3 pad positions)
    src_len = jnp.array([S_src, S_src - 3])
    src_mask = (jnp.arange(S_src)[None, :] < src_len[:, None]).astype(jnp.int32)[:, None, :]
    # trg_mask: (B, S_t, S_t) causal (no-peek) mask
    trg_mask = jnp.broadcast_to(jnp.tril(jnp.ones((S_t, S_t), jnp.int32)), (B, S_t, S_t))

    fwd = jax.jit(functools.partial(decoder_forward, heads=heads))
    out = fwd(params, trg, e_outputs, src_mask, trg_mask)
    out = jax.block_until_ready(out)
    assert out.shape == (B, S_t, d_model) and out.dtype == jnp.float32
    assert bool(jnp.all(jnp.isfinite(out)))
    print("KERNEL_OK")
</pallas_src>

<mosaic_0001>
module attributes {stable_mosaic.version = 11 : i64} {
  func.func @_decoder_kernel(%arg0: i32, %arg1: i32, %arg2: memref<1x8x32xf32, #tpu.memory_space<vmem>>, %arg3: memref<1x12x32xf32, #tpu.memory_space<vmem>>, %arg4: memref<8x32xf32, #tpu.memory_space<vmem>>, %arg5: memref<1x8x8xf32, #tpu.memory_space<vmem>>, %arg6: memref<1x1x12xf32, #tpu.memory_space<vmem>>, %arg7: memref<1x1x32xf32, #tpu.memory_space<vmem>>, %arg8: memref<1x1x32xf32, #tpu.memory_space<vmem>>, %arg9: memref<1x1x32xf32, #tpu.memory_space<vmem>>, %arg10: memref<1x1x32xf32, #tpu.memory_space<vmem>>, %arg11: memref<1x1x32xf32, #tpu.memory_space<vmem>>, %arg12: memref<1x1x32xf32, #tpu.memory_space<vmem>>, %arg13: memref<1x32x96xbf16, #tpu.memory_space<vmem>>, %arg14: memref<1x1x96xf32, #tpu.memory_space<vmem>>, %arg15: memref<1x32x32xbf16, #tpu.memory_space<vmem>>, %arg16: memref<1x1x32xf32, #tpu.memory_space<vmem>>, %arg17: memref<1x32x32xbf16, #tpu.memory_space<vmem>>, %arg18: memref<1x1x32xf32, #tpu.memory_space<vmem>>, %arg19: memref<1x32x64xbf16, #tpu.memory_space<vmem>>, %arg20: memref<1x1x64xf32, #tpu.memory_space<vmem>>, %arg21: memref<1x32x32xbf16, #tpu.memory_space<vmem>>, %arg22: memref<1x1x32xf32, #tpu.memory_space<vmem>>, %arg23: memref<1x32x2048xbf16, #tpu.memory_space<vmem>>, %arg24: memref<1x1x2048xf32, #tpu.memory_space<vmem>>, %arg25: memref<1x2048x32xbf16, #tpu.memory_space<vmem>>, %arg26: memref<1x1x32xf32, #tpu.memory_space<vmem>>, %arg27: memref<1x32xf32, #tpu.memory_space<vmem>>, %arg28: memref<1x32xf32, #tpu.memory_space<vmem>>, %arg29: memref<1x8x32xf32, #tpu.memory_space<vmem>>, %arg30: memref<8x32xf32, #tpu.memory_space<vmem>>) attributes {dimension_semantics = [#tpu.dimension_semantics<parallel>, #tpu.dimension_semantics<arbitrary>], iteration_bounds = array<i64: 2, 2>, scalar_prefetch = 0 : i64, scratch_operands = 1 : i64, tpu.core_type = #tpu.core_type<tc>, window_params = [{transform_indices = @transform_0, window_bounds = array<i64: 1, 8, 32>}, {transform_indices = @transform_1, window_bounds = array<i64: 1, 12, 32>}, {pipeline_mode = #tpu.pipeline_mode<synchronous>, transform_indices = @transform_2, window_bounds = array<i64: 8, 32>}, {transform_indices = @transform_3, window_bounds = array<i64: 1, 8, 8>}, {transform_indices = @transform_4, window_bounds = array<i64: 1, 1, 12>}, {transform_indices = @transform_5, window_bounds = array<i64: 1, 1, 32>}, {transform_indices = @transform_6, window_bounds = array<i64: 1, 1, 32>}, {transform_indices = @transform_7, window_bounds = array<i64: 1, 1, 32>}, {transform_indices = @transform_8, window_bounds = array<i64: 1, 1, 32>}, {transform_indices = @transform_9, window_bounds = array<i64: 1, 1, 32>}, {transform_indices = @transform_10, window_bounds = array<i64: 1, 1, 32>}, {transform_indices = @transform_11, window_bounds = array<i64: 1, 32, 96>}, {transform_indices = @transform_12, window_bounds = array<i64: 1, 1, 96>}, {transform_indices = @transform_13, window_bounds = array<i64: 1, 32, 32>}, {transform_indices = @transform_14, window_bounds = array<i64: 1, 1, 32>}, {transform_indices = @transform_15, window_bounds = array<i64: 1, 32, 32>}, {transform_indices = @transform_16, window_bounds = array<i64: 1, 1, 32>}, {transform_indices = @transform_17, window_bounds = array<i64: 1, 32, 64>}, {transform_indices = @transform_18, window_bounds = array<i64: 1, 1, 64>}, {transform_indices = @transform_19, window_bounds = array<i64: 1, 32, 32>}, {transform_indices = @transform_20, window_bounds = array<i64: 1, 1, 32>}, {transform_indices = @transform_21, window_bounds = array<i64: 1, 32, 2048>}, {transform_indices = @transform_22, window_bounds = array<i64: 1, 1, 2048>}, {transform_indices = @transform_23, window_bounds = array<i64: 1, 2048, 32>}, {transform_indices = @transform_24, window_bounds = array<i64: 1, 1, 32>}, {pipeline_mode = #tpu.pipeline_mode<synchronous>, transform_indices = @transform_25, window_bounds = array<i64: 1, 32>}, {pipeline_mode = #tpu.pipeline_mode<synchronous>, transform_indices = @transform_26, window_bounds = array<i64: 1, 32>}, {transform_indices = @transform_27, window_bounds = array<i64: 1, 8, 32>}]} {
    %c0_i32 = arith.constant 0 : i32
    %0 = arith.cmpi eq, %arg1, %c0_i32 : i32
    %1 = arith.extui %0 : i1 to i32
    %c0_i32_0 = arith.constant 0 : i32
    %2 = arith.cmpi ne, %1, %c0_i32_0 : i32
    scf.if %2 {
      %c0_155 = arith.constant 0 : index
      %c0_156 = arith.constant 0 : index
      %c0_157 = arith.constant 0 : index
      %351 = vector.load %arg2[%c0_155, %c0_156, %c0_157] : memref<1x8x32xf32, #tpu.memory_space<vmem>>, vector<1x8x32xf32>
      %352 = vector.shape_cast %351 : vector<1x8x32xf32> to vector<8x32xf32>
      %cst_158 = arith.constant 5.65685415 : f32
      %353 = vector.broadcast %cst_158 : f32 to vector<8x32xf32>
      %354 = arith.mulf %352, %353 : vector<8x32xf32>
      %c0_159 = arith.constant 0 : index
      %c0_160 = arith.constant 0 : index
      %355 = vector.load %arg4[%c0_159, %c0_160] : memref<8x32xf32, #tpu.memory_space<vmem>>, vector<8x32xf32>
      %356 = arith.addf %354, %355 : vector<8x32xf32>
      %c0_161 = arith.constant 0 : index
      %c0_162 = arith.constant 0 : index
      %c0_163 = arith.constant 0 : index
      %357 = vector.load %arg29[%c0_161, %c0_162, %c0_163] : memref<1x8x32xf32, #tpu.memory_space<vmem>>, vector<1x8x32xf32>
      %358 = vector.shape_cast %357 : vector<1x8x32xf32> to vector<8x32xf32>
      %359 = vector.shape_cast %356 : vector<8x32xf32> to vector<1x8x32xf32>
      tpu.vector_store %arg29[%c0_161, %c0_162, %c0_163], %359 {strides = array<i32>} : memref<1x8x32xf32, #tpu.memory_space<vmem>>, vector<1x8x32xf32>,
    } else {
    }
    %c0 = arith.constant 0 : index
    %c0_1 = arith.constant 0 : index
    %c0_2 = arith.constant 0 : index
    %3 = vector.load %arg29[%c0, %c0_1, %c0_2] : memref<1x8x32xf32, #tpu.memory_space<vmem>>, vector<1x8x32xf32>
    %4 = vector.shape_cast %3 : vector<1x8x32xf32> to vector<8x32xf32>
    %c0_3 = arith.constant 0 : index
    %c0_4 = arith.constant 0 : index
    %c0_5 = arith.constant 0 : index
    %5 = vector.load %arg3[%c0_3, %c0_4, %c0_5] : memref<1x12x32xf32, #tpu.memory_space<vmem>>, vector<1x12x32xf32>
    %6 = vector.shape_cast %5 : vector<1x12x32xf32> to vector<12x32xf32>
    %c0_6 = arith.constant 0 : index
    %c0_7 = arith.constant 0 : index
    %c0_8 = arith.constant 0 : index
    %7 = vector.load %arg5[%c0_6, %c0_7, %c0_8] : memref<1x8x8xf32, #tpu.memory_space<vmem>>, vector<1x8x8xf32>
    %8 = vector.shape_cast %7 : vector<1x8x8xf32> to vector<8x8xf32>
    %c0_9 = arith.constant 0 : index
    %c0_10 = arith.constant 0 : index
    %c0_11 = arith.constant 0 : index
    %9 = vector.load %arg6[%c0_9, %c0_10, %c0_11] : memref<1x1x12xf32, #tpu.memory_space<vmem>>, vector<1x1x12xf32>
    %10 = vector.shape_cast %9 : vector<1x1x12xf32> to vector<1x12xf32>
    %c0_12 = arith.constant 0 : index
    %c0_13 = arith.constant 0 : index
    %c0_14 = arith.constant 0 : index
    %11 = vector.load %arg7[%c0_12, %c0_13, %c0_14] : memref<1x1x32xf32, #tpu.memory_space<vmem>>, vector<1x1x32xf32>
    %12 = vector.shape_cast %11 : vector<1x1x32xf32> to vector<1x32xf32>
    %c0_15 = arith.constant 0 : index
    %c0_16 = arith.constant 0 : index
    %c0_17 = arith.constant 0 : index
    %13 = vector.load %arg8[%c0_15, %c0_16, %c0_17] : memref<1x1x32xf32, #tpu.memory_space<vmem>>, vector<1x1x32xf32>
    %14 = vector.shape_cast %13 : vector<1x1x32xf32> to vector<1x32xf32>
    %cst = arith.constant dense<0.000000e+00> : vector<8xf32>
    %15 = vector.multi_reduction <add>, %4, %cst [1] : vector<8x32xf32> to vector<8xf32>
    %16 = vector.shape_cast %15 : vector<8xf32> to vector<8x1xf32>
    %cst_18 = arith.constant 3.200000e+01 : f32
    %17 = vector.broadcast %cst_18 : f32 to vector<8x1xf32>
    %18 = arith.divf %16, %17 : vector<8x1xf32>
    %19 = vector.broadcast %18 : vector<8x1xf32> to vector<8x32xf32>
    %20 = arith.subf %4, %19 : vector<8x32xf32>
    %21 = arith.mulf %20, %20 : vector<8x32xf32>
    %cst_19 = arith.constant dense<0.000000e+00> : vector<8xf32>
    %22 = vector.multi_reduction <add>, %21, %cst_19 [1] : vector<8x32xf32> to vector<8xf32>
    %23 = vector.shape_cast %22 : vector<8xf32> to vector<8x1xf32>
    %cst_20 = arith.constant 3.100000e+01 : f32
    %24 = vector.broadcast %cst_20 : f32 to vector<8x1xf32>
    %25 = arith.divf %23, %24 : vector<8x1xf32>
    %26 = vector.broadcast %18 : vector<8x1xf32> to vector<8x32xf32>
    %27 = arith.subf %4, %26 : vector<8x32xf32>
    %28 = vector.broadcast %12 : vector<1x32xf32> to vector<8x32xf32>
    %29 = arith.mulf %28, %27 : vector<8x32xf32>
    %30 = math.sqrt %25 : vector<8x1xf32>
    %cst_21 = arith.constant 9.99999997E-7 : f32
    %31 = vector.broadcast %cst_21 : f32 to vector<8x1xf32>
    %32 = arith.addf %30, %31 : vector<8x1xf32>
    %33 = vector.broadcast %32 : vector<8x1xf32> to vector<8x32xf32>
    %34 = arith.divf %29, %33 : vector<8x32xf32>
    %35 = vector.broadcast %14 : vector<1x32xf32> to vector<8x32xf32>
    %36 = arith.addf %34, %35 : vector<8x32xf32>
    %c0_22 = arith.constant 0 : index
    %c0_23 = arith.constant 0 : index
    %c0_24 = arith.constant 0 : index
    %37 = vector.load %arg13[%c0_22, %c0_23, %c0_24] : memref<1x32x96xbf16, #tpu.memory_space<vmem>>, vector<1x32x96xbf16>
    %38 = vector.shape_cast %37 : vector<1x32x96xbf16> to vector<32x96xbf16>
    %39 = arith.truncf %36 : vector<8x32xf32> to vector<8x32xbf16>
    %cst_25 = arith.constant dense<0.000000e+00> : vector<8x96xf32>
    %40 = tpu.matmul %39, %38, %cst_25 {dimension_numbers = #tpu.dot_dimension_numbers<[1], [0], [0], [1], [0, 0, 1, 1], [], []>} : vector<8x32xbf16>, vector<32x96xbf16>, vector<8x96xf32> -> vector<8x96xf32>
    %c0_26 = arith.constant 0 : index
    %c0_27 = arith.constant 0 : index
    %c0_28 = arith.constant 0 : index
    %41 = vector.load %arg14[%c0_26, %c0_27, %c0_28] : memref<1x1x96xf32, #tpu.memory_space<vmem>>, vector<1x1x96xf32>
    %42 = vector.shape_cast %41 : vector<1x1x96xf32> to vector<1x96xf32>
    %43 = vector.broadcast %42 : vector<1x96xf32> to vector<8x96xf32>
    %44 = arith.addf %40, %43 : vector<8x96xf32>
    %45 = vector.extract_strided_slice %44 {offsets = [0, 0], sizes = [8, 32], strides = [1, 1]} : vector<8x96xf32> to vector<8x32xf32>
    %46 = vector.extract_strided_slice %44 {offsets = [0, 32], sizes = [8, 32], strides = [1, 1]} : vector<8x96xf32> to vector<8x32xf32>
    %47 = vector.extract_strided_slice %44 {offsets = [0, 64], sizes = [8, 32], strides = [1, 1]} : vector<8x96xf32> to vector<8x32xf32>
    %48 = vector.extract_strided_slice %45 {offsets = [0, 0], sizes = [8, 8], strides = [1, 1]} : vector<8x32xf32> to vector<8x8xf32>
    %49 = arith.truncf %48 : vector<8x8xf32> to vector<8x8xbf16>
    %50 = vector.extract_strided_slice %46 {offsets = [0, 0], sizes = [8, 8], strides = [1, 1]} : vector<8x32xf32> to vector<8x8xf32>
    %51 = arith.truncf %50 : vector<8x8xf32> to vector<8x8xbf16>
    %52 = vector.extract_strided_slice %47 {offsets = [0, 0], sizes = [8, 8], strides = [1, 1]} : vector<8x32xf32> to vector<8x8xf32>
    %53 = arith.truncf %52 : vector<8x8xf32> to vector<8x8xbf16>
    %cst_29 = arith.constant dense<0.000000e+00> : vector<8x8xf32>
    %54 = tpu.matmul %49, %51, %cst_29 {dimension_numbers = #tpu.dot_dimension_numbers<[1], [1], [0], [0], [0, 0, 1, 0], [], []>} : vector<8x8xbf16>, vector<8x8xbf16>, vector<8x8xf32> -> vector<8x8xf32>
    %cst_30 = arith.constant 0.353553385 : f32
    %55 = vector.broadcast %cst_30 : f32 to vector<8x8xf32>
    %56 = arith.mulf %54, %55 : vector<8x8xf32>
    %57 = arith.addf %56, %8 : vector<8x8xf32>
    %cst_31 = arith.constant dense<0xFF800000> : vector<8xf32>
    %58 = vector.multi_reduction <maximumf>, %57, %cst_31 [1] : vector<8x8xf32> to vector<8xf32>
    %59 = vector.shape_cast %58 : vector<8xf32> to vector<8x1xf32>
    %60 = vector.broadcast %59 : vector<8x1xf32> to vector<8x8xf32>
    %61 = arith.subf %57, %60 : vector<8x8xf32>
    %62 = math.exp %61 : vector<8x8xf32>
    %cst_32 = arith.constant dense<0.000000e+00> : vector<8xf32>
    %63 = vector.multi_reduction <add>, %62, %cst_32 [1] : vector<8x8xf32> to vector<8xf32>
    %64 = vector.shape_cast %63 : vector<8xf32> to vector<8x1xf32>
    %65 = tpu.reciprocal %64 {approx = true} : vector<8x1xf32> -> vector<8x1xf32>
    %66 = vector.broadcast %65 : vector<8x1xf32> to vector<8x8xf32>
    %67 = arith.mulf %62, %66 : vector<8x8xf32>
    %68 = arith.truncf %67 : vector<8x8xf32> to vector<8x8xbf16>
    %cst_33 = arith.constant dense<0.000000e+00> : vector<8x8xf32>
    %69 = tpu.matmul %68, %53, %cst_33 {dimension_numbers = #tpu.dot_dimension_numbers<[1], [0], [0], [1], [0, 0, 1, 1], [], []>} : vector<8x8xbf16>, vector<8x8xbf16>, vector<8x8xf32> -> vector<8x8xf32>
    %c0_34 = arith.constant 0 : index
    %c0_35 = arith.constant 0 : index
    %70 = vector.load %arg30[%c0_34, %c0_35] : memref<8x32xf32, #tpu.memory_space<vmem>>, vector<8x8xf32>
    tpu.vector_store %arg30[%c0_34, %c0_35], %69 {strides = array<i32>} : memref<8x32xf32, #tpu.memory_space<vmem>>, vector<8x8xf32>,
    %71 = vector.extract_strided_slice %45 {offsets = [0, 8], sizes = [8, 8], strides = [1, 1]} : vector<8x32xf32> to vector<8x8xf32>
    %72 = arith.truncf %71 : vector<8x8xf32> to vector<8x8xbf16>
    %73 = vector.extract_strided_slice %46 {offsets = [0, 8], sizes = [8, 8], strides = [1, 1]} : vector<8x32xf32> to vector<8x8xf32>
    %74 = arith.truncf %73 : vector<8x8xf32> to vector<8x8xbf16>
    %75 = vector.extract_strided_slice %47 {offsets = [0, 8], sizes = [8, 8], strides = [1, 1]} : vector<8x32xf32> to vector<8x8xf32>
    %76 = arith.truncf %75 : vector<8x8xf32> to vector<8x8xbf16>
    %cst_36 = arith.constant dense<0.000000e+00> : vector<8x8xf32>
    %77 = tpu.matmul %72, %74, %cst_36 {dimension_numbers = #tpu.dot_dimension_numbers<[1], [1], [0], [0], [0, 0, 1, 0], [], []>} : vector<8x8xbf16>, vector<8x8xbf16>, vector<8x8xf32> -> vector<8x8xf32>
    %cst_37 = arith.constant 0.353553385 : f32
    %78 = vector.broadcast %cst_37 : f32 to vector<8x8xf32>
    %79 = arith.mulf %77, %78 : vector<8x8xf32>
    %80 = arith.addf %79, %8 : vector<8x8xf32>
    %cst_38 = arith.constant dense<0xFF800000> : vector<8xf32>
    %81 = vector.multi_reduction <maximumf>, %80, %cst_38 [1] : vector<8x8xf32> to vector<8xf32>
    %82 = vector.shape_cast %81 : vector<8xf32> to vector<8x1xf32>
    %83 = vector.broadcast %82 : vector<8x1xf32> to vector<8x8xf32>
    %84 = arith.subf %80, %83 : vector<8x8xf32>
    %85 = math.exp %84 : vector<8x8xf32>
    %cst_39 = arith.constant dense<0.000000e+00> : vector<8xf32>
    %86 = vector.multi_reduction <add>, %85, %cst_39 [1] : vector<8x8xf32> to vector<8xf32>
    %87 = vector.shape_cast %86 : vector<8xf32> to vector<8x1xf32>
    %88 = tpu.reciprocal %87 {approx = true} : vector<8x1xf32> -> vector<8x1xf32>
    %89 = vector.broadcast %88 : vector<8x1xf32> to vector<8x8xf32>
    %90 = arith.mulf %85, %89 : vector<8x8xf32>
    %91 = arith.truncf %90 : vector<8x8xf32> to vector<8x8xbf16>
    %cst_40 = arith.constant dense<0.000000e+00> : vector<8x8xf32>
    %92 = tpu.matmul %91, %76, %cst_40 {dimension_numbers = #tpu.dot_dimension_numbers<[1], [0], [0], [1], [0, 0, 1, 1], [], []>} : vector<8x8xbf16>, vector<8x8xbf16>, vector<8x8xf32> -> vector<8x8xf32>
    %c0_41 = arith.constant 0 : index
    %c8 = arith.constant 8 : index
    %93 = vector.load %arg30[%c0_41, %c8] : memref<8x32xf32, #tpu.memory_space<vmem>>, vector<8x8xf32>
    tpu.vector_store %arg30[%c0_41, %c8], %92 {strides = array<i32>} : memref<8x32xf32, #tpu.memory_space<vmem>>, vector<8x8xf32>,
    %94 = vector.extract_strided_slice %45 {offsets = [0, 16], sizes = [8, 8], strides = [1, 1]} : vector<8x32xf32> to vector<8x8xf32>
    %95 = arith.truncf %94 : vector<8x8xf32> to vector<8x8xbf16>
    %96 = vector.extract_strided_slice %46 {offsets = [0, 16], sizes = [8, 8], strides = [1, 1]} : vector<8x32xf32> to vector<8x8xf32>
    %97 = arith.truncf %96 : vector<8x8xf32> to vector<8x8xbf16>
    %98 = vector.extract_strided_slice %47 {offsets = [0, 16], sizes = [8, 8], strides = [1, 1]} : vector<8x32xf32> to vector<8x8xf32>
    %99 = arith.truncf %98 : vector<8x8xf32> to vector<8x8xbf16>
    %cst_42 = arith.constant dense<0.000000e+00> : vector<8x8xf32>
    %100 = tpu.matmul %95, %97, %cst_42 {dimension_numbers = #tpu.dot_dimension_numbers<[1], [1], [0], [0], [0, 0, 1, 0], [], []>} : vector<8x8xbf16>, vector<8x8xbf16>, vector<8x8xf32> -> vector<8x8xf32>
    %cst_43 = arith.constant 0.353553385 : f32
    %101 = vector.broadcast %cst_43 : f32 to vector<8x8xf32>
    %102 = arith.mulf %100, %101 : vector<8x8xf32>
    %103 = arith.addf %102, %8 : vector<8x8xf32>
    %cst_44 = arith.constant dense<0xFF800000> : vector<8xf32>
    %104 = vector.multi_reduction <maximumf>, %103, %cst_44 [1] : vector<8x8xf32> to vector<8xf32>
    %105 = vector.shape_cast %104 : vector<8xf32> to vector<8x1xf32>
    %106 = vector.broadcast %105 : vector<8x1xf32> to vector<8x8xf32>
    %107 = arith.subf %103, %106 : vector<8x8xf32>
    %108 = math.exp %107 : vector<8x8xf32>
    %cst_45 = arith.constant dense<0.000000e+00> : vector<8xf32>
    %109 = vector.multi_reduction <add>, %108, %cst_45 [1] : vector<8x8xf32> to vector<8xf32>
    %110 = vector.shape_cast %109 : vector<8xf32> to vector<8x1xf32>
    %111 = tpu.reciprocal %110 {approx = true} : vector<8x1xf32> -> vector<8x1xf32>
    %112 = vector.broadcast %111 : vector<8x1xf32> to vector<8x8xf32>
    %113 = arith.mulf %108, %112 : vector<8x8xf32>
    %114 = arith.truncf %113 : vector<8x8xf32> to vector<8x8xbf16>
    %cst_46 = arith.constant dense<0.000000e+00> : vector<8x8xf32>
    %115 = tpu.matmul %114, %99, %cst_46 {dimension_numbers = #tpu.dot_dimension_numbers<[1], [0], [0], [1], [0, 0, 1, 1], [], []>} : vector<8x8xbf16>, vector<8x8xbf16>, vector<8x8xf32> -> vector<8x8xf32>
    %c0_47 = arith.constant 0 : index
    %c16 = arith.constant 16 : index
    %116 = vector.load %arg30[%c0_47, %c16] : memref<8x32xf32, #tpu.memory_space<vmem>>, vector<8x8xf32>
    tpu.vector_store %arg30[%c0_47, %c16], %115 {strides = array<i32>} : memref<8x32xf32, #tpu.memory_space<vmem>>, vector<8x8xf32>,
    %117 = vector.extract_strided_slice %45 {offsets = [0, 24], sizes = [8, 8], strides = [1, 1]} : vector<8x32xf32> to vector<8x8xf32>
    %118 = arith.truncf %117 : vector<8x8xf32> to vector<8x8xbf16>
    %119 = vector.extract_strided_slice %46 {offsets = [0, 24], sizes = [8, 8], strides = [1, 1]} : vector<8x32xf32> to vector<8x8xf32>
    %120 = arith.truncf %119 : vector<8x8xf32> to vector<8x8xbf16>
    %121 = vector.extract_strided_slice %47 {offsets = [0, 24], sizes = [8, 8], strides = [1, 1]} : vector<8x32xf32> to vector<8x8xf32>
    %122 = arith.truncf %121 : vector<8x8xf32> to vector<8x8xbf16>
    %cst_48 = arith.constant dense<0.000000e+00> : vector<8x8xf32>
    %123 = tpu.matmul %118, %120, %cst_48 {dimension_numbers = #tpu.dot_dimension_numbers<[1], [1], [0], [0], [0, 0, 1, 0], [], []>} : vector<8x8xbf16>, vector<8x8xbf16>, vector<8x8xf32> -> vector<8x8xf32>
    %cst_49 = arith.constant 0.353553385 : f32
    %124 = vector.broadcast %cst_49 : f32 to vector<8x8xf32>
    %125 = arith.mulf %123, %124 : vector<8x8xf32>
    %126 = arith.addf %125, %8 : vector<8x8xf32>
    %cst_50 = arith.constant dense<0xFF800000> : vector<8xf32>
    %127 = vector.multi_reduction <maximumf>, %126, %cst_50 [1] : vector<8x8xf32> to vector<8xf32>
    %128 = vector.shape_cast %127 : vector<8xf32> to vector<8x1xf32>
    %129 = vector.broadcast %128 : vector<8x1xf32> to vector<8x8xf32>
    %130 = arith.subf %126, %129 : vector<8x8xf32>
    %131 = math.exp %130 : vector<8x8xf32>
    %cst_51 = arith.constant dense<0.000000e+00> : vector<8xf32>
    %132 = vector.multi_reduction <add>, %131, %cst_51 [1] : vector<8x8xf32> to vector<8xf32>
    %133 = vector.shape_cast %132 : vector<8xf32> to vector<8x1xf32>
    %134 = tpu.reciprocal %133 {approx = true} : vector<8x1xf32> -> vector<8x1xf32>
    %135 = vector.broadcast %134 : vector<8x1xf32> to vector<8x8xf32>
    %136 = arith.mulf %131, %135 : vector<8x8xf32>
    %137 = arith.truncf %136 : vector<8x8xf32> to vector<8x8xbf16>
    %cst_52 = arith.constant dense<0.000000e+00> : vector<8x8xf32>
    %138 = tpu.matmul %137, %122, %cst_52 {dimension_numbers = #tpu.dot_dimension_numbers<[1], [0], [0], [1], [0, 0, 1, 1], [], []>} : vector<8x8xbf16>, vector<8x8xbf16>, vector<8x8xf32> -> vector<8x8xf32>
    %c0_53 = arith.constant 0 : index
    %c24 = arith.constant 24 : index
    %139 = vector.load %arg30[%c0_53, %c24] : memref<8x32xf32, #tpu.memory_space<vmem>>, vector<8x8xf32>
    tpu.vector_store %arg30[%c0_53, %c24], %138 {strides = array<i32>} : memref<8x32xf32, #tpu.memory_space<vmem>>, vector<8x8xf32>,
    %c0_54 = arith.constant 0 : index
    %c0_55 = arith.constant 0 : index
    %140 = vector.load %arg30[%c0_54, %c0_55] : memref<8x32xf32, #tpu.memory_space<vmem>>, vector<8x32xf32>
    %c0_56 = arith.constant 0 : index
    %c0_57 = arith.constant 0 : index
    %c0_58 = arith.constant 0 : index
    %141 = vector.load %arg15[%c0_56, %c0_57, %c0_58] : memref<1x32x32xbf16, #tpu.memory_space<vmem>>, vector<1x32x32xbf16>
    %142 = vector.shape_cast %141 : vector<1x32x32xbf16> to vector<32x32xbf16>
    %143 = arith.truncf %140 : vector<8x32xf32> to vector<8x32xbf16>
    %cst_59 = arith.constant dense<0.000000e+00> : vector<8x32xf32>
    %144 = tpu.matmul %143, %142, %cst_59 {dimension_numbers = #tpu.dot_dimension_numbers<[1], [0], [0], [1], [0, 0, 1, 1], [], []>} : vector<8x32xbf16>, vector<32x32xbf16>, vector<8x32xf32> -> vector<8x32xf32>
    %145 = arith.addf %4, %144 : vector<8x32xf32>
    %c0_60 = arith.constant 0 : index
    %c0_61 = arith.constant 0 : index
    %c0_62 = arith.constant 0 : index
    %146 = vector.load %arg16[%c0_60, %c0_61, %c0_62] : memref<1x1x32xf32, #tpu.memory_space<vmem>>, vector<1x1x32xf32>
    %147 = vector.shape_cast %146 : vector<1x1x32xf32> to vector<1x32xf32>
    %148 = vector.broadcast %147 : vector<1x32xf32> to vector<8x32xf32>
    %149 = arith.addf %145, %148 : vector<8x32xf32>
    %c0_63 = arith.constant 0 : index
    %c0_64 = arith.constant 0 : index
    %c0_65 = arith.constant 0 : index
    %150 = vector.load %arg9[%c0_63, %c0_64, %c0_65] : memref<1x1x32xf32, #tpu.memory_space<vmem>>, vector<1x1x32xf32>
    %151 = vector.shape_cast %150 : vector<1x1x32xf32> to vector<1x32xf32>
    %c0_66 = arith.constant 0 : index
    %c0_67 = arith.constant 0 : index
    %c0_68 = arith.constant 0 : index
    %152 = vector.load %arg10[%c0_66, %c0_67, %c0_68] : memref<1x1x32xf32, #tpu.memory_space<vmem>>, vector<1x1x32xf32>
    %153 = vector.shape_cast %152 : vector<1x1x32xf32> to vector<1x32xf32>
    %cst_69 = arith.constant dense<0.000000e+00> : vector<8xf32>
    %154 = vector.multi_reduction <add>, %149, %cst_69 [1] : vector<8x32xf32> to vector<8xf32>
    %155 = vector.shape_cast %154 : vector<8xf32> to vector<8x1xf32>
    %cst_70 = arith.constant 3.200000e+01 : f32
    %156 = vector.broadcast %cst_70 : f32 to vector<8x1xf32>
    %157 = arith.divf %155, %156 : vector<8x1xf32>
    %158 = vector.broadcast %157 : vector<8x1xf32> to vector<8x32xf32>
    %159 = arith.subf %149, %158 : vector<8x32xf32>
    %160 = arith.mulf %159, %159 : vector<8x32xf32>
    %cst_71 = arith.constant dense<0.000000e+00> : vector<8xf32>
    %161 = vector.multi_reduction <add>, %160, %cst_71 [1] : vector<8x32xf32> to vector<8xf32>
    %162 = vector.shape_cast %161 : vector<8xf32> to vector<8x1xf32>
    %cst_72 = arith.constant 3.100000e+01 : f32
    %163 = vector.broadcast %cst_72 : f32 to vector<8x1xf32>
    %164 = arith.divf %162, %163 : vector<8x1xf32>
    %165 = vector.broadcast %157 : vector<8x1xf32> to vector<8x32xf32>
    %166 = arith.subf %149, %165 : vector<8x32xf32>
    %167 = vector.broadcast %151 : vector<1x32xf32> to vector<8x32xf32>
    %168 = arith.mulf %167, %166 : vector<8x32xf32>
    %169 = math.sqrt %164 : vector<8x1xf32>
    %cst_73 = arith.constant 9.99999997E-7 : f32
    %170 = vector.broadcast %cst_73 : f32 to vector<8x1xf32>
    %171 = arith.addf %169, %170 : vector<8x1xf32>
    %172 = vector.broadcast %171 : vector<8x1xf32> to vector<8x32xf32>
    %173 = arith.divf %168, %172 : vector<8x32xf32>
    %174 = vector.broadcast %153 : vector<1x32xf32> to vector<8x32xf32>
    %175 = arith.addf %173, %174 : vector<8x32xf32>
    %c0_74 = arith.constant 0 : index
    %c0_75 = arith.constant 0 : index
    %c0_76 = arith.constant 0 : index
    %176 = vector.load %arg17[%c0_74, %c0_75, %c0_76] : memref<1x32x32xbf16, #tpu.memory_space<vmem>>, vector<1x32x32xbf16>
    %177 = vector.shape_cast %176 : vector<1x32x32xbf16> to vector<32x32xbf16>
    %178 = arith.truncf %175 : vector<8x32xf32> to vector<8x32xbf16>
    %cst_77 = arith.constant dense<0.000000e+00> : vector<8x32xf32>
    %179 = tpu.matmul %178, %177, %cst_77 {dimension_numbers = #tpu.dot_dimension_numbers<[1], [0], [0], [1], [0, 0, 1, 1], [], []>} : vector<8x32xbf16>, vector<32x32xbf16>, vector<8x32xf32> -> vector<8x32xf32>
    %c0_78 = arith.constant 0 : index
    %c0_79 = arith.constant 0 : index
    %c0_80 = arith.constant 0 : index
    %180 = vector.load %arg18[%c0_78, %c0_79, %c0_80] : memref<1x1x32xf32, #tpu.memory_space<vmem>>, vector<1x1x32xf32>
    %181 = vector.shape_cast %180 : vector<1x1x32xf32> to vector<1x32xf32>
    %182 = vector.broadcast %181 : vector<1x32xf32> to vector<8x32xf32>
    %183 = arith.addf %179, %182 : vector<8x32xf32>
    %c0_81 = arith.constant 0 : index
    %c0_82 = arith.constant 0 : index
    %c0_83 = arith.constant 0 : index
    %184 = vector.load %arg19[%c0_81, %c0_82, %c0_83] : memref<1x32x64xbf16, #tpu.memory_space<vmem>>, vector<1x32x64xbf16>
    %185 = vector.shape_cast %184 : vector<1x32x64xbf16> to vector<32x64xbf16>
    %186 = arith.truncf %6 : vector<12x32xf32> to vector<12x32xbf16>
    %cst_84 = arith.constant dense<0.000000e+00> : vector<12x64xf32>
    %187 = tpu.matmul %186, %185, %cst_84 {dimension_numbers = #tpu.dot_dimension_numbers<[1], [0], [0], [1], [0, 0, 1, 1], [], []>} : vector<12x32xbf16>, vector<32x64xbf16>, vector<12x64xf32> -> vector<12x64xf32>
    %c0_85 = arith.constant 0 : index
    %c0_86 = arith.constant 0 : index
    %c0_87 = arith.constant 0 : index
    %188 = vector.load %arg20[%c0_85, %c0_86, %c0_87] : memref<1x1x64xf32, #tpu.memory_space<vmem>>, vector<1x1x64xf32>
    %189 = vector.shape_cast %188 : vector<1x1x64xf32> to vector<1x64xf32>
    %190 = vector.broadcast %189 : vector<1x64xf32> to vector<12x64xf32>
    %191 = arith.addf %187, %190 : vector<12x64xf32>
    %192 = vector.extract_strided_slice %191 {offsets = [0, 0], sizes = [12, 32], strides = [1, 1]} : vector<12x64xf32> to vector<12x32xf32>
    %193 = vector.extract_strided_slice %191 {offsets = [0, 32], sizes = [12, 32], strides = [1, 1]} : vector<12x64xf32> to vector<12x32xf32>
    %194 = vector.extract_strided_slice %183 {offsets = [0, 0], sizes = [8, 8], strides = [1, 1]} : vector<8x32xf32> to vector<8x8xf32>
    %195 = arith.truncf %194 : vector<8x8xf32> to vector<8x8xbf16>
    %196 = vector.extract_strided_slice %192 {offsets = [0, 0], sizes = [12, 8], strides = [1, 1]} : vector<12x32xf32> to vector<12x8xf32>
    %197 = arith.truncf %196 : vector<12x8xf32> to vector<12x8xbf16>
    %198 = vector.extract_strided_slice %193 {offsets = [0, 0], sizes = [12, 8], strides = [1, 1]} : vector<12x32xf32> to vector<12x8xf32>
    %199 = arith.truncf %198 : vector<12x8xf32> to vector<12x8xbf16>
    %cst_88 = arith.constant dense<0.000000e+00> : vector<8x12xf32>
    %200 = tpu.matmul %195, %197, %cst_88 {dimension_numbers = #tpu.dot_dimension_numbers<[1], [1], [0], [0], [0, 0, 1, 0], [], []>} : vector<8x8xbf16>, vector<12x8xbf16>, vector<8x12xf32> -> vector<8x12xf32>
    %cst_89 = arith.constant 0.353553385 : f32
    %201 = vector.broadcast %cst_89 : f32 to vector<8x12xf32>
    %202 = arith.mulf %200, %201 : vector<8x12xf32>
    %203 = vector.broadcast %10 : vector<1x12xf32> to vector<8x12xf32>
    %204 = arith.addf %202, %203 : vector<8x12xf32>
    %cst_90 = arith.constant dense<0xFF800000> : vector<8xf32>
    %205 = vector.multi_reduction <maximumf>, %204, %cst_90 [1] : vector<8x12xf32> to vector<8xf32>
    %206 = vector.shape_cast %205 : vector<8xf32> to vector<8x1xf32>
    %207 = vector.broadcast %206 : vector<8x1xf32> to vector<8x12xf32>
    %208 = arith.subf %204, %207 : vector<8x12xf32>
    %209 = math.exp %208 : vector<8x12xf32>
    %cst_91 = arith.constant dense<0.000000e+00> : vector<8xf32>
    %210 = vector.multi_reduction <add>, %209, %cst_91 [1] : vector<8x12xf32> to vector<8xf32>
    %211 = vector.shape_cast %210 : vector<8xf32> to vector<8x1xf32>
    %212 = tpu.reciprocal %211 {approx = true} : vector<8x1xf32> -> vector<8x1xf32>
    %213 = vector.broadcast %212 : vector<8x1xf32> to vector<8x12xf32>
    %214 = arith.mulf %209, %213 : vector<8x12xf32>
    %215 = arith.truncf %214 : vector<8x12xf32> to vector<8x12xbf16>
    %cst_92 = arith.constant dense<0.000000e+00> : vector<8x8xf32>
    %216 = tpu.matmul %215, %199, %cst_92 {dimension_numbers = #tpu.dot_dimension_numbers<[1], [0], [0], [1], [0, 0, 1, 1], [], []>} : vector<8x12xbf16>, vector<12x8xbf16>, vector<8x8xf32> -> vector<8x8xf32>
    %c0_93 = arith.constant 0 : index
    %c0_94 = arith.constant 0 : index
    %217 = vector.load %arg30[%c0_93, %c0_94] : memref<8x32xf32, #tpu.memory_space<vmem>>, vector<8x8xf32>
    tpu.vector_store %arg30[%c0_93, %c0_94], %216 {strides = array<i32>} : memref<8x32xf32, #tpu.memory_space<vmem>>, vector<8x8xf32>,
    %218 = vector.extract_strided_slice %183 {offsets = [0, 8], sizes = [8, 8], strides = [1, 1]} : vector<8x32xf32> to vector<8x8xf32>
    %219 = arith.truncf %218 : vector<8x8xf32> to vector<8x8xbf16>
    %220 = vector.extract_strided_slice %192 {offsets = [0, 8], sizes = [12, 8], strides = [1, 1]} : vector<12x32xf32> to vector<12x8xf32>
    %221 = arith.truncf %220 : vector<12x8xf32> to vector<12x8xbf16>
    %222 = vector.extract_strided_slice %193 {offsets = [0, 8], sizes = [12, 8], strides = [1, 1]} : vector<12x32xf32> to vector<12x8xf32>
    %223 = arith.truncf %222 : vector<12x8xf32> to vector<12x8xbf16>
    %cst_95 = arith.constant dense<0.000000e+00> : vector<8x12xf32>
    %224 = tpu.matmul %219, %221, %cst_95 {dimension_numbers = #tpu.dot_dimension_numbers<[1], [1], [0], [0], [0, 0, 1, 0], [], []>} : vector<8x8xbf16>, vector<12x8xbf16>, vector<8x12xf32> -> vector<8x12xf32>
    %cst_96 = arith.constant 0.353553385 : f32
    %225 = vector.broadcast %cst_96 : f32 to vector<8x12xf32>
    %226 = arith.mulf %224, %225 : vector<8x12xf32>
    %227 = vector.broadcast %10 : vector<1x12xf32> to vector<8x12xf32>
    %228 = arith.addf %226, %227 : vector<8x12xf32>
    %cst_97 = arith.constant dense<0xFF800000> : vector<8xf32>
    %229 = vector.multi_reduction <maximumf>, %228, %cst_97 [1] : vector<8x12xf32> to vector<8xf32>
    %230 = vector.shape_cast %229 : vector<8xf32> to vector<8x1xf32>
    %231 = vector.broadcast %230 : vector<8x1xf32> to vector<8x12xf32>
    %232 = arith.subf %228, %231 : vector<8x12xf32>
    %233 = math.exp %232 : vector<8x12xf32>
    %cst_98 = arith.constant dense<0.000000e+00> : vector<8xf32>
    %234 = vector.multi_reduction <add>, %233, %cst_98 [1] : vector<8x12xf32> to vector<8xf32>
    %235 = vector.shape_cast %234 : vector<8xf32> to vector<8x1xf32>
    %236 = tpu.reciprocal %235 {approx = true} : vector<8x1xf32> -> vector<8x1xf32>
    %237 = vector.broadcast %236 : vector<8x1xf32> to vector<8x12xf32>
    %238 = arith.mulf %233, %237 : vector<8x12xf32>
    %239 = arith.truncf %238 : vector<8x12xf32> to vector<8x12xbf16>
    %cst_99 = arith.constant dense<0.000000e+00> : vector<8x8xf32>
    %240 = tpu.matmul %239, %223, %cst_99 {dimension_numbers = #tpu.dot_dimension_numbers<[1], [0], [0], [1], [0, 0, 1, 1], [], []>} : vector<8x12xbf16>, vector<12x8xbf16>, vector<8x8xf32> -> vector<8x8xf32>
    %c0_100 = arith.constant 0 : index
    %c8_101 = arith.constant 8 : index
    %241 = vector.load %arg30[%c0_100, %c8_101] : memref<8x32xf32, #tpu.memory_space<vmem>>, vector<8x8xf32>
    tpu.vector_store %arg30[%c0_100, %c8_101], %240 {strides = array<i32>} : memref<8x32xf32, #tpu.memory_space<vmem>>, vector<8x8xf32>,
    %242 = vector.extract_strided_slice %183 {offsets = [0, 16], sizes = [8, 8], strides = [1, 1]} : vector<8x32xf32> to vector<8x8xf32>
    %243 = arith.truncf %242 : vector<8x8xf32> to vector<8x8xbf16>
    %244 = vector.extract_strided_slice %192 {offsets = [0, 16], sizes = [12, 8], strides = [1, 1]} : vector<12x32xf32> to vector<12x8xf32>
    %245 = arith.truncf %244 : vector<12x8xf32> to vector<12x8xbf16>
    %246 = vector.extract_strided_slice %193 {offsets = [0, 16], sizes = [12, 8], strides = [1, 1]} : vector<12x32xf32> to vector<12x8xf32>
    %247 = arith.truncf %246 : vector<12x8xf32> to vector<12x8xbf16>
    %cst_102 = arith.constant dense<0.000000e+00> : vector<8x12xf32>
    %248 = tpu.matmul %243, %245, %cst_102 {dimension_numbers = #tpu.dot_dimension_numbers<[1], [1], [0], [0], [0, 0, 1, 0], [], []>} : vector<8x8xbf16>, vector<12x8xbf16>, vector<8x12xf32> -> vector<8x12xf32>
    %cst_103 = arith.constant 0.353553385 : f32
    %249 = vector.broadcast %cst_103 : f32 to vector<8x12xf32>
    %250 = arith.mulf %248, %249 : vector<8x12xf32>
    %251 = vector.broadcast %10 : vector<1x12xf32> to vector<8x12xf32>
    %252 = arith.addf %250, %251 : vector<8x12xf32>
    %cst_104 = arith.constant dense<0xFF800000> : vector<8xf32>
    %253 = vector.multi_reduction <maximumf>, %252, %cst_104 [1] : vector<8x12xf32> to vector<8xf32>
    %254 = vector.shape_cast %253 : vector<8xf32> to vector<8x1xf32>
    %255 = vector.broadcast %254 : vector<8x1xf32> to vector<8x12xf32>
    %256 = arith.subf %252, %255 : vector<8x12xf32>
    %257 = math.exp %256 : vector<8x12xf32>
    %cst_105 = arith.constant dense<0.000000e+00> : vector<8xf32>
    %258 = vector.multi_reduction <add>, %257, %cst_105 [1] : vector<8x12xf32> to vector<8xf32>
    %259 = vector.shape_cast %258 : vector<8xf32> to vector<8x1xf32>
    %260 = tpu.reciprocal %259 {approx = true} : vector<8x1xf32> -> vector<8x1xf32>
    %261 = vector.broadcast %260 : vector<8x1xf32> to vector<8x12xf32>
    %262 = arith.mulf %257, %261 : vector<8x12xf32>
    %263 = arith.truncf %262 : vector<8x12xf32> to vector<8x12xbf16>
    %cst_106 = arith.constant dense<0.000000e+00> : vector<8x8xf32>
    %264 = tpu.matmul %263, %247, %cst_106 {dimension_numbers = #tpu.dot_dimension_numbers<[1], [0], [0], [1], [0, 0, 1, 1], [], []>} : vector<8x12xbf16>, vector<12x8xbf16>, vector<8x8xf32> -> vector<8x8xf32>
    %c0_107 = arith.constant 0 : index
    %c16_108 = arith.constant 16 : index
    %265 = vector.load %arg30[%c0_107, %c16_108] : memref<8x32xf32, #tpu.memory_space<vmem>>, vector<8x8xf32>
    tpu.vector_store %arg30[%c0_107, %c16_108], %264 {strides = array<i32>} : memref<8x32xf32, #tpu.memory_space<vmem>>, vector<8x8xf32>,
    %266 = vector.extract_strided_slice %183 {offsets = [0, 24], sizes = [8, 8], strides = [1, 1]} : vector<8x32xf32> to vector<8x8xf32>
    %267 = arith.truncf %266 : vector<8x8xf32> to vector<8x8xbf16>
    %268 = vector.extract_strided_slice %192 {offsets = [0, 24], sizes = [12, 8], strides = [1, 1]} : vector<12x32xf32> to vector<12x8xf32>
    %269 = arith.truncf %268 : vector<12x8xf32> to vector<12x8xbf16>
    %270 = vector.extract_strided_slice %193 {offsets = [0, 24], sizes = [12, 8], strides = [1, 1]} : vector<12x32xf32> to vector<12x8xf32>
    %271 = arith.truncf %270 : vector<12x8xf32> to vector<12x8xbf16>
    %cst_109 = arith.constant dense<0.000000e+00> : vector<8x12xf32>
    %272 = tpu.matmul %267, %269, %cst_109 {dimension_numbers = #tpu.dot_dimension_numbers<[1], [1], [0], [0], [0, 0, 1, 0], [], []>} : vector<8x8xbf16>, vector<12x8xbf16>, vector<8x12xf32> -> vector<8x12xf32>
    %cst_110 = arith.constant 0.353553385 : f32
    %273 = vector.broadcast %cst_110 : f32 to vector<8x12xf32>
    %274 = arith.mulf %272, %273 : vector<8x12xf32>
    %275 = vector.broadcast %10 : vector<1x12xf32> to vector<8x12xf32>
    %276 = arith.addf %274, %275 : vector<8x12xf32>
    %cst_111 = arith.constant dense<0xFF800000> : vector<8xf32>
    %277 = vector.multi_reduction <maximumf>, %276, %cst_111 [1] : vector<8x12xf32> to vector<8xf32>
    %278 = vector.shape_cast %277 : vector<8xf32> to vector<8x1xf32>
    %279 = vector.broadcast %278 : vector<8x1xf32> to vector<8x12xf32>
    %280 = arith.subf %276, %279 : vector<8x12xf32>
    %281 = math.exp %280 : vector<8x12xf32>
    %cst_112 = arith.constant dense<0.000000e+00> : vector<8xf32>
    %282 = vector.multi_reduction <add>, %281, %cst_112 [1] : vector<8x12xf32> to vector<8xf32>
    %283 = vector.shape_cast %282 : vector<8xf32> to vector<8x1xf32>
    %284 = tpu.reciprocal %283 {approx = true} : vector<8x1xf32> -> vector<8x1xf32>
    %285 = vector.broadcast %284 : vector<8x1xf32> to vector<8x12xf32>
    %286 = arith.mulf %281, %285 : vector<8x12xf32>
    %287 = arith.truncf %286 : vector<8x12xf32> to vector<8x12xbf16>
    %cst_113 = arith.constant dense<0.000000e+00> : vector<8x8xf32>
    %288 = tpu.matmul %287, %271, %cst_113 {dimension_numbers = #tpu.dot_dimension_numbers<[1], [0], [0], [1], [0, 0, 1, 1], [], []>} : vector<8x12xbf16>, vector<12x8xbf16>, vector<8x8xf32> -> vector<8x8xf32>
    %c0_114 = arith.constant 0 : index
    %c24_115 = arith.constant 24 : index
    %289 = vector.load %arg30[%c0_114, %c24_115] : memref<8x32xf32, #tpu.memory_space<vmem>>, vector<8x8xf32>
    tpu.vector_store %arg30[%c0_114, %c24_115], %288 {strides = array<i32>} : memref<8x32xf32, #tpu.memory_space<vmem>>, vector<8x8xf32>,
    %c0_116 = arith.constant 0 : index
    %c0_117 = arith.constant 0 : index
    %290 = vector.load %arg30[%c0_116, %c0_117] : memref<8x32xf32, #tpu.memory_space<vmem>>, vector<8x32xf32>
    %c0_118 = arith.constant 0 : index
    %c0_119 = arith.constant 0 : index
    %c0_120 = arith.constant 0 : index
    %291 = vector.load %arg21[%c0_118, %c0_119, %c0_120] : memref<1x32x32xbf16, #tpu.memory_space<vmem>>, vector<1x32x32xbf16>
    %292 = vector.shape_cast %291 : vector<1x32x32xbf16> to vector<32x32xbf16>
    %293 = arith.truncf %290 : vector<8x32xf32> to vector<8x32xbf16>
    %cst_121 = arith.constant dense<0.000000e+00> : vector<8x32xf32>
    %294 = tpu.matmul %293, %292, %cst_121 {dimension_numbers = #tpu.dot_dimension_numbers<[1], [0], [0], [1], [0, 0, 1, 1], [], []>} : vector<8x32xbf16>, vector<32x32xbf16>, vector<8x32xf32> -> vector<8x32xf32>
    %295 = arith.addf %149, %294 : vector<8x32xf32>
    %c0_122 = arith.constant 0 : index
    %c0_123 = arith.constant 0 : index
    %c0_124 = arith.constant 0 : index
    %296 = vector.load %arg22[%c0_122, %c0_123, %c0_124] : memref<1x1x32xf32, #tpu.memory_space<vmem>>, vector<1x1x32xf32>
    %297 = vector.shape_cast %296 : vector<1x1x32xf32> to vector<1x32xf32>
    %298 = vector.broadcast %297 : vector<1x32xf32> to vector<8x32xf32>
    %299 = arith.addf %295, %298 : vector<8x32xf32>
    %c0_125 = arith.constant 0 : index
    %c0_126 = arith.constant 0 : index
    %c0_127 = arith.constant 0 : index
    %300 = vector.load %arg11[%c0_125, %c0_126, %c0_127] : memref<1x1x32xf32, #tpu.memory_space<vmem>>, vector<1x1x32xf32>
    %301 = vector.shape_cast %300 : vector<1x1x32xf32> to vector<1x32xf32>
    %c0_128 = arith.constant 0 : index
    %c0_129 = arith.constant 0 : index
    %c0_130 = arith.constant 0 : index
    %302 = vector.load %arg12[%c0_128, %c0_129, %c0_130] : memref<1x1x32xf32, #tpu.memory_space<vmem>>, vector<1x1x32xf32>
    %303 = vector.shape_cast %302 : vector<1x1x32xf32> to vector<1x32xf32>
    %cst_131 = arith.constant dense<0.000000e+00> : vector<8xf32>
    %304 = vector.multi_reduction <add>, %299, %cst_131 [1] : vector<8x32xf32> to vector<8xf32>
    %305 = vector.shape_cast %304 : vector<8xf32> to vector<8x1xf32>
    %cst_132 = arith.constant 3.200000e+01 : f32
    %306 = vector.broadcast %cst_132 : f32 to vector<8x1xf32>
    %307 = arith.divf %305, %306 : vector<8x1xf32>
    %308 = vector.broadcast %307 : vector<8x1xf32> to vector<8x32xf32>
    %309 = arith.subf %299, %308 : vector<8x32xf32>
    %310 = arith.mulf %309, %309 : vector<8x32xf32>
    %cst_133 = arith.constant dense<0.000000e+00> : vector<8xf32>
    %311 = vector.multi_reduction <add>, %310, %cst_133 [1] : vector<8x32xf32> to vector<8xf32>
    %312 = vector.shape_cast %311 : vector<8xf32> to vector<8x1xf32>
    %cst_134 = arith.constant 3.100000e+01 : f32
    %313 = vector.broadcast %cst_134 : f32 to vector<8x1xf32>
    %314 = arith.divf %312, %313 : vector<8x1xf32>
    %315 = vector.broadcast %307 : vector<8x1xf32> to vector<8x32xf32>
    %316 = arith.subf %299, %315 : vector<8x32xf32>
    %317 = vector.broadcast %301 : vector<1x32xf32> to vector<8x32xf32>
    %318 = arith.mulf %317, %316 : vector<8x32xf32>
    %319 = math.sqrt %314 : vector<8x1xf32>
    %cst_135 = arith.constant 9.99999997E-7 : f32
    %320 = vector.broadcast %cst_135 : f32 to vector<8x1xf32>
    %321 = arith.addf %319, %320 : vector<8x1xf32>
    %322 = vector.broadcast %321 : vector<8x1xf32> to vector<8x32xf32>
    %323 = arith.divf %318, %322 : vector<8x32xf32>
    %324 = vector.broadcast %303 : vector<1x32xf32> to vector<8x32xf32>
    %325 = arith.addf %323, %324 : vector<8x32xf32>
    %c0_136 = arith.constant 0 : index
    %c0_137 = arith.constant 0 : index
    %c0_138 = arith.constant 0 : index
    %326 = vector.load %arg23[%c0_136, %c0_137, %c0_138] : memref<1x32x2048xbf16, #tpu.memory_space<vmem>>, vector<1x32x2048xbf16>
    %327 = vector.shape_cast %326 : vector<1x32x2048xbf16> to vector<32x2048xbf16>
    %328 = arith.truncf %325 : vector<8x32xf32> to vector<8x32xbf16>
    %cst_139 = arith.constant dense<0.000000e+00> : vector<8x2048xf32>
    %329 = tpu.matmul %328, %327, %cst_139 {dimension_numbers = #tpu.dot_dimension_numbers<[1], [0], [0], [1], [0, 0, 1, 1], [], []>} : vector<8x32xbf16>, vector<32x2048xbf16>, vector<8x2048xf32> -> vector<8x2048xf32>
    %c0_140 = arith.constant 0 : index
    %c0_141 = arith.constant 0 : index
    %c0_142 = arith.constant 0 : index
    %330 = vector.load %arg24[%c0_140, %c0_141, %c0_142] : memref<1x1x2048xf32, #tpu.memory_space<vmem>>, vector<1x1x2048xf32>
    %331 = vector.shape_cast %330 : vector<1x1x2048xf32> to vector<1x2048xf32>
    %332 = vector.broadcast %331 : vector<1x2048xf32> to vector<8x2048xf32>
    %333 = arith.addf %329, %332 : vector<8x2048xf32>
    %cst_143 = arith.constant 0.000000e+00 : f32
    %334 = vector.broadcast %cst_143 : f32 to vector<8x2048xf32>
    %335 = arith.maximumf %333, %334 : vector<8x2048xf32>
    %c0_144 = arith.constant 0 : index
    %c0_145 = arith.constant 0 : index
    %c0_146 = arith.constant 0 : index
    %336 = vector.load %arg25[%c0_144, %c0_145, %c0_146] : memref<1x2048x32xbf16, #tpu.memory_space<vmem>>, vector<1x2048x32xbf16>
    %337 = vector.shape_cast %336 : vector<1x2048x32xbf16> to vector<2048x32xbf16>
    %338 = arith.truncf %335 : vector<8x2048xf32> to vector<8x2048xbf16>
    %cst_147 = arith.constant dense<0.000000e+00> : vector<8x32xf32>
    %339 = tpu.matmul %338, %337, %cst_147 {dimension_numbers = #tpu.dot_dimension_numbers<[1], [0], [0], [1], [0, 0, 1, 1], [], []>} : vector<8x2048xbf16>, vector<2048x32xbf16>, vector<8x32xf32> -> vector<8x32xf32>
    %340 = arith.addf %299, %339 : vector<8x32xf32>
    %c0_148 = arith.constant 0 : index
    %c0_149 = arith.constant 0 : index
    %c0_150 = arith.constant 0 : index
    %341 = vector.load %arg26[%c0_148, %c0_149, %c0_150] : memref<1x1x32xf32, #tpu.memory_space<vmem>>, vector<1x1x32xf32>
    %342 = vector.shape_cast %341 : vector<1x1x32xf32> to vector<1x32xf32>
    %343 = vector.broadcast %342 : vector<1x32xf32> to vector<8x32xf32>
    %344 = arith.addf %340, %343 : vector<8x32xf32>
    %c0_151 = arith.constant 0 : index
    %c0_152 = arith.constant 0 : index
    %c0_153 = arith.constant 0 : index
    %345 = vector.load %arg29[%c0_151, %c0_152, %c0_153] : memref<1x8x32xf32, #tpu.memory_space<vmem>>, vector<1x8x32xf32>
    %346 = vector.shape_cast %345 : vector<1x8x32xf32> to vector<8x32xf32>
    %347 = vector.shape_cast %344 : vector<8x32xf32> to vector<1x8x32xf32>
    tpu.vector_store %arg29[%c0_151, %c0_152, %c0_153], %347 {strides = array<i32>} : memref<1x8x32xf32, #tpu.memory_space<vmem>>, vector<1x8x32xf32>,
    %c1_i32 = arith.constant 1 : i32
    %348 = arith.cmpi eq, %arg1, %c1_i32 : i32
    %349 = arith.extui %348 : i1 to i32
    %c0_i32_154 = arith.constant 0 : i32
    %350 = arith.cmpi ne, %349, %c0_i32_154 : i32
    scf.if %350 {
      %c0_155 = arith.constant 0 : index
      %c0_156 = arith.constant 0 : index
      %c0_157 = arith.constant 0 : index
      %351 = vector.load %arg29[%c0_155, %c0_156, %c0_157] : memref<1x8x32xf32, #tpu.memory_space<vmem>>, vector<1x8x32xf32>
      %352 = vector.shape_cast %351 : vector<1x8x32xf32> to vector<8x32xf32>
      %c0_158 = arith.constant 0 : index
      %c0_159 = arith.constant 0 : index
      %353 = vector.load %arg27[%c0_158, %c0_159] : memref<1x32xf32, #tpu.memory_space<vmem>>, vector<1x32xf32>
      %c0_160 = arith.constant 0 : index
      %c0_161 = arith.constant 0 : index
      %354 = vector.load %arg28[%c0_160, %c0_161] : memref<1x32xf32, #tpu.memory_space<vmem>>, vector<1x32xf32>
      %cst_162 = arith.constant dense<0.000000e+00> : vector<8xf32>
      %355 = vector.multi_reduction <add>, %352, %cst_162 [1] : vector<8x32xf32> to vector<8xf32>
      %356 = vector.shape_cast %355 : vector<8xf32> to vector<8x1xf32>
      %cst_163 = arith.constant 3.200000e+01 : f32
      %357 = vector.broadcast %cst_163 : f32 to vector<8x1xf32>
      %358 = arith.divf %356, %357 : vector<8x1xf32>
      %359 = vector.broadcast %358 : vector<8x1xf32> to vector<8x32xf32>
      %360 = arith.subf %352, %359 : vector<8x32xf32>
      %361 = arith.mulf %360, %360 : vector<8x32xf32>
      %cst_164 = arith.constant dense<0.000000e+00> : vector<8xf32>
      %362 = vector.multi_reduction <add>, %361, %cst_164 [1] : vector<8x32xf32> to vector<8xf32>
      %363 = vector.shape_cast %362 : vector<8xf32> to vector<8x1xf32>
      %cst_165 = arith.constant 3.100000e+01 : f32
      %364 = vector.broadcast %cst_165 : f32 to vector<8x1xf32>
      %365 = arith.divf %363, %364 : vector<8x1xf32>
      %366 = vector.broadcast %358 : vector<8x1xf32> to vector<8x32xf32>
      %367 = arith.subf %352, %366 : vector<8x32xf32>
      %368 = vector.broadcast %353 : vector<1x32xf32> to vector<8x32xf32>
      %369 = arith.mulf %368, %367 : vector<8x32xf32>
      %370 = math.sqrt %365 : vector<8x1xf32>
      %cst_166 = arith.constant 9.99999997E-7 : f32
      %371 = vector.broadcast %cst_166 : f32 to vector<8x1xf32>
      %372 = arith.addf %370, %371 : vector<8x1xf32>
      %373 = vector.broadcast %372 : vector<8x1xf32> to vector<8x32xf32>
      %374 = arith.divf %369, %373 : vector<8x32xf32>
      %375 = vector.broadcast %354 : vector<1x32xf32> to vector<8x32xf32>
      %376 = arith.addf %374, %375 : vector<8x32xf32>
      %c0_167 = arith.constant 0 : index
      %c0_168 = arith.constant 0 : index
      %c0_169 = arith.constant 0 : index
      %377 = vector.load %arg29[%c0_167, %c0_168, %c0_169] : memref<1x8x32xf32, #tpu.memory_space<vmem>>, vector<1x8x32xf32>
      %378 = vector.shape_cast %377 : vector<1x8x32xf32> to vector<8x32xf32>
      %379 = vector.shape_cast %376 : vector<8x32xf32> to vector<1x8x32xf32>
      tpu.vector_store %arg29[%c0_167, %c0_168, %c0_169], %379 {strides = array<i32>} : memref<1x8x32xf32, #tpu.memory_space<vmem>>, vector<1x8x32xf32>,
    } else {
    }
    return
  }
  func.func @transform_0(%arg0: i32, %arg1: i32) -> (i32, i32, i32) {
    %c0_i32 = arith.constant 0 : i32
    %c0_i32_0 = arith.constant 0 : i32
    %c0_i32_1 = arith.constant 0 : i32
    return %arg0, %c0_i32, %c0_i32_0 : i32, i32, i32
  }
  func.func @transform_1(%arg0: i32, %arg1: i32) -> (i32, i32, i32) {
    %c0_i32 = arith.constant 0 : i32
    %c0_i32_0 = arith.constant 0 : i32
    %c0_i32_1 = arith.constant 0 : i32
    return %arg0, %c0_i32, %c0_i32_0 : i32, i32, i32
  }
  func.func @transform_2(%arg0: i32, %arg1: i32) -> (i32, i32) {
    %c0_i32 = arith.constant 0 : i32
    %c0_i32_0 = arith.constant 0 : i32
    %c0_i32_1 = arith.constant 0 : i32
    return %c0_i32, %c0_i32_0 : i32, i32
  }
  func.func @transform_3(%arg0: i32, %arg1: i32) -> (i32, i32, i32) {
    %c0_i32 = arith.constant 0 : i32
    %c0_i32_0 = arith.constant 0 : i32
    %c0_i32_1 = arith.constant 0 : i32
    return %arg0, %c0_i32, %c0_i32_0 : i32, i32, i32
  }
  func.func @transform_4(%arg0: i32, %arg1: i32) -> (i32, i32, i32) {
    %c0_i32 = arith.constant 0 : i32
    %c0_i32_0 = arith.constant 0 : i32
    %c0_i32_1 = arith.constant 0 : i32
    return %arg0, %c0_i32, %c0_i32_0 : i32, i32, i32
  }
  func.func @transform_5(%arg0: i32, %arg1: i32) -> (i32, i32, i32) {
    %c0_i32 = arith.constant 0 : i32
    %c0_i32_0 = arith.constant 0 : i32
    %c0_i32_1 = arith.constant 0 : i32
    return %arg1, %c0_i32, %c0_i32_0 : i32, i32, i32
  }
  func.func @transform_6(%arg0: i32, %arg1: i32) -> (i32, i32, i32) {
    %c0_i32 = arith.constant 0 : i32
    %c0_i32_0 = arith.constant 0 : i32
    %c0_i32_1 = arith.constant 0 : i32
    return %arg1, %c0_i32, %c0_i32_0 : i32, i32, i32
  }
  func.func @transform_7(%arg0: i32, %arg1: i32) -> (i32, i32, i32) {
    %c0_i32 = arith.constant 0 : i32
    %c0_i32_0 = arith.constant 0 : i32
    %c0_i32_1 = arith.constant 0 : i32
    return %arg1, %c0_i32, %c0_i32_0 : i32, i32, i32
  }
  func.func @transform_8(%arg0: i32, %arg1: i32) -> (i32, i32, i32) {
    %c0_i32 = arith.constant 0 : i32
    %c0_i32_0 = arith.constant 0 : i32
    %c0_i32_1 = arith.constant 0 : i32
    return %arg1, %c0_i32, %c0_i32_0 : i32, i32, i32
  }
  func.func @transform_9(%arg0: i32, %arg1: i32) -> (i32, i32, i32) {
    %c0_i32 = arith.constant 0 : i32
    %c0_i32_0 = arith.constant 0 : i32
    %c0_i32_1 = arith.constant 0 : i32
    return %arg1, %c0_i32, %c0_i32_0 : i32, i32, i32
  }
  func.func @transform_10(%arg0: i32, %arg1: i32) -> (i32, i32, i32) {
    %c0_i32 = arith.constant 0 : i32
    %c0_i32_0 = arith.constant 0 : i32
    %c0_i32_1 = arith.constant 0 : i32
    return %arg1, %c0_i32, %c0_i32_0 : i32, i32, i32
  }
  func.func @transform_11(%arg0: i32, %arg1: i32) -> (i32, i32, i32) {
    %c0_i32 = arith.constant 0 : i32
    %c0_i32_0 = arith.constant 0 : i32
    %c0_i32_1 = arith.constant 0 : i32
    return %arg1, %c0_i32, %c0_i32_0 : i32, i32, i32
  }
  func.func @transform_12(%arg0: i32, %arg1: i32) -> (i32, i32, i32) {
    %c0_i32 = arith.constant 0 : i32
    %c0_i32_0 = arith.constant 0 : i32
    %c0_i32_1 = arith.constant 0 : i32
    return %arg1, %c0_i32, %c0_i32_0 : i32, i32, i32
  }
  func.func @transform_13(%arg0: i32, %arg1: i32) -> (i32, i32, i32) {
    %c0_i32 = arith.constant 0 : i32
    %c0_i32_0 = arith.constant 0 : i32
    %c0_i32_1 = arith.constant 0 : i32
    return %arg1, %c0_i32, %c0_i32_0 : i32, i32, i32
  }
  func.func @transform_14(%arg0: i32, %arg1: i32) -> (i32, i32, i32) {
    %c0_i32 = arith.constant 0 : i32
    %c0_i32_0 = arith.constant 0 : i32
    %c0_i32_1 = arith.constant 0 : i32
    return %arg1, %c0_i32, %c0_i32_0 : i32, i32, i32
  }
  func.func @transform_15(%arg0: i32, %arg1: i32) -> (i32, i32, i32) {
    %c0_i32 = arith.constant 0 : i32
    %c0_i32_0 = arith.constant 0 : i32
    %c0_i32_1 = arith.constant 0 : i32
    return %arg1, %c0_i32, %c0_i32_0 : i32, i32, i32
  }
  func.func @transform_16(%arg0: i32, %arg1: i32) -> (i32, i32, i32) {
    %c0_i32 = arith.constant 0 : i32
    %c0_i32_0 = arith.constant 0 : i32
    %c0_i32_1 = arith.constant 0 : i32
    return %arg1, %c0_i32, %c0_i32_0 : i32, i32, i32
  }
  func.func @transform_17(%arg0: i32, %arg1: i32) -> (i32, i32, i32) {
    %c0_i32 = arith.constant 0 : i32
    %c0_i32_0 = arith.constant 0 : i32
    %c0_i32_1 = arith.constant 0 : i32
    return %arg1, %c0_i32, %c0_i32_0 : i32, i32, i32
  }
  func.func @transform_18(%arg0: i32, %arg1: i32) -> (i32, i32, i32) {
    %c0_i32 = arith.constant 0 : i32
    %c0_i32_0 = arith.constant 0 : i32
    %c0_i32_1 = arith.constant 0 : i32
    return %arg1, %c0_i32, %c0_i32_0 : i32, i32, i32
  }
  func.func @transform_19(%arg0: i32, %arg1: i32) -> (i32, i32, i32) {
    %c0_i32 = arith.constant 0 : i32
    %c0_i32_0 = arith.constant 0 : i32
    %c0_i32_1 = arith.constant 0 : i32
    return %arg1, %c0_i32, %c0_i32_0 : i32, i32, i32
  }
  func.func @transform_20(%arg0: i32, %arg1: i32) -> (i32, i32, i32) {
    %c0_i32 = arith.constant 0 : i32
    %c0_i32_0 = arith.constant 0 : i32
    %c0_i32_1 = arith.constant 0 : i32
    return %arg1, %c0_i32, %c0_i32_0 : i32, i32, i32
  }
  func.func @transform_21(%arg0: i32, %arg1: i32) -> (i32, i32, i32) {
    %c0_i32 = arith.constant 0 : i32
    %c0_i32_0 = arith.constant 0 : i32
    %c0_i32_1 = arith.constant 0 : i32
    return %arg1, %c0_i32, %c0_i32_0 : i32, i32, i32
  }
  func.func @transform_22(%arg0: i32, %arg1: i32) -> (i32, i32, i32) {
    %c0_i32 = arith.constant 0 : i32
    %c0_i32_0 = arith.constant 0 : i32
    %c0_i32_1 = arith.constant 0 : i32
    return %arg1, %c0_i32, %c0_i32_0 : i32, i32, i32
  }
  func.func @transform_23(%arg0: i32, %arg1: i32) -> (i32, i32, i32) {
    %c0_i32 = arith.constant 0 : i32
    %c0_i32_0 = arith.constant 0 : i32
    %c0_i32_1 = arith.constant 0 : i32
    return %arg1, %c0_i32, %c0_i32_0 : i32, i32, i32
  }
  func.func @transform_24(%arg0: i32, %arg1: i32) -> (i32, i32, i32) {
    %c0_i32 = arith.constant 0 : i32
    %c0_i32_0 = arith.constant 0 : i32
    %c0_i32_1 = arith.constant 0 : i32
    return %arg1, %c0_i32, %c0_i32_0 : i32, i32, i32
  }
  func.func @transform_25(%arg0: i32, %arg1: i32) -> (i32, i32) {
    %c0_i32 = arith.constant 0 : i32
    %c0_i32_0 = arith.constant 0 : i32
    %c0_i32_1 = arith.constant 0 : i32
    return %c0_i32, %c0_i32_0 : i32, i32
  }
  func.func @transform_26(%arg0: i32, %arg1: i32) -> (i32, i32) {
    %c0_i32 = arith.constant 0 : i32
    %c0_i32_0 = arith.constant 0 : i32
    %c0_i32_1 = arith.constant 0 : i32
    return %c0_i32, %c0_i32_0 : i32, i32
  }
  func.func @transform_27(%arg0: i32, %arg1: i32) -> (i32, i32, i32) {
    %c0_i32 = arith.constant 0 : i32
    %c0_i32_0 = arith.constant 0 : i32
    %c0_i32_1 = arith.constant 0 : i32
    return %arg0, %c0_i32, %c0_i32_0 : i32, i32, i32
  }
}

</mosaic_0001>

<bundles_post_ra>
// kernel: decoder_forward.1
= control target key start
LH: loop header
LB: loop body
LE: loop exit
PB: predicated region body
PF: predicated region fallthrough
CT: control target
= control target key end

     0   :  { %s6915_s0 = inlined_call_operand.vmem [shape: f32[2,8,32], index: 0, kind: input, shape index: {}]   ;;  %s6916_s1 = inlined_call_operand.vmem [shape: f32[2,12,32], index: 1, kind: input, shape index: {}]   ;;  %s6917_s2 = inlined_call_operand.vmem [shape: f32[8,32], index: 2, kind: input, shape index: {}]   ;;  %s6918_s3 = inlined_call_operand.vmem [shape: f32[2,8,8], index: 3, kind: input, shape index: {}]   ;;  %s6919_s4 = inlined_call_operand.vmem [shape: f32[2,1,12], index: 4, kind: input, shape index: {}]   ;;  %s6920_s5 = inlined_call_operand.vmem [shape: f32[2,1,32], index: 5, kind: input, shape index: {}]   ;;  %s6921_s6 = inlined_call_operand.vmem [shape: f32[2,1,32], index: 6, kind: input, shape index: {}]   ;;  %s6922_s7 = inlined_call_operand.vmem [shape: f32[2,1,32], index: 7, kind: input, shape index: {}]   ;;  %s6923_s8 = inlined_call_operand.vmem [shape: f32[2,1,32], index: 8, kind: input, shape index: {}]   ;;  %s6924_s9 = inlined_call_operand.vmem [shape: f32[2,1,32], index: 9, kind: input, shape index: {}]   ;;  %s6925_s10 = inlined_call_operand.vmem [shape: f32[2,1,32], index: 10, kind: input, shape index: {}]   ;;  %s6926_s11 = inlined_call_operand.vmem [shape: bf16[2,32,96], index: 11, kind: input, shape index: {}]   ;;  %s6927_s12 = inlined_call_operand.vmem [shape: f32[2,1,96], index: 12, kind: input, shape index: {}]   ;;  %s6928_s13 = inlined_call_operand.vmem [shape: bf16[2,32,32], index: 13, kind: input, shape index: {}]   ;;  %s6929_s14 = inlined_call_operand.vmem [shape: f32[2,1,32], index: 14, kind: input, shape index: {}]   ;;  %s6930_s15 = inlined_call_operand.vmem [shape: bf16[2,32,32], index: 15, kind: input, shape index: {}]   ;;  %s6931_s16 = inlined_call_operand.vmem [shape: f32[2,1,32], index: 16, kind: input, shape index: {}]   ;;  %s6932_s17 = inlined_call_operand.vmem [shape: bf16[2,32,64], index: 17, kind: input, shape index: {}]   ;;  %s6933_s18 = inlined_call_operand.vmem [shape: f32[2,1,64], index: 18, kind: input, shape index: {}]   ;;  %s6934_s19 = inlined_call_operand.vmem [shape: bf16[2,32,32], index: 19, kind: input, shape index: {}]   ;;  %s6935_s20 = inlined_call_operand.vmem [shape: f32[2,1,32], index: 20, kind: input, shape index: {}]   ;;  %s6936_s21 = inlined_call_operand.vmem [shape: bf16[2,32,2048], index: 21, kind: input, shape index: {}]   ;;  %s6937_s22 = inlined_call_operand.vmem [shape: f32[2,1,2048], index: 22, kind: input, shape index: {}]   ;;  %s6938_s23 = inlined_call_operand.vmem [shape: bf16[2,2048,32], index: 23, kind: input, shape index: {}]   ;;  %s6939_s24 = inlined_call_operand.vmem [shape: f32[2,1,32], index: 24, kind: input, shape index: {}]   ;;  %s6940_s25 = inlined_call_operand.vmem [shape: f32[1,32], index: 25, kind: input, shape index: {}]   ;;  %s6941_s26 = inlined_call_operand.vmem [shape: f32[1,32], index: 26, kind: input, shape index: {}]   ;;  %s6942_s27 = inlined_call_operand.hbm [shape: f32[2,8,32], index: 27, kind: output, shape index: {}]  }
   0x1   :  { %6961 = sst [smem:[#allocation22_spill]] %s6915_s0 }
   0x2   :  { %6962 = sst [smem:[#allocation23_spill]] %s6916_s1 }
   0x3   :  { %6963 = sst [smem:[#allocation24_spill]] %s6917_s2 }
   0x4   :  { %6964 = sst [smem:[#allocation25_spill]] %s6918_s3 }
   0x5   :  { %6965 = sst [smem:[#allocation26_spill]] %s6919_s4 }
   0x6   :  { %6966 = sst [smem:[#allocation27_spill]] %s6920_s5 }
   0x7   :  { %6967 = sst [smem:[#allocation28_spill]] %s6921_s6 }
   0x8   :  { %6968 = sst [smem:[#allocation29_spill]] %s6922_s7 }
   0x9   :  { %6969 = sst [smem:[#allocation30_spill]] %s6923_s8 }
   0xa   :  { %6970 = sst [smem:[#allocation31_spill]] %s6924_s9 }
   0xb   :  { %6971 = sst [smem:[#allocation32_spill]] %s6925_s10 }
   0xc   :  { %6972 = sst [smem:[#allocation33_spill]] %s6926_s11 }
   0xd   :  { %6973 = sst [smem:[#allocation34_spill]] %s6928_s13 }
   0xe   :  { %6974 = sst [smem:[#allocation35_spill]] %s6930_s15 }
   0xf   :  { %6975 = sst [smem:[#allocation36_spill]] %s6931_s16 }
  0x10   :  { %6976 = sst [smem:[#allocation37_spill]] %s6932_s17 }
  0x11   :  { %6977 = sst [smem:[#allocation38_spill]] %s6933_s18 }
  0x12   :  { %6978 = sst [smem:[#allocation39_spill]] %s6934_s19 }
  0x13   :  { %6979 = sst [smem:[#allocation40_spill]] %s6935_s20 }
  0x14   :  { %6980 = sst [smem:[#allocation41_spill]] %s6936_s21 }
  0x15   :  { %6981 = sst [smem:[#allocation42_spill]] %s6937_s22 }
  0x16   :  { %6982 = sst [smem:[#allocation43_spill]] %s6938_s23 }
  0x17   :  { %6983 = sst [smem:[#allocation44_spill]] %s6939_s24 }
  0x18   :  { %6984 = sst [smem:[#allocation45_spill]] %s6940_s25 }
  0x19   :  { %6985 = sst [smem:[#allocation46_spill]] %s6941_s26 }
  0x1a   :  { %6986 = sst [smem:[#allocation47_spill]] %s6942_s27 }
  0x1b   :  { %32 = vsyncpa [#allocation4], 0 }
  0x1c   :  { %34 = vsyncpa [#allocation4 + $0x1], 0  ;;  %s6110_s7 = smov 0   ;;  %s6112_s4 = smov 0  }
  0x1d   :  { %s6114_s8 = smov 0   ;;  %s6116_s30 = smov 0  }
  0x1e   :  { %s6118_s9 = smov 0   ;;  %s6120_s5 = smov 0  }
  0x1f   :  { %s6122_s28 = smov 0   ;;  %s6124_s0 = smov 0  }
  0x20 LB: > { %6987 = sst [smem:[#allocation6_spill]] %s5922_s7  ;;  %s4969_s10 = sadd.s32 4294967295, %s5950_s0   ;;  %s5950_s0 = sphi %s6124_s0, %s40_s0   ;;  %s5946_s28 = sphi %s6122_s28, %s7071_s28   ;;  %s5942_s5 = sphi %s6120_s5, %s7070_s5   ;;  %s5938_s9 = sphi %s6118_s9, %s7069_s9   ;;  %s5934_s30 = sphi %s6116_s30, %s7068_s30   ;;  %s5930_s8 = sphi %s6114_s8, %s7067_s8   ;;  %s5926_s4 = sphi %s6112_s4, %s7066_s4   ;;  %s5922_s7 = sphi %s6110_s7, %s7065_s7  }
  0x21   : > { %6988 = sst [smem:[#allocation7_spill]] %s5926_s4  ;;  %s4970_s29 = sadd.s32 4294967294, %s5950_s0  }
  0x22   : > { %6989 = sst [smem:[#allocation8_spill]] %s5930_s8  ;;  %s49_s1 = sadd.s32 1, %s5942_s5 }
  0x23   : > { %6990 = sst [smem:[#allocation9_spill]] %s5934_s30  ;;  %p50_p0 = scmp.ge.s32.totalorder %s49_s1, 2 }
  0x24   : > { %6991 = sst [smem:[#allocation10_spill]] %s5938_s9  ;;  %s52_s6 = sadd.s32 1, %s5946_s28 }
  0x25   : > { %6992 = sst [smem:[#allocation11_spill]] %s5942_s5  ;;  %p756_p1 = scmp.ne.s32.totalorder %s5930_s8, %s5926_s4 }
  0x26   : > { %6993 = sst [smem:[#allocation12_spill]] %s5946_s28  ;;  %p757_p2 = scmp.eq.s32.totalorder %s4969_s10, 3 }
  0x27   : > { %6994 = sst [smem:[#allocation13_spill]] %s5950_s0  ;;  %s7073_s1 = smov (%p50_p0, %s49_s1), 0 }
  0x28   : > { %6995 = sst [smem:[#allocation14_spill]] %s7073_s1  ;;  %s7075_s6 = smov (!%p50_p0, %s52_s6), %s5946_s28 }
  0x29   : > { %p6159_p3 = por %p757_p2, %p756_p1  ;;  %p762_p4 = scmp.ne.s32.totalorder %s5926_s4, %s5922_s7 }
  0x2a   : > { %p54_p5 = scmp.ge.s32.totalorder %s7075_s6, 2  ;;  %p763_p6 = scmp.eq.s32.totalorder %s4970_s29, 3 }
  0x2b   : > { %s6996_s11 = scalar_select %p6159_p3, 1, 0 }
  0x2c   : > { %p4973_p7 = scmp.ge.s32.totalorder %s5950_s0, 1  ;;  %p953_p8 = scmp.lt.s32.totalorder %s5950_s0, 5 }
  0x2d   : > { %6997 = sst [smem:[#allocation15_spill]] %s6996_s11  ;;  %s7077_s6 = smov (%p54_p5, %s7075_s6), 0 }
  0x2e   : > { %6998 = sst [smem:[#allocation16_spill]] %s7077_s6  ;;  %p6169_p9 = por %p763_p6, %p762_p4 }
  0x2f   : > { %p954_p10 = pnand %p4973_p7, %p953_p8  ;;  %s743_s3 = ssub.s32 %s5946_s28, %s7077_s6 }
  0x30   : > { %s6999_s2 = scalar_select %p6169_p9, 1, 0 }
  0x31   : > { %s746_s10 = sadd.s32 1, %s5930_s8  ;;  %p744_p11 = scmp.eq.s32.totalorder %s743_s3, 0 }
  0x32   : > { %7000 = sst [smem:[#allocation17_spill]] %s6999_s2  ;;  %957 = sbr.rel (%p954_p10) target bundleno = 4939 (0x134b), region = 128 }
  0x33   : > { %s6177_s1 = scalar_select %p744_p11, %s5930_s8, %s746_s10  }
  0x35   : > { %7001 = sst [smem:[#allocation18_spill]] %s6177_s1 }
  0x39   : > { %s6945_s29 = sand.u32 1, %s5926_s4   ;;  %p1111_p12 = scmp.lt.s32.totalorder %s5938_s9, 1 }
  0x3a   : > { %s6183_s5 = sshll.u32 %s6945_s29, 3  ;;  %p1127_p13 = scmp.lt.s32.totalorder %s5934_s30, 1 }
  0x3b   : > { %s6187_s2 = scalar_select %p1111_p12, %s5938_s9, 1 }
  0x3c   : > { %s6190_s3 = scalar_select %p1127_p13, %s5934_s30, 1 }
  0x3d   : > { %7002 = sst [smem:[#allocation19_spill]] %s6187_s2  ;;  %s4975_s10 = sshll.u32 %s6187_s2, 3 }
  0x3e   : > { %s5214_s29 = sshll.u32 %s6187_s2, 4  ;;  %s7003_s1 = sld [smem:[#allocation22_spill]] }
  0x3f   : > { %s7004_s27 = sld [smem:[#allocation23_spill]]  ;;  %s7006_s26 = sld [smem:[#allocation25_spill]] }
  0x40   : > { %s5215_s6 = sshll.u32 %s6190_s3, 4  ;;  %s7015_s13 = sld [smem:[#allocation34_spill]] }
  0x41   : > { %s7016_s15 = sld [smem:[#allocation35_spill]]  ;;  %s7018_s17 = sld [smem:[#allocation37_spill]] }
  0x42   : > { %s7020_s20 = sld [smem:[#allocation39_spill]]  ;;  %s5220_s19 = sshll.u32 %s6190_s3, 8 }
  0x43   : > { %s7024_s16 = sld [smem:[#allocation42_spill]]  ;;  %s7026_s21 = sld [smem:[#allocation43_spill]] }
  0x44   : > { %s1114_s8 = scalar_lea.vmem %s7003_s1, %s4975_s10  ;;  %s7022_s1 = sld [smem:[#allocation40_spill]] }
  0x45   : > { %s6200_s11 = scalar_lea.vmem %s7004_s27, %s5214_s29  ;;  %s6205_s25 = scalar_lea.vmem %s7006_s26, %s4975_s10 }
  0x46   : > { %7005 = sst [smem:[#allocation20_spill]] %s6200_s11  ;;  %s7014_s26 = sld [smem:[#allocation33_spill]] }
  0x47   : > { %s6248_s22 = scalar_lea.vmem %s7015_s13, %s5215_s6  ;;  %s6257_s27 = scalar_lea.vmem %s7016_s15, %s5215_s6 }
  0x48   : > { %s6266_s2 = scalar_lea.vmem %s7018_s17, %s5215_s6  ;;  %s6275_s0 = scalar_lea.vmem %s7020_s20, %s5215_s6 }
  0x49   : > { %7021 = sst [smem:[#allocation21_spill]] %s6275_s0  ;;  %s7023_s15 = sld [smem:[#allocation41_spill]] }
  0x4a   : > { %s1184_s13 = scalar_lea.vmem %s7022_s1, %s6190_s3  ;;  %s6290_s9 = scalar_lea.vmem %s7024_s16, %s5215_s6 }
  0x4b   : > { %s5221_s10 = sshll.u32 %s6190_s3, 10  ;;  %s7025_s20 = sld [smem:[#allocation44_spill]] }
  0x4c   : > { %s6243_s4 = scalar_lea.vmem %s7014_s26, %s5215_s6  ;;  %s6300_s1 = scalar_lea.vmem %s7026_s21, %s5221_s10 }
  0x4d   : > { %s6303_s28 = scalar_lea.vmem [#allocation3], %s6183_s5  ;;  %s7027_s11 = sld [smem:[#allocation9_spill]] }
  0x4f   : > { %s6285_s26 = scalar_lea.vmem %s7023_s15, %s5220_s19 }
  0x51   : > { %s1201_s24 = scalar_lea.vmem %s7025_s20, %s6190_s3 }
  0x53   : > { %p4994_p0 = scmp.ne.s32.totalorder %s7027_s11, 0 }
  0x54   : > { %v1207_v0 = vld [vmem:[%s1114_s8] sm:$0xff] (!%p4994_p0)  ;;  %s7028_s16 = sld [smem:[#allocation24_spill]] (!%p4994_p0)  ;;  %vm1211_vm0 = vcmask (!%p4994_p0), 261120  }
  0x55   : > { %1206 = sbr.rel (%p4994_p0) target bundleno = 94 (0x5e), region = 132  ;;  %v1208_v2 = vmul.f32 (!%p4994_p0), 5.656854, %v1207_v0 }
  0x5a   : > { %v1209_v1 = vld [vmem:[%s7028_s16] sm:$0xff] (!%p4994_p0) }
  0x5b   : > { %v1210_v3 = vadd.f32 (!%p4994_p0), %v1209_v1, %v1208_v2 }
  0x5d   : > { %1212 = vst.msk [vmem:[%s6303_s28] sm:$0xff] %vm1211_vm0, %v1210_v3 }
  0x5e PF: > { %vm1220_vm1 = vcmask 261120   ;;  %v5669_v11 = vld [vmem:[%s6243_s4] sm:$0xff]   ;;  %v5952_v12 = vmov 0.0   ;;  %vm5953_vm2 = vmmov 0   ;;  %v5670_v13 = vld [vmem:[%s6243_s4 + $0x8] sm:$0xff]   ;;  %s7029_s5 = sld [smem:[#allocation27_spill]]  ;;  %s7033_s10 = scalar_lea.vmem %s6927_s12, %s6190_s3 }
  0x5f   : > { %5445 = vmatprep.subr.bf16.mxu0 %v5952_v12  ;;  %5449 = vmatprep.mubr.msk.bf16.mxu0 %vm5953_vm2, %v5952_v12  ;;  %s7031_s4 = sld [smem:[#allocation28_spill]]  ;;  %v4997_v29 = vld [vmem:[%s7033_s10] ss:$0 sm:$0xff]  ;;  %s5954_s30 = smov 120   ;;  %vm1328_vm5 = vcmask 64512   ;;  %vm1394_vm6 = vcmask 1043456  }
  0x60   : > { %5446 = vmatpush3.bf16.msra.mxu0 %v5669_v11  ;;  %5453 = vmatprep.subr.bf16.mxu1 %v5952_v12  ;;  %s5955_s20 = smov 96   ;;  %s5956_s21 = smov 88   ;;  %v1216_v48 = vld [vmem:[%s6205_s25] sm:$0xff]  ;;  %vm1555_vm7 = vcmask 130112   ;;  %vm1673_vm8 = vcmask 195712   ;;  %vm1791_vm9 = vcmask 261312  }
  0x61   : > { %5447 = vmatprep.subr.bf16.mxu0 %v5952_v12  ;;  %5455 = vmatprep.mubr.msk.bf16.mxu1 %vm5953_vm2, %v5952_v12  ;;  %s5957_s11 = smov 80   ;;  %s5958_s15 = smov 112   ;;  %vm2090_vm12 = vcmask 97280   ;;  %vm2109_vm13 = vcmask 1045504  }
  0x62   : > { %s5959_s17 = smov 72   ;;  %s5960_s16 = smov 104  }
  0x63   : > { %s5961_s25 = smov 64   ;;  %s5962_s18 = smov 56  }
  0x64   : > { %v1213_v4 = vld [vmem:[%s6303_s28] sm:$0xff]  ;;  %5448 = vmatpush3.bf16.msra.mxu0 %v5670_v13  ;;  %s7030_s23 = scalar_lea.vmem %s7029_s5, %s6190_s3  ;;  %s5963_s8 = smov 48  }
  0x65   : > { %v1221_v5 = vsel %vm1220_vm1, %v1213_v4, 0.0  ;;  %5459 = vmatprep.subr.bf16.mxu0 %v5952_v12  ;;  %v4995_v22 = vld [vmem:[%s7030_s23] ss:$0 sm:$0xff]  ;;  %s7032_s19 = scalar_lea.vmem %s7031_s4, %s6190_s3  ;;  %s5964_s5 = smov 40  }
  0x66   : > { %1222 = vadd.xlane.f32.xlu0 %v1221_v5  ;;  %v4996_v25 = vld [vmem:[%s7032_s19] ss:$0 sm:$0xff]  ;;  %s5965_s23 = smov 8   ;;  %s5966_s6 = smov 16  }
  0x67   : > { %s5967_s0 = smov 24   ;;  %s7034_s19 = scalar_lea.vmem %s6929_s14, %s6190_s3 }
  0x68   : > { %s7035_s7 = sld [smem:[#allocation20_spill]]  ;;  %s7036_s29 = sld [smem:[#allocation29_spill]] }
  0x6e   : > { %s7037_s10 = scalar_lea.vmem %s7036_s29, %s6190_s3  ;;  %s7042_s29 = sld [smem:[#allocation36_spill]] }
  0xf3   : > { %v1223_v6 = vpop.xlane.xlu0 %1222 }
  0xf4   : > { %v1225_v7 = vmul.f32 0.03125, %v1223_v6 }
  0xf6   : > { %v1226_v8 = vsub.f32 %v1213_v4, %v1225_v7 }
  0xf8   : > { %v1227_v9 = vmul.f32 %v1226_v8, %v1226_v8  ;;  %v1239_v23 = vmul.f32 %v4995_v22, %v1226_v8 }
  0xfa   : > { %v1228_v10 = vsel %vm1220_vm1, %v1227_v9, 0.0 }
  0xfb   : > { %1229 = vadd.xlane.f32.xlu0 %v1228_v10 }
 0x188   : > { %v1230_v14 = vpop.xlane.xlu0 %1229 }
 0x189   : > { %v1232_v15 = vmul.f32 0.032258064, %v1230_v14 }
 0x18b   : > { %5807 = vrsqrt.f32 %v1232_v15  ;;  %vm1242_vm3 = vcmp.eq.f32.partialorder %v1232_v15, inf  ;;  %v1245_v18 = vand.u32 2147483648, %v1232_v15  ;;  %vm1244_vm4 = vcmp.eq.f32.partialorder %v1232_v15, 0.0 }
 0x195   : > { %v5808_v16 = vpop.eup %5807 }
 0x196   : > { %v1241_v17 = vmul.f32 %v5808_v16, %v1232_v15 }
 0x198   : > { %v1243_v19 = vsel %vm1242_vm3, %v1232_v15, %v1241_v17 }
 0x199   : > { %v1246_v20 = vsel %vm1244_vm4, %v1245_v18, %v1243_v19 }
 0x19a   : > { %v1247_v21 = vadd.f32 1e-06, %v1246_v20 }
 0x19c   : > { %5809 = vrcp.f32 %v1247_v21 }
 0x1a6   : > { %v5810_v24 = vpop.eup %5809 }
 0x1a7   : > { %v1249_v26 = vmul.f32 %v5810_v24, %v1239_v23 }
 0x1a9   : > { %v1256_v27 = vadd.f32 %v4996_v25, %v1249_v26 }
 0x1ab   : > { %v1261_v28 = vpack.c.bf16 %v1256_v27, %v1256_v27 }
 0x1ad   : > { %5450 = vmatmul.mubr.msk.bf16.vlgmr.msra.gmra.mrb[0].mxu0 %vm1220_vm1, %v1261_v28 }
 0x1ae   : > { %5461 = vmatprep.mubr.msk.bf16.mxu0 %vm5953_vm2, %v5952_v12 }
 0x280   : > { %v1318_v30 = vpop.f32.mrb[0].mxu0 }
 0x281   : > { %v1319_v31 = vadd.f32 %v4997_v29, %v1318_v30  ;;  %v5451_v32 = vpop.f32.mrb[1].mxu0 }
 0x282   : > { %v1321_v33 = vpop.f32.mrb[2].mxu0 }
 0x283   : > { %v6341_v34 = vpack.c.bf16 %v1319_v31, %v1319_v31  ;;  %v5452_v35 = vpop.f32.mrb[3].mxu0 }
 0x285   : > { %1439 = vrot.lane.b32.xlu0 %v6341_v34, %s5954_s30  ;;  %1326 = vrot.lane.b32.xlu1 %v6341_v34, %s5955_s20 }
 0x289   : > { %1441 = vrot.lane.b32.xlu1 %v6341_v34, %s5956_s21 }
 0x28d   : > { %1559 = vrot.lane.b32.xlu1 %v6341_v34, %s5957_s11 }
 0x291   : > { %1557 = vrot.lane.b32.xlu1 %v6341_v34, %s5958_s15 }
 0x295   : > { %1677 = vrot.lane.b32.xlu1 %v6341_v34, %s5959_s17 }
 0x299   : > { %1675 = vrot.lane.b32.xlu1 %v6341_v34, %s5960_s16 }
 0x2f7   : > { %v1327_v36 = vpop.permute.xlu1 %1326  ;;  %v1440_v41 = vpop.permute.xlu0 %1439 }
 0x2f8   : > { %v1333_v37 = vsel %vm1328_vm5, %v1327_v36, 0 }
 0x2f9   : > { %5454 = vmatpush3.bf16.xpose.msra.mxu1 %v1333_v37 }
 0x2fa   : > { %5465 = vmatprep.subr.bf16.mxu1 %v5952_v12 }
 0x2fb   : > { %v1442_v38 = vpop.permute.xlu1 %1441 }
 0x2fc   : > { %v1447_v39 = vsel %vm1328_vm5, %v1442_v38, 0 }
 0x2ff   : > { %v1560_v40 = vpop.permute.xlu1 %1559 }
 0x300   : > { %5456 = vmatmul.mubr.msk.bf16.vlgmr.msra.gmra.mrb[0].mxu1 %vm1328_vm5, %v6341_v34  ;;  %v1565_v43 = vsel %vm1328_vm5, %v1560_v40, 0 }
 0x301   : > { %5466 = vmatpush3.bf16.xpose.msra.mxu1 %v1447_v39  ;;  %5467 = vmatprep.mubr.msk.bf16.mxu1 %vm5953_vm2, %v5952_v12 }
 0x302   : > { %5477 = vmatprep.subr.bf16.mxu1 %v5952_v12 }
 0x303   : > { %v1558_v42 = vpop.permute.xlu1 %1557 }
 0x307   : > { %v1678_v44 = vpop.permute.xlu1 %1677 }
 0x308   : > { %5468 = vmatmul.mubr.msk.bf16.vlgmr.msra.gmra.mrb[4].mxu1 %vm1328_vm5, %v1440_v41  ;;  %v1683_v45 = vsel %vm1328_vm5, %v1678_v44, 0 }
 0x309   : > { %5478 = vmatpush3.bf16.xpose.msra.mxu1 %v1565_v43  ;;  %5479 = vmatprep.mubr.msk.bf16.mxu1 %vm5953_vm2, %v5952_v12 }
 0x30a   : > { %5489 = vmatprep.subr.bf16.mxu1 %v5952_v12 }
 0x30b   : > { %v1676_v46 = vpop.permute.xlu1 %1675 }
 0x310   : > { %5480 = vmatmul.mubr.msk.bf16.vlgmr.msra.gmra.mrb[8].mxu1 %vm1328_vm5, %v1558_v42 }
 0x311   : > { %5490 = vmatpush3.bf16.xpose.msra.mxu1 %v1683_v45  ;;  %5491 = vmatprep.mubr.msk.bf16.mxu1 %vm5953_vm2, %v5952_v12 }
 0x312   : > { %5501 = vmatprep.subr.bf16.mxu1 %v5952_v12 }
 0x318   : > { %5492 = vmatmul.mubr.msk.bf16.vlgmr.msra.gmra.mrb[12].mxu1 %vm1328_vm5, %v1676_v46 }
 0x319   : > { %5505 = vmatprep.mubr.msk.bf16.mxu1 %vm5953_vm2, %v5952_v12 }
 0x3d3   : > { %v1369_v47 = vpop.f32.mrb[0].mxu1 }
 0x3d4   : > { %v1375_v49 = vmul.f32 0.35355338, %v1369_v47  ;;  %v5457_v50 = vpop.f32.mrb[1].mxu1 }
 0x3d5   : > { %v1372_v51 = vpop.f32.mrb[2].mxu1 }
 0x3d6   : > { %v5458_v52 = vpop.f32.mrb[3].mxu1  ;;  %v1376_v53 = vadd.f32 %v1375_v49, %v1216_v48 }
 0x3d8   : > { %v1377_v54 = vsel %vm1328_vm5, %v1376_v53, -inf }
 0x3d9   : > { %1378 = vmax.xlane.f32.xlu1 %v1377_v54 }
 0x3db   : > { %v1483_v55 = vpop.f32.mrb[4].mxu1 }
 0x3dc   : > { %v1489_v56 = vmul.f32 0.35355338, %v1483_v55  ;;  %v5469_v57 = vpop.f32.mrb[5].mxu1 }
 0x3dd   : > { %v1486_v58 = vpop.f32.mrb[6].mxu1 }
 0x3de   : > { %v5470_v59 = vpop.f32.mrb[7].mxu1  ;;  %v1490_v60 = vadd.f32 %v1489_v56, %v1216_v48 }
 0x3e0   : > { %v1491_v61 = vsel %vm1328_vm5, %v1490_v60, -inf }
 0x3e1   : > { %1492 = vmax.xlane.f32.xlu0 %v1491_v61 }
 0x3e3   : > { %v1601_v62 = vpop.f32.mrb[8].mxu1 }
 0x3e4   : > { %v1607_v63 = vmul.f32 0.35355338, %v1601_v62  ;;  %v5481_v0 = vpop.f32.mrb[9].mxu1 }
 0x3e5   : > { %v1604_v1 = vpop.f32.mrb[10].mxu1 }
 0x3e6   : > { %v5482_v2 = vpop.f32.mrb[11].mxu1  ;;  %v1608_v3 = vadd.f32 %v1607_v63, %v1216_v48  ;;  %v5671_v1 = vld [vmem:[%s6248_s22] sm:$0xff]  }
 0x3e7   : > { %5502 = vmatpush3.bf16.msra.mxu1 %v5671_v1  ;;  %v5672_v2 = vld [vmem:[%s6248_s22 + $0x8] sm:$0xff]   ;;  %s7051_s22 = sld [smem:[#allocation32_spill]] }
 0x3e8   : > { %v1609_v4 = vsel %vm1328_vm5, %v1608_v3, -inf  ;;  %5503 = vmatprep.subr.bf16.mxu1 %v5952_v12 }
 0x3e9   : > { %1610 = vmax.xlane.f32.xlu1 %v1609_v4 }
 0x3eb   : > { %v1719_v5 = vpop.f32.mrb[12].mxu1  ;;  %5504 = vmatpush3.bf16.msra.mxu1 %v5672_v2 }
 0x3ec   : > { %v1725_v6 = vmul.f32 0.35355338, %v1719_v5  ;;  %v5493_v7 = vpop.f32.mrb[13].mxu1  ;;  %5517 = vmatprep.subr.bf16.mxu1 %v5952_v12 }
 0x3ed   : > { %v1722_v8 = vpop.f32.mrb[14].mxu1  ;;  %s7052_s4 = scalar_lea.vmem %s7051_s22, %s6190_s3 }
 0x3ee   : > { %v5494_v9 = vpop.f32.mrb[15].mxu1  ;;  %v1726_v10 = vadd.f32 %v1725_v6, %v1216_v48 }
 0x3f0   : > { %v1727_v11 = vsel %vm1328_vm5, %v1726_v10, -inf }
 0x3f1   : > { %1728 = vmax.xlane.f32.xlu0 %v1727_v11 }
 0x466   : > { %v1379_v13 = vpop.xlane.xlu1 %1378 }
 0x467   : > { %v1380_v14 = vsub.f32 %v1376_v53, %v1379_v13 }
 0x469   : > { %v1381_v15 = vmul.f32 1.442695, %v1380_v14 }
 0x46b   : > { %5811 = vpow2.f32 %v1381_v15 }
 0x46e   : > { %v1493_v16 = vpop.xlane.xlu0 %1492 }
 0x46f   : > { %v1494_v17 = vsub.f32 %v1490_v60, %v1493_v16 }
 0x471   : > { %v1495_v18 = vmul.f32 1.442695, %v1494_v17 }
 0x473   : > { %5813 = vpow2.f32 %v1495_v18  ;;  %v5012_v18 = vld [vmem:[%s7034_s19] ss:$0 sm:$0xff]  ;;  %s7040_s19 = sld [smem:[#allocation38_spill]] }
 0x475   : > { %v5812_v19 = vpop.eup %5811 }
 0x476   : > { %v1383_v20 = vsel %vm1328_vm5, %v5812_v19, 0.0  ;;  %v1611_v28 = vpop.xlane.xlu1 %1610 }
 0x477   : > { %1384 = vadd.xlane.f32.xlu1 %v1383_v20  ;;  %v1612_v29 = vsub.f32 %v1608_v3, %v1611_v28 }
 0x479   : > { %v1613_v30 = vmul.f32 1.442695, %v1612_v29 }
 0x47d   : > { %v5814_v21 = vpop.eup %5813 }
 0x47e   : > { %v1729_v22 = vpop.xlane.xlu0 %1728  ;;  %v1497_v23 = vsel %vm1328_vm5, %v5814_v21, 0.0 }
 0x47f   : > { %v1730_v24 = vsub.f32 %v1726_v10, %v1729_v22  ;;  %1498 = vadd.xlane.f32.xlu0 %v1497_v23 }
 0x481   : > { %v1731_v25 = vmul.f32 1.442695, %v1730_v24 }
 0x483   : > { %5815 = vpow2.f32 %v1731_v25 }
 0x484   : > { %5817 = vpow2.f32 %v1613_v30 }
 0x488   : > { %1389 = vrot.lane.b32.xlu1 %v6341_v34, %s5961_s25  ;;  %s7045_s25 = sld [smem:[#allocation26_spill]] }
 0x48d   : > { %v5816_v26 = vpop.eup %5815 }
 0x48e   : > { %v1733_v27 = vsel %vm1328_vm5, %v5816_v26, 0.0  ;;  %v5818_v31 = vpop.eup %5817 }
 0x48f   : > { %1734 = vadd.xlane.f32.xlu0 %v1733_v27  ;;  %v1615_v32 = vsel %vm1328_vm5, %v5818_v31, 0.0 }
 0x4a5   : > { %1503 = vrot.lane.b32.xlu0 %v6341_v34, %s5962_s18 }
 0x4ac   : > { %1616 = vadd.xlane.f32.xlu1 %v1615_v32  ;;  %v5674_v32 = vld [vmem:[%s6266_s2 + $0x8] sm:$0xff]  }
 0x4bd   : > { %1621 = vrot.lane.b32.xlu1 %v6341_v34, %s5963_s8  ;;  %s7038_s8 = sld [smem:[#allocation30_spill]] }
 0x4c1   : > { %1739 = vrot.lane.b32.xlu1 %v6341_v34, %s5964_s5 }
 0x4c3   : > { %s7039_s5 = scalar_lea.vmem %s7038_s8, %s6190_s3 }
 0x504   : > { %v1385_v33 = vpop.xlane.xlu1 %1384 }
 0x505   : > { %5819 = vrcp.f32 %v1385_v33  ;;  %v1214_v33 = vld [vmem:[%s7035_s7] sm:$0xff] }
 0x508   : > { %v1390_v35 = vpop.permute.xlu1 %1389 }
 0x509   : > { %v1396_v36 = vsel %vm1394_vm6, %v1390_v35, 0  ;;  %v1215_v35 = vld [vmem:[%s7035_s7 + $0x8] sm:$0xf]  ;;  %s7041_s7 = scalar_lea.vmem %s7040_s19, %s6190_s3  ;;  %s7054_s19 = sld [smem:[#allocation9_spill]] }
 0x50a   : > { %5460 = vmatpush3.bf16.msra.mxu0 %v1396_v36  ;;  %v1970_v36 = vpack.c.bf16 %v1215_v35, %v1214_v33 }
 0x50b   : > { %5471 = vmatprep.subr.bf16.mxu0 %v5952_v12 }
 0x50c   : > { %v1499_v38 = vpop.xlane.xlu0 %1498 }
 0x50d   : > { %5821 = vrcp.f32 %v1499_v38  ;;  %v5676_v38 = vld [vmem:[%s6257_s27 + $0x8] sm:$0xff]  }
 0x50f   : > { %v5820_v37 = vpop.eup %5819  ;;  %p5207_p1 = scmp.ne.s32.totalorder %s7054_s19, 1 }
 0x510   : > { %v1387_v39 = vmul.f32 %v5820_v37, %v5812_v19  ;;  %v5851_v19 = vld [vmem:[%s6303_s28] sm:$0xff]  ;;  %v5675_v37 = vld [vmem:[%s6257_s27] sm:$0xff]  }
 0x512   : > { %v1388_v40 = vpack.c.bf16 %v1387_v39, %v1387_v39 }
 0x514   : > { %5462 = vmatmul.mubr.msk.bf16.vlgmr.msra.gmra.mrb[4].mxu0 %vm1328_vm5, %v1388_v40 }
 0x515   : > { %5473 = vmatprep.mubr.msk.bf16.mxu0 %vm5953_vm2, %v5952_v12 }
 0x517   : > { %v5822_v34 = vpop.eup %5821 }
 0x518   : > { %v1501_v42 = vmul.f32 %v5822_v34, %v5814_v21 }
 0x51a   : > { %v1502_v45 = vpack.c.bf16 %v1501_v42, %v1501_v42 }
 0x51c   : > { %v1735_v41 = vpop.xlane.xlu0 %1734 }
 0x520   : > { %v1504_v43 = vpop.permute.xlu0 %1503 }
 0x521   : > { %v1509_v44 = vsel %vm1394_vm6, %v1504_v43, 0 }
 0x522   : > { %5472 = vmatpush3.bf16.msra.mxu0 %v1509_v44 }
 0x523   : > { %5483 = vmatprep.subr.bf16.mxu0 %v5952_v12 }
 0x525   : > { %5474 = vmatmul.mubr.msk.bf16.vlgmr.msra.gmra.mrb[8].mxu0 %vm1328_vm5, %v1502_v45 }
 0x526   : > { %5485 = vmatprep.mubr.msk.bf16.mxu0 %vm5953_vm2, %v5952_v12 }
 0x539   : > { %v1617_v46 = vpop.xlane.xlu1 %1616 }
 0x53a   : > { %5823 = vrcp.f32 %v1617_v46  ;;  %v5013_v46 = vld [vmem:[%s7037_s10] ss:$0 sm:$0xff]  ;;  %s7043_s10 = scalar_lea.vmem %s7042_s29, %s6190_s3  ;;  %s7056_s29 = sld [smem:[#allocation46_spill]] (!%p5207_p1) }
 0x53b   : > { %5825 = vrcp.f32 %v1735_v41 }
 0x53d   : > { %v1622_v47 = vpop.permute.xlu1 %1621 }
 0x53e   : > { %v1627_v48 = vsel %vm1394_vm6, %v1622_v47, 0 }
 0x53f   : > { %5484 = vmatpush3.bf16.msra.mxu0 %v1627_v48 }
 0x540   : > { %5495 = vmatprep.subr.bf16.mxu0 %v5952_v12 }
 0x541   : > { %v1740_v51 = vpop.permute.xlu1 %1739 }
 0x542   : > { %v1745_v54 = vsel %vm1394_vm6, %v1740_v51, 0 }
 0x544   : > { %v5824_v49 = vpop.eup %5823 }
 0x545   : > { %v1619_v50 = vmul.f32 %v5824_v49, %v5818_v31  ;;  %v5826_v53 = vpop.eup %5825  ;;  %v5673_v31 = vld [vmem:[%s6266_s2] sm:$0xff]  }
 0x546   : > { %v1737_v55 = vmul.f32 %v5826_v53, %v5816_v26  ;;  %v5014_v49 = vld [vmem:[%s7039_s5] ss:$0 sm:$0xff] }
 0x547   : > { %v1620_v52 = vpack.c.bf16 %v1619_v50, %v1619_v50  ;;  %v5019_v53 = vld [vmem:[%s7041_s7] ss:$0 sm:$0xff]  ;;  %s7055_s7 = sld [smem:[#allocation45_spill]] (!%p5207_p1) }
 0x548   : > { %v1738_v56 = vpack.c.bf16 %v1737_v55, %v1737_v55 }
 0x549   : > { %5486 = vmatmul.mubr.msk.bf16.vlgmr.msra.gmra.mrb[12].mxu0 %vm1328_vm5, %v1620_v52 }
 0x54a   : > { %5496 = vmatpush3.bf16.msra.mxu0 %v1745_v54  ;;  %5497 = vmatprep.mubr.msk.bf16.mxu0 %vm5953_vm2, %v5952_v12 }
 0x54b   : > { %5509 = vmatprep.subr.bf16.mxu0 %v5952_v12 }
 0x551   : > { %5498 = vmatmul.mubr.msk.bf16.vlgmr.msra.gmra.mrb[16].mxu0 %vm1328_vm5, %v1738_v56 }
 0x552   : > { %5513 = vmatprep.mubr.msk.bf16.mxu0 %vm5953_vm2, %v5952_v12  ;;  %5510 = vmatpush3.bf16.msra.mxu0 %v5675_v37 }
 0x553   : > { %5511 = vmatprep.subr.bf16.mxu0 %v5952_v12 }
 0x556   : > { %5512 = vmatpush3.bf16.msra.mxu0 %v5676_v38 }
 0x557   : > { %5525 = vmatprep.subr.bf16.mxu0 %v5952_v12 }
 0x5e7   : > { %v1432_v57 = vpop.f32.mrb[4].mxu0 }
 0x5e8   : > { %1438 = vst.msk [vmem:[#allocation2] sm:$0xff] %vm1328_vm5, %v1432_v57  ;;  %v5463_v58 = vpop.f32.mrb[5].mxu0 }
 0x5e9   : > { %v1435_v59 = vpop.f32.mrb[6].mxu0 }
 0x5ea   : > { %v5464_v60 = vpop.f32.mrb[7].mxu0 }
 0x5f8   : > { %v1545_v61 = vpop.f32.mrb[8].mxu0 }
 0x5f9   : > { %1552 = vrot.lane.b32.xlu0 %v1545_v61, %s5965_s23  ;;  %v5475_v62 = vpop.f32.mrb[9].mxu0 }
 0x5fa   : > { %v1548_v63 = vpop.f32.mrb[10].mxu0  ;;  %v5015_v62 = vld [vmem:[%s7043_s10] ss:$0 sm:$0xff] }
 0x5fb   : > { %v5476_v0 = vpop.f32.mrb[11].mxu0 }
 0x61c   : > { %v1663_v3 = vpop.f32.mrb[12].mxu0 }
 0x61d   : > { %1670 = vrot.lane.b32.xlu1 %v1663_v3, %s5966_s6  ;;  %v5487_v4 = vpop.f32.mrb[13].mxu0 }
 0x61e   : > { %v1666_v5 = vpop.f32.mrb[14].mxu0 }
 0x61f   : > { %v5488_v6 = vpop.f32.mrb[15].mxu0 }
 0x624   : > { %v1781_v7 = vpop.f32.mrb[16].mxu0 }
 0x625   : > { %1788 = vrot.lane.b32.xlu0 %v1781_v7, %s5967_s0  ;;  %v5499_v8 = vpop.f32.mrb[17].mxu0 }
 0x626   : > { %v1784_v9 = vpop.f32.mrb[18].mxu0 }
 0x627   : > { %v5500_v10 = vpop.f32.mrb[19].mxu0 }
 0x66b   : > { %v1553_v11 = vpop.permute.xlu0 %1552 }
 0x66c   : > { %1556 = vst.msk [vmem:[#allocation2] sm:$0xff] %vm1555_vm7, %v1553_v11 }
 0x68f   : > { %v1671_v13 = vpop.permute.xlu1 %1670 }
 0x690   : > { %1674 = vst.msk [vmem:[#allocation2] sm:$0xff] %vm1673_vm8, %v1671_v13 }
 0x697   : > { %v1789_v14 = vpop.permute.xlu0 %1788 }
 0x698   : > { %1792 = vst.msk [vmem:[#allocation2] sm:$0xff] %vm1791_vm9, %v1789_v14 }
 0x69f   : > { %v1793_v15 = vld [vmem:[#allocation2] sm:$0xff] }
 0x6a0   : > { %v1798_v16 = vpack.c.bf16 %v1793_v15, %v1793_v15 }
 0x6a2   : > { %5506 = vmatmul.mubr.msk.bf16.vlgmr.msra.gmra.mrb[16].mxu1 %vm1220_vm1, %v1798_v16 }
 0x6a3   : > { %5521 = vmatprep.mubr.msk.bf16.mxu1 %vm5953_vm2, %v5952_v12  ;;  %5518 = vmatpush3.bf16.msra.mxu1 %v5673_v31 }
 0x6a4   : > { %5519 = vmatprep.subr.bf16.mxu1 %v5952_v12 }
 0x6a7   : > { %5520 = vmatpush3.bf16.msra.mxu1 %v5674_v32 }
 0x6a8   : > { %5531 = vmatprep.subr.bf16.mxu1 %v5952_v12 }
 0x6aa   : > { %5522 = vmatmul.mubr.msk.bf16.vlgmr.msra.gmra.mrb[20].mxu1 %vm1220_vm1, %v1970_v36 }
 0x6ab   : > { %5533 = vmatprep.mubr.msk.bf16.mxu1 %vm5953_vm2, %v5952_v12 }
 0x775   : > { %v1848_v17 = vpop.f32.mrb[16].mxu1 }
 0x776   : > { %v1854_v20 = vadd.f32 %v5851_v19, %v1848_v17  ;;  %v5507_v21 = vpop.f32.mrb[17].mxu1 }
 0x777   : > { %v1851_v22 = vpop.f32.mrb[18].mxu1 }
 0x778   : > { %v6431_v23 = vadd.f32 %v5012_v18, %v1854_v20  ;;  %v5508_v24 = vpop.f32.mrb[19].mxu1 }
 0x77a   : > { %v1865_v25 = vsel %vm1220_vm1, %v6431_v23, 0.0 }
 0x77b   : > { %1866 = vadd.xlane.f32.xlu1 %v1865_v25 }
 0x77d   : > { %v2027_v54 = vpop.f32.mrb[20].mxu1 }
 0x77e   : > { %v2028_v55 = vadd.f32 %v5019_v53, %v2027_v54  ;;  %v5523_v56 = vpop.f32.mrb[21].mxu1 }
 0x77f   : > { %v2030_v57 = vpop.f32.mrb[22].mxu1 }
 0x780   : > { %v2031_v58 = vadd.f32 %v5019_v53, %v2030_v57  ;;  %v5524_v59 = vpop.f32.mrb[23].mxu1 }
 0x782   : > { %v6468_v60 = vpack.c.bf16 %v2031_v58, %v2028_v55 }
 0x784   : > { %v2040_v61 = vsel %vm1328_vm5, %v6468_v60, 0 }
 0x808   : > { %v1867_v26 = vpop.xlane.xlu1 %1866 }
 0x809   : > { %v1868_v27 = vmul.f32 0.03125, %v1867_v26 }
 0x80b   : > { %v1869_v28 = vsub.f32 %v6431_v23, %v1868_v27 }
 0x80d   : > { %v1870_v29 = vmul.f32 %v1869_v28, %v1869_v28  ;;  %v1881_v47 = vmul.f32 %v5013_v46, %v1869_v28 }
 0x80f   : > { %v1871_v30 = vsel %vm1220_vm1, %v1870_v29, 0.0 }
 0x810   : > { %1872 = vadd.xlane.f32.xlu0 %v1871_v30 }
 0x826   : > { %2157 = vrot.lane.b32.xlu0 %v6468_v60, %s5954_s30 }
 0x89d   : > { %v1873_v39 = vpop.xlane.xlu0 %1872 }
 0x89e   : > { %v1874_v40 = vmul.f32 0.032258064, %v1873_v39 }
 0x8a0   : > { %5827 = vrsqrt.f32 %v1874_v40  ;;  %vm1884_vm10 = vcmp.eq.f32.partialorder %v1874_v40, inf  ;;  %v1887_v42 = vand.u32 2147483648, %v1874_v40  ;;  %vm1886_vm11 = vcmp.eq.f32.partialorder %v1874_v40, 0.0 }
 0x8a1   : > { %v2158_v2 = vpop.permute.xlu0 %2157 }
 0x8a2   : > { %v2163_v6 = vsel %vm1328_vm5, %v2158_v2, 0 }
 0x8aa   : > { %v5828_v34 = vpop.eup %5827 }
 0x8ab   : > { %v1883_v41 = vmul.f32 %v5828_v34, %v1874_v40 }
 0x8ad   : > { %v1885_v43 = vsel %vm1884_vm10, %v1874_v40, %v1883_v41 }
 0x8ae   : > { %v1888_v44 = vsel %vm1886_vm11, %v1887_v42, %v1885_v43 }
 0x8af   : > { %v1889_v45 = vadd.f32 1e-06, %v1888_v44 }
 0x8b1   : > { %5829 = vrcp.f32 %v1889_v45 }
 0x8bb   : > { %v5830_v48 = vpop.eup %5829 }
 0x8bc   : > { %v1891_v50 = vmul.f32 %v5830_v48, %v1881_v47 }
 0x8be   : > { %v1898_v51 = vadd.f32 %v5014_v49, %v1891_v50 }
 0x8c0   : > { %v1903_v52 = vpack.c.bf16 %v1898_v51, %v1898_v51 }
 0x8c2   : > { %5514 = vmatmul.mubr.msk.bf16.vlgmr.msra.gmra.mrb[20].mxu0 %vm1220_vm1, %v1903_v52 }
 0x8c3   : > { %5527 = vmatprep.mubr.msk.bf16.mxu0 %vm5953_vm2, %v5952_v12  ;;  %5526 = vmatpush3.bf16.xpose.msra.mxu0 %v2040_v61 }
 0x8c4   : > { %5537 = vmatprep.subr.bf16.mxu0 %v5952_v12 }
 0x995   : > { %v1960_v63 = vpop.f32.mrb[20].mxu0 }
 0x996   : > { %v1961_v0 = vadd.f32 %v5015_v62, %v1960_v63  ;;  %v5515_v1 = vpop.f32.mrb[21].mxu0 }
 0x997   : > { %v1963_v3 = vpop.f32.mrb[22].mxu0 }
 0x998   : > { %v2034_v4 = vpack.c.bf16 %v1961_v0, %v1961_v0  ;;  %v5516_v5 = vpop.f32.mrb[23].mxu0 }
 0x99a   : > { %2272 = vrot.lane.b32.xlu0 %v2034_v4, %s5958_s15  ;;  %2155 = vrot.lane.b32.xlu1 %v2034_v4, %s5954_s30  ;;  %s7044_s30 = sld [smem:[#allocation19_spill]] }
 0x99b   : > { %5528 = vmatmul.mubr.msk.bf16.vlgmr.msra.gmra.mrb[24].mxu0 %vm1328_vm5, %v2034_v4 }
 0x99c   : > { %5538 = vmatpush3.bf16.xpose.msra.mxu0 %v2163_v6  ;;  %5539 = vmatprep.mubr.msk.bf16.mxu0 %vm5953_vm2, %v5952_v12 }
 0x99d   : > { %5549 = vmatprep.subr.bf16.mxu0 %v5952_v12 }
 0x99e   : > { %2389 = vrot.lane.b32.xlu0 %v2034_v4, %s5960_s16  ;;  %2274 = vrot.lane.b32.xlu1 %v6468_v60, %s5958_s15 }
 0x9a0   : > { %s7046_s18 = scalar_lea.vmem %s7045_s25, %s7044_s30 }
 0x9a1   : > { %v5024_v16 = vld [vmem:[%s7046_s18] ss:$0 sm:$0xff] }
 0x9a2   : > { %2391 = vrot.lane.b32.xlu1 %v6468_v60, %s5960_s16 }
 0xa0c   : > { %v2156_v7 = vpop.permute.xlu1 %2155  ;;  %v2273_v11 = vpop.permute.xlu0 %2272 }
 0xa0d   : > { %5540 = vmatmul.mubr.msk.bf16.vlgmr.msra.gmra.mrb[28].mxu0 %vm1328_vm5, %v2156_v7 }
 0xa0e   : > { %5551 = vmatprep.mubr.msk.bf16.mxu0 %vm5953_vm2, %v5952_v12 }
 0xa10   : > { %v2275_v8 = vpop.permute.xlu1 %2274  ;;  %v2390_v14 = vpop.permute.xlu0 %2389 }
 0xa11   : > { %v2280_v9 = vsel %vm1328_vm5, %v2275_v8, 0 }
 0xa12   : > { %5550 = vmatpush3.bf16.xpose.msra.mxu0 %v2280_v9 }
 0xa13   : > { %5561 = vmatprep.subr.bf16.mxu0 %v5952_v12 }
 0xa14   : > { %v2392_v10 = vpop.permute.xlu1 %2391 }
 0xa15   : > { %v2397_v13 = vsel %vm1328_vm5, %v2392_v10, 0 }
 0xa19   : > { %5552 = vmatmul.mubr.msk.bf16.vlgmr.msra.gmra.mrb[32].mxu0 %vm1328_vm5, %v2273_v11 }
 0xa1a   : > { %5562 = vmatpush3.bf16.xpose.msra.mxu0 %v2397_v13  ;;  %5563 = vmatprep.mubr.msk.bf16.mxu0 %vm5953_vm2, %v5952_v12 }
 0xa1b   : > { %5573 = vmatprep.subr.bf16.mxu0 %v5952_v12 }
 0xa21   : > { %5564 = vmatmul.mubr.msk.bf16.vlgmr.msra.gmra.mrb[36].mxu0 %vm1328_vm5, %v2390_v14 }
 0xa22   : > { %5577 = vmatprep.mubr.msk.bf16.mxu0 %vm5953_vm2, %v5952_v12 }
 0xa6e   : > { %v2076_v15 = vpop.f32.mrb[24].mxu0 }
 0xa6f   : > { %v2082_v17 = vmul.f32 0.35355338, %v2076_v15  ;;  %v5529_v18 = vpop.f32.mrb[25].mxu0 }
 0xa70   : > { %v2079_v19 = vpop.f32.mrb[26].mxu0 }
 0xa71   : > { %v5530_v20 = vpop.f32.mrb[27].mxu0  ;;  %v2089_v21 = vadd.f32 %v5024_v16, %v2082_v17 }
 0xa73   : > { %v2091_v22 = vsel %vm2090_vm12, %v2089_v21, -inf }
 0xa74   : > { %2092 = vmax.xlane.f32.xlu1 %v2091_v22 }
 0xae0   : > { %v2199_v24 = vpop.f32.mrb[28].mxu0 }
 0xae1   : > { %v2205_v25 = vmul.f32 0.35355338, %v2199_v24  ;;  %v5541_v26 = vpop.f32.mrb[29].mxu0 }
 0xae2   : > { %v2202_v27 = vpop.f32.mrb[30].mxu0 }
 0xae3   : > { %v5542_v28 = vpop.f32.mrb[31].mxu0  ;;  %v2206_v29 = vadd.f32 %v5024_v16, %v2205_v25 }
 0xae5   : > { %v2207_v30 = vsel %vm2090_vm12, %v2206_v29, -inf }
 0xae6   : > { %2208 = vmax.xlane.f32.xlu0 %v2207_v30 }
 0xaec   : > { %v2316_v31 = vpop.f32.mrb[32].mxu0 }
 0xaed   : > { %v2322_v32 = vmul.f32 0.35355338, %v2316_v31  ;;  %v5553_v33 = vpop.f32.mrb[33].mxu0 }
 0xaee   : > { %v2319_v35 = vpop.f32.mrb[34].mxu0 }
 0xaef   : > { %v5554_v36 = vpop.f32.mrb[35].mxu0  ;;  %v2323_v37 = vadd.f32 %v5024_v16, %v2322_v32 }
 0xaf1   : > { %v2324_v38 = vsel %vm2090_vm12, %v2323_v37, -inf }
 0xaf2   : > { %2325 = vmax.xlane.f32.xlu0 %v2324_v38 }
 0xaf4   : > { %v2433_v39 = vpop.f32.mrb[36].mxu0 }
 0xaf5   : > { %v2439_v40 = vmul.f32 0.35355338, %v2433_v39  ;;  %v5565_v34 = vpop.f32.mrb[37].mxu0 }
 0xaf6   : > { %v2436_v41 = vpop.f32.mrb[38].mxu0 }
 0xaf7   : > { %v5566_v42 = vpop.f32.mrb[39].mxu0  ;;  %v2440_v43 = vadd.f32 %v5024_v16, %v2439_v40 }
 0xaf9   : > { %v2441_v44 = vsel %vm2090_vm12, %v2440_v43, -inf }
 0xafa   : > { %2442 = vmax.xlane.f32.xlu1 %v2441_v44 }
 0xb01   : > { %v2093_v45 = vpop.xlane.xlu1 %2092 }
 0xb02   : > { %v2094_v46 = vsub.f32 %v2089_v21, %v2093_v45 }
 0xb04   : > { %v2095_v47 = vmul.f32 1.442695, %v2094_v46 }
 0xb06   : > { %5831 = vpow2.f32 %v2095_v47 }
 0xb10   : > { %v5832_v48 = vpop.eup %5831 }
 0xb11   : > { %v2097_v49 = vsel %vm2090_vm12, %v5832_v48, 0.0 }
 0xb12   : > { %2098 = vadd.xlane.f32.xlu0 %v2097_v49 }
 0xb73   : > { %v2209_v50 = vpop.xlane.xlu0 %2208 }
 0xb74   : > { %v2210_v51 = vsub.f32 %v2206_v29, %v2209_v50  ;;  %v5035_v50 = vld [vmem:[%s1184_s13] ss:$0 sm:$0xff] }
 0xb76   : > { %v2211_v52 = vmul.f32 1.442695, %v2210_v51 }
 0xb78   : > { %5833 = vpow2.f32 %v2211_v52 }
 0xb7f   : > { %v2326_v53 = vpop.xlane.xlu0 %2325 }
 0xb80   : > { %v2327_v54 = vsub.f32 %v2323_v37, %v2326_v53 }
 0xb82   : > { %v5834_v55 = vpop.eup %5833  ;;  %v2328_v56 = vmul.f32 1.442695, %v2327_v54 }
 0xb83   : > { %v2213_v57 = vsel %vm2090_vm12, %v5834_v55, 0.0 }
 0xb84   : > { %5835 = vpow2.f32 %v2328_v56  ;;  %2214 = vadd.xlane.f32.xlu1 %v2213_v57 }
 0xb87   : > { %v2443_v61 = vpop.xlane.xlu1 %2442 }
 0xb88   : > { %v2444_v62 = vsub.f32 %v2440_v43, %v2443_v61 }
 0xb8a   : > { %v2445_v63 = vmul.f32 1.442695, %v2444_v62  ;;  %v2612_v62 = vld [vmem:[%s6285_s26] sm:$0xff] }
 0xb8c   : > { %5837 = vpow2.f32 %v2445_v63  ;;  %v2620_v63 = vld [vmem:[%s6285_s26 + $0x40] sm:$0xff] }
 0xb8e   : > { %v5836_v58 = vpop.eup %5835 }
 0xb8f   : > { %v2330_v59 = vsel %vm2090_vm12, %v5836_v58, 0.0 }
 0xb90   : > { %2331 = vadd.xlane.f32.xlu0 %v2330_v59 }
 0xb95   : > { %2219 = vrot.lane.b32.xlu1 %v6468_v60, %s5956_s21 }
 0xb96   : > { %v5838_v0 = vpop.eup %5837 }
 0xb97   : > { %v2447_v1 = vsel %vm2090_vm12, %v5838_v0, 0.0 }
 0xb9f   : > { %v2099_v2 = vpop.xlane.xlu0 %2098 }
 0xba0   : > { %5839 = vrcp.f32 %v2099_v2  ;;  %v2621_v2 = vld [vmem:[%s6285_s26 + $0x48] sm:$0xff] }
 0xba6   : > { %2104 = vrot.lane.b32.xlu0 %v6468_v60, %s5955_s20  ;;  %s7047_s20 = sld [smem:[#allocation21_spill]] }
 0xbaa   : > { %2453 = vrot.lane.b32.xlu0 %v6468_v60, %s5959_s17  ;;  %v5840_v4 = vpop.eup %5839 }
 0xbab   : > { %v2101_v6 = vmul.f32 %v5840_v4, %v5832_v48 }
 0xbac   : > { %v5677_v36 = vld [vmem:[%s7047_s20] sm:$0xff]   ;;  %v5678_v37 = vld [vmem:[%s7047_s20 + $0x8] sm:$0xff]  }
 0xbad   : > { %v2102_v10 = vpack.c.bf16 %v2101_v6, %v2101_v6  ;;  %5574 = vmatpush3.bf16.msra.mxu0 %v5677_v36  ;;  %v2628_v6 = vld [vmem:[%s6285_s26 + $0x80] sm:$0xff] }
 0xbae   : > { %5575 = vmatprep.subr.bf16.mxu0 %v5952_v12  ;;  %v5037_v36 = vld [vmem:[%s7052_s4] ss:$0 sm:$0xff] }
 0xbb1   : > { %5576 = vmatpush3.bf16.msra.mxu0 %v5678_v37 }
 0xbb9   : > { %2448 = vadd.xlane.f32.xlu1 %v2447_v1  ;;  %v5039_v1 = vcombine.high %v2612_v62, %v2620_v63 }
 0xbca   : > { %2336 = vrot.lane.b32.xlu1 %v6468_v60, %s5957_s11 }
 0xc11   : > { %v2215_v3 = vpop.xlane.xlu1 %2214 }
 0xc12   : > { %5841 = vrcp.f32 %v2215_v3  ;;  %v5038_v3 = vcombine.low %v2612_v62, %v2620_v63  ;;  %v2626_v62 = vld [vmem:[%s6285_s26 + $0x70] sm:$0xff]  ;;  %v2619_v63 = vld [vmem:[%s6285_s26 + $0x38] sm:$0xff] }
 0xc15   : > { %v2220_v9 = vpop.permute.xlu1 %2219 }
 0xc16   : > { %v2225_v13 = vsel %vm2109_vm13, %v2220_v9, 0 }
 0xc1c   : > { %v5842_v11 = vpop.eup %5841 }
 0xc1d   : > { %v2332_v5 = vpop.xlane.xlu0 %2331  ;;  %v2217_v60 = vmul.f32 %v5842_v11, %v5834_v55  ;;  %v2637_v11 = vld [vmem:[%s6285_s26 + $0xc8] sm:$0xff] }
 0xc1e   : > { %5843 = vrcp.f32 %v2332_v5 }
 0xc1f   : > { %v2218_v14 = vpack.c.bf16 %v2217_v60, %v2217_v60 }
 0xc21   : > { %v2105_v7 = vpop.permute.xlu0 %2104 }
 0xc22   : > { %v2111_v8 = vsel %vm2109_vm13, %v2105_v7, 0  ;;  %v2636_v7 = vld [vmem:[%s6285_s26 + $0xc0] sm:$0xff] }
 0xc23   : > { %5532 = vmatpush3.bf16.msra.mxu1 %v2111_v8  ;;  %v2629_v8 = vld [vmem:[%s6285_s26 + $0x88] sm:$0xff]  ;;  %v5054_v9 = vcombine.low %v2628_v6, %v2636_v7 }
 0xc24   : > { %5543 = vmatprep.subr.bf16.mxu1 %v5952_v12  ;;  %v5056_v60 = vcombine.low %v2629_v8, %v2637_v11 }
 0xc25   : > { %v2454_v20 = vpop.permute.xlu0 %2453 }
 0xc26   : > { %5534 = vmatmul.mubr.msk.bf16.vlgmr.msra.gmra.mrb[24].mxu1 %vm2090_vm12, %v2102_v10  ;;  %v2459_v22 = vsel %vm2109_vm13, %v2454_v20, 0  ;;  %v5055_v10 = vcombine.high %v2628_v6, %v2636_v7  ;;  %v2642_v6 = vld [vmem:[%s6285_s26 + $0xf0] sm:$0xff]  ;;  %v2635_v7 = vld [vmem:[%s6285_s26 + $0xb8] sm:$0xff] }
 0xc27   : > { %5544 = vmatpush3.bf16.msra.mxu1 %v2225_v13  ;;  %5545 = vmatprep.mubr.msk.bf16.mxu1 %vm5953_vm2, %v5952_v12  ;;  %v5968_v13 = vmov 0  }
 0xc28   : > { %5555 = vmatprep.subr.bf16.mxu1 %v5952_v12  ;;  %v5844_v15 = vpop.eup %5843 }
 0xc29   : > { %v2334_v17 = vmul.f32 %v5844_v15, %v5836_v58  ;;  %v2614_v15 = vld [vmem:[%s6285_s26 + $0x10] sm:$0xff] }
 0xc2b   : > { %v2335_v21 = vpack.c.bf16 %v2334_v17, %v2334_v17  ;;  %v2615_v17 = vld [vmem:[%s6285_s26 + $0x18] sm:$0xff] }
 0xc2e   : > { %5546 = vmatmul.mubr.msk.bf16.vlgmr.msra.gmra.mrb[28].mxu1 %vm2090_vm12, %v2218_v14  ;;  %v5057_v14 = vcombine.high %v2629_v8, %v2637_v11  ;;  %v2643_v8 = vld [vmem:[%s6285_s26 + $0xf8] sm:$0xff] }
 0xc2f   : > { %5557 = vmatprep.mubr.msk.bf16.mxu1 %vm5953_vm2, %v5952_v12 }
 0xc46   : > { %v2449_v16 = vpop.xlane.xlu1 %2448 }
 0xc47   : > { %5845 = vrcp.f32 %v2449_v16  ;;  %v2622_v16 = vld [vmem:[%s6285_s26 + $0x50] sm:$0xff] }
 0xc48   : > { %v5042_v20 = vcombine.low %v2614_v15, %v2622_v16 }
 0xc4a   : > { %v2337_v18 = vpop.permute.xlu1 %2336 }
 0xc4b   : > { %v2342_v19 = vsel %vm2109_vm13, %v2337_v18, 0  ;;  %v5043_v18 = vcombine.high %v2614_v15, %v2622_v16  ;;  %v5068_v15 = vcombine.low %v2635_v7, %v2643_v8  ;;  %v5679_v16 = vld [vmem:[%s6300_s1 + $0x40] sm:$0xff]  }
 0xc4c   : > { %5556 = vmatpush3.bf16.msra.mxu1 %v2342_v19  ;;  %v2623_v19 = vld [vmem:[%s6285_s26 + $0x58] sm:$0xff] }
 0xc4d   : > { %5567 = vmatprep.subr.bf16.mxu1 %v5952_v12 }
 0xc4f   : > { %5558 = vmatmul.mubr.msk.bf16.vlgmr.msra.gmra.mrb[32].mxu1 %vm2090_vm12, %v2335_v21  ;;  %v5044_v21 = vcombine.low %v2615_v17, %v2623_v19 }
 0xc50   : > { %5568 = vmatpush3.bf16.msra.mxu1 %v2459_v22  ;;  %5569 = vmatprep.mubr.msk.bf16.mxu1 %vm5953_vm2, %v5952_v12  ;;  %v5045_v22 = vcombine.high %v2615_v17, %v2623_v19  ;;  %v5680_v17 = vld [vmem:[%s6300_s1 + $0xc0] sm:$0xff]  }
 0xc51   : > { %v5846_v24 = vpop.eup %5845  ;;  %2892 = vmatprep.subr.bf16.mxu1 %v5039_v1  ;;  %v5682_v19 = vld [vmem:[%s6300_s1 + $0x80] sm:$0xff]  }
 0xc52   : > { %v2451_v25 = vmul.f32 %v5846_v24, %v5838_v0  ;;  %v2613_v0 = vld [vmem:[%s6285_s26 + $0x8] sm:$0xff] }
 0xc53   : > { %v5040_v4 = vcombine.low %v2613_v0, %v2621_v2  ;;  %v5041_v5 = vcombine.high %v2613_v0, %v2621_v2  ;;  %v2627_v0 = vld [vmem:[%s6285_s26 + $0x78] sm:$0xff] }
 0xc54   : > { %v2452_v26 = vpack.c.bf16 %v2451_v25, %v2451_v25 }
 0xc55   : > { %2933 = vmatprep.subr.bf16.mxu0 %v5041_v5  ;;  %v2634_v5 = vld [vmem:[%s6285_s26 + $0xb0] sm:$0xff] }
 0xc56   : > { %v5067_v11 = vcombine.high %v2634_v5, %v2642_v6 }
 0xc57   : > { %5570 = vmatmul.mubr.msk.bf16.vlgmr.msra.gmra.mrb[36].mxu1 %vm2090_vm12, %v2452_v26 }
 0xc58   : > { %2893 = vmatpush1.bf16.msra.mxu1 %v5038_v3  ;;  %2924 = vmatprep.mubr.bf16.mxu1 %v5968_v13 }
 0xc59   : > { %2894 = vmatprep.subr.bf16.mxu1 %v5055_v10  ;;  %v5052_v10 = vcombine.low %v2619_v63, %v2627_v0 }
 0xc5c   : > { %2895 = vmatpush1.bf16.msra.mxu1 %v5054_v9 }
 0xc5d   : > { %2974 = vmatprep.subr.bf16.mxu1 %v5043_v18  ;;  %v5681_v18 = vld [vmem:[%s6300_s1] sm:$0xff]  }
 0xcf9   : > { %v2147_v27 = vpop.f32.mrb[24].mxu1 }
 0xcfa   : > { %2153 = vst.msk [vmem:[#allocation2] sm:$0xff] %vm1328_vm5, %v2147_v27  ;;  %v5535_v28 = vpop.f32.mrb[25].mxu1 }
 0xcfb   : > { %v2150_v29 = vpop.f32.mrb[26].mxu1 }
 0xcfc   : > { %v5536_v30 = vpop.f32.mrb[27].mxu1 }
 0xd01   : > { %v2261_v31 = vpop.f32.mrb[28].mxu1 }
 0xd02   : > { %2268 = vrot.lane.b32.xlu1 %v2261_v31, %s5965_s23  ;;  %v5547_v32 = vpop.f32.mrb[29].mxu1 }
 0xd03   : > { %v2264_v33 = vpop.f32.mrb[30].mxu1 }
 0xd04   : > { %v5548_v35 = vpop.f32.mrb[31].mxu1 }
 0xd22   : > { %v2378_v38 = vpop.f32.mrb[32].mxu1 }
 0xd23   : > { %2385 = vrot.lane.b32.xlu0 %v2378_v38, %s5966_s6  ;;  %v5559_v39 = vpop.f32.mrb[33].mxu1  ;;  %s7049_s6 = sld [smem:[#allocation31_spill]]  ;;  %v2630_v38 = vld [vmem:[%s6285_s26 + $0x90] sm:$0xff] }
 0xd24   : > { %v2381_v40 = vpop.f32.mrb[34].mxu1  ;;  %v2638_v39 = vld [vmem:[%s6285_s26 + $0xd0] sm:$0xff] }
 0xd25   : > { %v5560_v34 = vpop.f32.mrb[35].mxu1  ;;  %v2631_v40 = vld [vmem:[%s6285_s26 + $0x98] sm:$0xff] }
 0xd26   : > { %v2639_v34 = vld [vmem:[%s6285_s26 + $0xd8] sm:$0xff] }
 0xd2a   : > { %v2495_v41 = vpop.f32.mrb[36].mxu1 }
 0xd2b   : > { %2502 = vrot.lane.b32.xlu1 %v2495_v41, %s5967_s0  ;;  %v5571_v42 = vpop.f32.mrb[37].mxu1  ;;  %s7050_s0 = scalar_lea.vmem %s7049_s6, %s6190_s3 }
 0xd2c   : > { %v2498_v43 = vpop.f32.mrb[38].mxu1  ;;  %v5036_v32 = vld [vmem:[%s7050_s0] ss:$0 sm:$0xff] }
 0xd2d   : > { %v5572_v44 = vpop.f32.mrb[39].mxu1  ;;  %v5059_v43 = vcombine.high %v2630_v38, %v2638_v39 }
 0xd2e   : > { %v5061_v44 = vcombine.high %v2631_v40, %v2639_v34 }
 0xd74   : > { %v2269_v45 = vpop.permute.xlu1 %2268 }
 0xd75   : > { %2271 = vst.msk [vmem:[#allocation2] sm:$0xff] %vm1555_vm7, %v2269_v45  ;;  %v2616_v45 = vld [vmem:[%s6285_s26 + $0x20] sm:$0xff] }
 0xd95   : > { %v2386_v46 = vpop.permute.xlu0 %2385 }
 0xd96   : > { %2388 = vst.msk [vmem:[#allocation2] sm:$0xff] %vm1673_vm8, %v2386_v46  ;;  %v2624_v46 = vld [vmem:[%s6285_s26 + $0x60] sm:$0xff] }
 0xd9d   : > { %v2503_v12 = vpop.permute.xlu1 %2502 }
 0xd9e   : > { %2505 = vst.msk [vmem:[#allocation2] sm:$0xff] %vm1791_vm9, %v2503_v12  ;;  %v2617_v12 = vld [vmem:[%s6285_s26 + $0x28] sm:$0xff] }
 0xda5   : > { %v2506_v47 = vld [vmem:[#allocation2] sm:$0xff] }
 0xda6   : > { %v2511_v48 = vpack.c.bf16 %v2506_v47, %v2506_v47  ;;  %v2625_v47 = vld [vmem:[%s6285_s26 + $0x68] sm:$0xff] }
 0xda8   : > { %5578 = vmatmul.mubr.msk.bf16.vlgmr.msra.gmra.mrb[40].mxu0 %vm1220_vm1, %v2511_v48  ;;  %v5058_v48 = vcombine.low %v2630_v38, %v2638_v39  ;;  %v5700_v38 = vld [vmem:[%s6300_s1 + $0xe8] sm:$0xff]  }
 0xda9   : > { %2934 = vmatpush1.bf16.msra.mxu0 %v5040_v4  ;;  %2965 = vmatprep.mubr.bf16.mxu0 %v5968_v13  ;;  %v5053_v4 = vcombine.high %v2619_v63, %v2627_v0  ;;  %v5701_v39 = vld [vmem:[%s6300_s1 + $0x28] sm:$0xff]  }
 0xdaa   : > { %2935 = vmatprep.subr.bf16.mxu0 %v5057_v14  ;;  %v5066_v14 = vcombine.low %v2634_v5, %v2642_v6 }
 0xdad   : > { %2936 = vmatpush1.bf16.msra.mxu0 %v5056_v60  ;;  %v5069_v60 = vcombine.high %v2635_v7, %v2643_v8 }
 0xdae   : > { %3015 = vmatprep.subr.bf16.mxu0 %v5045_v22  ;;  %v5686_v22 = vld [vmem:[%s6300_s1 + $0x88] sm:$0xff]  }
 0xe7b   : > { %v2561_v49 = vpop.f32.mrb[40].mxu0 }
 0xe7c   : > { %v2567_v51 = vadd.f32 %v2561_v49, %v6431_v23  ;;  %v5579_v52 = vpop.f32.mrb[41].mxu0  ;;  %v5060_v49 = vcombine.low %v2631_v40, %v2639_v34  ;;  %v5702_v40 = vld [vmem:[%s6300_s1 + $0xa8] sm:$0xff]   ;;  %v5703_v34 = vld [vmem:[%s6300_s1 + $0x70] sm:$0xff]  }
 0xe7d   : > { %v2564_v53 = vpop.f32.mrb[42].mxu0  ;;  %v2632_v52 = vld [vmem:[%s6285_s26 + $0xa0] sm:$0xff] }
 0xe7e   : > { %v6560_v54 = vadd.f32 %v5035_v50, %v2567_v51  ;;  %v5580_v55 = vpop.f32.mrb[43].mxu0  ;;  %v5047_v50 = vcombine.high %v2616_v45, %v2624_v46  ;;  %v5049_v51 = vcombine.high %v2617_v12, %v2625_v47  ;;  %v2640_v53 = vld [vmem:[%s6285_s26 + $0xe0] sm:$0xff] }
 0xe7f   : > { %v2633_v55 = vld [vmem:[%s6285_s26 + $0xa8] sm:$0xff]  ;;  %v5062_v1 = vcombine.low %v2632_v52, %v2640_v53 }
 0xe80   : > { %v2578_v56 = vsel %vm1220_vm1, %v6560_v54, 0.0 }
 0xe81   : > { %2579 = vadd.xlane.f32.xlu0 %v2578_v56  ;;  %v2641_v56 = vld [vmem:[%s6285_s26 + $0xe8] sm:$0xff] }
 0xe82   : > { %v5064_v2 = vcombine.low %v2633_v55, %v2641_v56 }
 0xf0e   : > { %v2580_v57 = vpop.xlane.xlu0 %2579 }
 0xf0f   : > { %v2581_v58 = vmul.f32 0.03125, %v2580_v57  ;;  %v5046_v57 = vcombine.low %v2616_v45, %v2624_v46  ;;  %v5708_v45 = vld [vmem:[%s6300_s1 + $0xf8] sm:$0xff]  }
 0xf10   : > { %v5709_v46 = vld [vmem:[%s6300_s1 + $0x38] sm:$0xff]  }
 0xf11   : > { %v2582_v59 = vsub.f32 %v6560_v54, %v2581_v58  ;;  %v5048_v58 = vcombine.low %v2617_v12, %v2625_v47  ;;  %v5710_v12 = vld [vmem:[%s6300_s1 + $0xb8] sm:$0xff]   ;;  %v5711_v47 = vld [vmem:[%s6300_s1 + $0x140] sm:$0xff]  }
 0xf13   : > { %v2583_v61 = vmul.f32 %v2582_v59, %v2582_v59  ;;  %v2594_v33 = vmul.f32 %v5036_v32, %v2582_v59  ;;  %v5063_v59 = vcombine.high %v2632_v52, %v2640_v53  ;;  %v5695_v32 = vld [vmem:[%s6300_s1 + $0x60] sm:$0xff]   ;;  %v6672_v52 = vld [vmem:[%s6290_s9 + $0x8] sm:$0xff] }
 0xf15   : > { %v2584_v23 = vsel %vm1220_vm1, %v2583_v61, 0.0  ;;  %v5065_v61 = vcombine.high %v2633_v55, %v2641_v56 }
 0xf16   : > { %2585 = vadd.xlane.f32.xlu1 %v2584_v23  ;;  %v2618_v23 = vld [vmem:[%s6285_s26 + $0x30] sm:$0xff] }
 0xf17   : > { %v5051_v3 = vcombine.high %v2618_v23, %v2626_v62  ;;  %v5050_v9 = vcombine.low %v2618_v23, %v2626_v62 }
 0xfa3   : > { %v2586_v24 = vpop.xlane.xlu1 %2585 }
 0xfa4   : > { %v2587_v25 = vmul.f32 0.032258064, %v2586_v24  ;;  %v5687_v24 = vld [vmem:[%s6300_s1 + $0x50] sm:$0xff]  }
 0xfa6   : > { %5847 = vrsqrt.f32 %v2587_v25  ;;  %vm2597_vm14 = vcmp.eq.f32.partialorder %v2587_v25, inf  ;;  %v2600_v28 = vand.u32 2147483648, %v2587_v25  ;;  %vm2599_vm15 = vcmp.eq.f32.partialorder %v2587_v25, 0.0 }
 0xfb0   : > { %v5848_v26 = vpop.eup %5847 }
 0xfb1   : > { %v2596_v27 = vmul.f32 %v5848_v26, %v2587_v25  ;;  %v5689_v26 = vld [vmem:[%s6300_s1 + $0x10] sm:$0xff]  }
 0xfb3   : > { %v2598_v29 = vsel %vm2597_vm14, %v2587_v25, %v2596_v27  ;;  %v5688_v25 = vld [vmem:[%s6300_s1 + $0xd0] sm:$0xff]  }
 0xfb4   : > { %v2601_v30 = vsel %vm2599_vm15, %v2600_v28, %v2598_v29  ;;  %v5690_v27 = vld [vmem:[%s6300_s1 + $0x90] sm:$0xff]   ;;  %v5691_v28 = vld [vmem:[%s6300_s1 + $0x58] sm:$0xff]  }
 0xfb5   : > { %v2602_v31 = vadd.f32 1e-06, %v2601_v30  ;;  %v5692_v29 = vld [vmem:[%s6300_s1 + $0xd8] sm:$0xff]  }
 0xfb6   : > { %v5693_v30 = vld [vmem:[%s6300_s1 + $0x18] sm:$0xff]  }
 0xfb7   : > { %5849 = vrcp.f32 %v2602_v31  ;;  %v5694_v31 = vld [vmem:[%s6300_s1 + $0x98] sm:$0xff]  }
 0xfc1   : > { %v5850_v35 = vpop.eup %5849 }
 0xfc2   : > { %v2604_v37 = vmul.f32 %v5850_v35, %v2594_v33  ;;  %v5696_v33 = vld [vmem:[%s6300_s1 + $0xe0] sm:$0xff]  }
 0xfc3   : > { %v5697_v35 = vld [vmem:[%s6300_s1 + $0x20] sm:$0xff]  }
 0xfc4   : > { %v2611_v41 = vadd.f32 %v5037_v36, %v2604_v37  ;;  %v5698_v36 = vld [vmem:[%s6300_s1 + $0xa0] sm:$0xff]   ;;  %v5699_v37 = vld [vmem:[%s6300_s1 + $0x68] sm:$0xff]  }
 0xfc6   : > { %v6594_v42 = vpack.c.bf16 %v2611_v41, %v2611_v41  ;;  %v5704_v41 = vld [vmem:[%s6300_s1 + $0xf0] sm:$0xff]  }
 0xfc8   : > { %5070 = vmatmul.mubr.msk.bf16.vlgmr.msra.gmra.mrb[40].mxu1 %vm1220_vm1, %v6594_v42  ;;  %5071 = vmatmul.mubr.msk.bf16.vlgmr.msra.gmra.mrb[44].mxu0 %vm1220_vm1, %v6594_v42 }
 0xfc9   : > { %2975 = vmatpush1.bf16.msra.mxu1 %v5042_v20  ;;  %3016 = vmatpush1.bf16.msra.mxu0 %v5044_v21  ;;  %v5683_v20 = vld [vmem:[%s6300_s1 + $0x48] sm:$0xff]  }
 0xfca   : > { %2976 = vmatprep.subr.bf16.mxu1 %v5059_v43  ;;  %3017 = vmatprep.subr.bf16.mxu0 %v5061_v44  ;;  %v5684_v21 = vld [vmem:[%s6300_s1 + $0xc8] sm:$0xff]   ;;  %v5706_v43 = vld [vmem:[%s6300_s1 + $0xb0] sm:$0xff]   ;;  %v5707_v44 = vld [vmem:[%s6300_s1 + $0x78] sm:$0xff]  }
 0xfcb   : > { %3006 = vmatprep.mubr.bf16.mxu1 %v5968_v13  ;;  %3047 = vmatprep.mubr.bf16.mxu0 %v5968_v13 }
 0xfcd   : > { %2977 = vmatpush1.bf16.msra.mxu1 %v5058_v48  ;;  %3018 = vmatpush1.bf16.msra.mxu0 %v5060_v49  ;;  %v5712_v48 = vld [vmem:[%s6300_s1 + $0x1c0] sm:$0xff]   ;;  %v2649_v49 = vlaneseq }
 0xfce   : > { %3056 = vmatprep.subr.bf16.mxu1 %v5047_v50  ;;  %3097 = vmatprep.subr.bf16.mxu0 %v5049_v51 }
 0xfcf   : > { %v6668_v50 = vshrl.u32 %v2649_v49, 7  ;;  %v5722_v49 = vld [vmem:[%s6300_s1 + $0x190] sm:$0xff]  }
 0xfd0   : > { %5072 = vmatmul.mubr.msk.bf16.vlgmr.msra.gmra.mrb[44].mxu1 %vm1220_vm1, %v6594_v42  ;;  %5073 = vmatmul.mubr.msk.bf16.vlgmr.msra.gmra.mrb[48].mxu0 %vm1220_vm1, %v6594_v42 }
 0xfd1   : > { %3057 = vmatpush1.bf16.msra.mxu1 %v5046_v57  ;;  %3098 = vmatpush1.bf16.msra.mxu0 %v5048_v58  ;;  %v2675_v51 = vsub.s32 6, %v6668_v50  ;;  %v2651_v55 = vsub.s32 0, %v6668_v50  ;;  %v2659_v56 = vsub.s32 2, %v6668_v50  ;;  %v6682_v57 = vld [vmem:[%s6290_s9] sm:$0xff]  ;;  %v2655_v58 = vsub.s32 1, %v6668_v50 }
 0xfd2   : > { %3058 = vmatprep.subr.bf16.mxu1 %v5063_v59  ;;  %3099 = vmatprep.subr.bf16.mxu0 %v5065_v61  ;;  %v2663_v59 = vsub.s32 3, %v6668_v50 }
 0xfd3   : > { %3088 = vmatprep.mubr.bf16.mxu1 %v5968_v13  ;;  %3129 = vmatprep.mubr.bf16.mxu0 %v5968_v13  ;;  %v6677_v53 = vrot.slane %v6672_v52, %v2675_v51  ;;  %v2652_v61 = vrot.slane %v6682_v57, %v2651_v55  ;;  %v2660_v23 = vrot.slane %v6682_v57, %v2659_v56 }
 0xfd4   : > { %v2656_v62 = vrot.slane %v6682_v57, %v2655_v58  ;;  %v2664_v63 = vrot.slane %v6682_v57, %v2663_v59 }
 0xfd5   : > { %3059 = vmatpush1.bf16.msra.mxu1 %v5062_v1  ;;  %3100 = vmatpush1.bf16.msra.mxu0 %v5064_v2 }
 0xfd6   : > { %3138 = vmatprep.subr.bf16.mxu1 %v5051_v3  ;;  %3179 = vmatprep.subr.bf16.mxu0 %v5053_v4 }
 0xfd8   : > { %5074 = vmatmul.mubr.msk.bf16.vlgmr.msra.gmra.mrb[48].mxu1 %vm1220_vm1, %v6594_v42  ;;  %5075 = vmatmul.mubr.msk.bf16.vlgmr.msra.gmra.mrb[52].mxu0 %vm1220_vm1, %v6594_v42 }
 0xfd9   : > { %3139 = vmatpush1.bf16.msra.mxu1 %v5050_v9  ;;  %3180 = vmatpush1.bf16.msra.mxu0 %v5052_v10  ;;  %v2671_v10 = vsub.s32 5, %v6668_v50 }
 0xfda   : > { %3140 = vmatprep.subr.bf16.mxu1 %v5067_v11  ;;  %3181 = vmatprep.subr.bf16.mxu0 %v5069_v60  ;;  %v2679_v11 = vsub.s32 7, %v6668_v50 }
 0xfdb   : > { %3170 = vmatprep.mubr.bf16.mxu1 %v5968_v13  ;;  %3211 = vmatprep.mubr.bf16.mxu0 %v5968_v13  ;;  %v5685_v13 = vld [vmem:[%s6300_s1 + $0x8] sm:$0xff]  }
 0xfdd   : > { %3141 = vmatpush1.bf16.msra.mxu1 %v5066_v14  ;;  %3182 = vmatpush1.bf16.msra.mxu0 %v5068_v15 }
 0xfde   : > { %5269 = vmatprep.subr.bf16.mxu1 %v5679_v16  ;;  %5291 = vmatprep.subr.bf16.mxu0 %v5680_v17 }
 0xfe0   : > { %5076 = vmatmul.mubr.msk.bf16.vlgmr.msra.gmra.mrb[52].mxu1 %vm1220_vm1, %v6594_v42  ;;  %5077 = vmatmul.mubr.msk.bf16.vlgmr.msra.gmra.mrb[56].mxu0 %vm1220_vm1, %v6594_v42  ;;  %v5705_v42 = vld [vmem:[%s6300_s1 + $0x30] sm:$0xff]  }
 0xfe1   : > { %5270 = vmatpush3.bf16.msra.mxu1 %v5681_v18  ;;  %5292 = vmatpush3.bf16.msra.mxu0 %v5682_v19 }
 0xfe2   : > { %5271 = vmatprep.subr.bf16.mxu1 %v5683_v20  ;;  %5293 = vmatprep.subr.bf16.mxu0 %v5684_v21  ;;  %v2672_v21 = vrot.slane %v6682_v57, %v2671_v10 }
 0xfe5   : > { %5272 = vmatpush3.bf16.msra.mxu1 %v5685_v13  ;;  %5294 = vmatpush3.bf16.msra.mxu0 %v5686_v22  ;;  %v2680_v13 = vrot.slane %v6682_v57, %v2679_v11  ;;  %v5713_v22 = vld [vmem:[%s6300_s1 + $0x100] sm:$0xff]  }
 0xfe6   : > { %5273 = vmatprep.subr.bf16.mxu1 %v5687_v24  ;;  %5295 = vmatprep.subr.bf16.mxu0 %v5688_v25  ;;  %v5714_v24 = vld [vmem:[%s6300_s1 + $0x180] sm:$0xff]  }
 0xfe9   : > { %5274 = vmatpush3.bf16.msra.mxu1 %v5689_v26  ;;  %5296 = vmatpush3.bf16.msra.mxu0 %v5690_v27  ;;  %v5715_v27 = vld [vmem:[%s6300_s1 + $0x148] sm:$0xff]  }
 0xfea   : > { %5275 = vmatprep.subr.bf16.mxu1 %v5691_v28  ;;  %5297 = vmatprep.subr.bf16.mxu0 %v5692_v29  ;;  %v5716_v28 = vld [vmem:[%s6300_s1 + $0x1c8] sm:$0xff]  }
 0xfed   : > { %5276 = vmatpush3.bf16.msra.mxu1 %v5693_v30  ;;  %5298 = vmatpush3.bf16.msra.mxu0 %v5694_v31 }
 0xfee   : > { %5277 = vmatprep.subr.bf16.mxu1 %v5695_v32  ;;  %5299 = vmatprep.subr.bf16.mxu0 %v5696_v33 }
 0xff1   : > { %5278 = vmatpush3.bf16.msra.mxu1 %v5697_v35  ;;  %5300 = vmatpush3.bf16.msra.mxu0 %v5698_v36 }
 0xff2   : > { %5279 = vmatprep.subr.bf16.mxu1 %v5699_v37  ;;  %5301 = vmatprep.subr.bf16.mxu0 %v5700_v38  ;;  %v5717_v38 = vld [vmem:[%s6300_s1 + $0x108] sm:$0xff]  }
 0xff5   : > { %5280 = vmatpush3.bf16.msra.mxu1 %v5701_v39  ;;  %5302 = vmatpush3.bf16.msra.mxu0 %v5702_v40  ;;  %v5718_v39 = vld [vmem:[%s6300_s1 + $0x188] sm:$0xff]  }
 0xff6   : > { %5281 = vmatprep.subr.bf16.mxu1 %v5703_v34  ;;  %5303 = vmatprep.subr.bf16.mxu0 %v5704_v41  ;;  %v5719_v41 = vld [vmem:[%s6300_s1 + $0x150] sm:$0xff]  }
 0xff9   : > { %5282 = vmatpush3.bf16.msra.mxu1 %v5705_v42  ;;  %5304 = vmatpush3.bf16.msra.mxu0 %v5706_v43  ;;  %v5720_v42 = vld [vmem:[%s6300_s1 + $0x1d0] sm:$0xff]  }
 0xffa   : > { %5283 = vmatprep.subr.bf16.mxu1 %v5707_v44  ;;  %5305 = vmatprep.subr.bf16.mxu0 %v5708_v45  ;;  %v2684_v45 = vrot.slane %v6672_v52, %v2651_v55 }
 0xffd   : > { %5284 = vmatpush3.bf16.msra.mxu1 %v5709_v46  ;;  %5306 = vmatpush3.bf16.msra.mxu0 %v5710_v12  ;;  %v2692_v46 = vrot.slane %v6672_v52, %v2659_v56 }
 0xffe   : > { %5313 = vmatprep.subr.bf16.mxu1 %v5711_v47  ;;  %5335 = vmatprep.subr.bf16.mxu0 %v5712_v48  ;;  %v5721_v48 = vld [vmem:[%s6300_s1 + $0x110] sm:$0xff]  }
0x109b   : > { %v2926_v0 = vpop.f32.mrb[40].mxu1  ;;  %v2967_v1 = vpop.f32.mrb[44].mxu0 }
0x109c   : > { %v2927_v2 = vadd.f32 %v2926_v0, %v2652_v61  ;;  %v2968_v3 = vadd.f32 %v2967_v1, %v2660_v23  ;;  %v2928_v4 = vpop.f32.mrb[41].mxu1  ;;  %v2969_v5 = vpop.f32.mrb[45].mxu0  ;;  %v5723_v61 = vld [vmem:[%s6300_s1 + $0x158] sm:$0xff]  }
0x109d   : > { %v2929_v6 = vadd.f32 %v2928_v4, %v2656_v62  ;;  %v2970_v7 = vadd.f32 %v2969_v5, %v2664_v63  ;;  %v2930_v8 = vpop.f32.mrb[42].mxu1  ;;  %v2971_v9 = vpop.f32.mrb[46].mxu0  ;;  %v5724_v23 = vld [vmem:[%s6300_s1 + $0x1d8] sm:$0xff]  }
0x109e   : > { %v3220_v60 = vmax.f32 %v2927_v2, 0.0  ;;  %v3222_v14 = vmax.f32 %v2968_v3, 0.0  ;;  %v2931_v15 = vpop.f32.mrb[43].mxu1  ;;  %v2972_v16 = vpop.f32.mrb[47].mxu0  ;;  %v5725_v4 = vld [vmem:[%s6300_s1 + $0x118] sm:$0xff]   ;;  %v5727_v9 = vld [vmem:[%s6300_s1 + $0x160] sm:$0xff]  }
0x109f   : > { %v3221_v17 = vmax.f32 %v2929_v6, 0.0  ;;  %v3223_v18 = vmax.f32 %v2970_v7, 0.0  ;;  %v5726_v5 = vld [vmem:[%s6300_s1 + $0x198] sm:$0xff]   ;;  %v2667_v6 = vsub.s32 4, %v6668_v50  ;;  %v5729_v15 = vld [vmem:[%s6300_s1 + $0x120] sm:$0xff]  }
0x10a0   : > { %v3492_v25 = vpack.c.bf16 %v3220_v60, %v3220_v60  ;;  %v3494_v26 = vpack.c.bf16 %v3222_v14, %v3222_v14  ;;  %v5728_v60 = vld [vmem:[%s6300_s1 + $0x1e0] sm:$0xff]   ;;  %v5773_v50 = vld [vmem:[%s6300_s1 + $0x238] sm:$0xff]  }
0x10a1   : > { %v3493_v19 = vpack.c.bf16 %v3221_v17, %v3221_v17  ;;  %v3495_v20 = vpack.c.bf16 %v3223_v18, %v3223_v18  ;;  %v2700_v14 = vrot.slane %v6672_v52, %v2667_v6  ;;  %v5730_v16 = vld [vmem:[%s6300_s1 + $0x1a0] sm:$0xff]   ;;  %v5731_v17 = vld [vmem:[%s6300_s1 + $0x168] sm:$0xff]  }
0x10a2   : > { %v5732_v18 = vld [vmem:[%s6300_s1 + $0x1e8] sm:$0xff]  }
0x10a3   : > { %v6706_v29 = vpop.f32.mrb[44].mxu1  ;;  %v6708_v30 = vpop.f32.mrb[48].mxu0  ;;  %4308 = vmatprep.mubr.bf16.mxu1 %v3493_v19  ;;  %4348 = vmatprep.mubr.bf16.mxu0 %v3495_v20 }
0x10a4   : > { %v3010_v31 = vpop.f32.mrb[45].mxu1  ;;  %v3051_v32 = vpop.f32.mrb[49].mxu0  ;;  %4309 = vmatmul.mubr.bf16.vlgmr.msra.gmra.mrb[56].mxu1 %v3492_v25  ;;  %4349 = vmatmul.mubr.bf16.vlgmr.msra.gmra.mrb[60].mxu0 %v3494_v26 }
0x10a5   : > { %v3011_v33 = vadd.f32 %v3010_v31, %v2672_v21  ;;  %v3052_v35 = vadd.f32 %v3051_v32, %v2680_v13  ;;  %5314 = vmatpush3.bf16.msra.mxu1 %v5713_v22  ;;  %5336 = vmatpush3.bf16.msra.mxu0 %v5714_v24  ;;  %v3012_v36 = vpop.f32.mrb[46].mxu1  ;;  %v3053_v37 = vpop.f32.mrb[50].mxu0  ;;  %v2668_v31 = vrot.slane %v6682_v57, %v2667_v6  ;;  %v5754_v6 = vld [vmem:[%s6300_s1 + $0x290] sm:$0xff]  }
0x10a6   : > { %v3013_v40 = vpop.f32.mrb[47].mxu1  ;;  %v3054_v34 = vpop.f32.mrb[51].mxu0  ;;  %5315 = vmatprep.subr.bf16.mxu1 %v5715_v27  ;;  %5337 = vmatprep.subr.bf16.mxu0 %v5716_v28  ;;  %v5733_v27 = vld [vmem:[%s6300_s1 + $0x128] sm:$0xff]   ;;  %v5736_v36 = vld [vmem:[%s6300_s1 + $0x1f0] sm:$0xff]   ;;  %v2688_v37 = vrot.slane %v6672_v52, %v2655_v58  ;;  %v5740_v58 = vld [vmem:[%s6300_s1 + $0x1f8] sm:$0xff]  }
0x10a7   : > { %v3225_v43 = vmax.f32 %v3011_v33, 0.0  ;;  %v3227_v44 = vmax.f32 %v3052_v35, 0.0  ;;  %v5734_v28 = vld [vmem:[%s6300_s1 + $0x1a8] sm:$0xff]   ;;  %v5735_v35 = vld [vmem:[%s6300_s1 + $0x170] sm:$0xff]   ;;  %v5739_v34 = vld [vmem:[%s6300_s1 + $0x178] sm:$0xff]  }
0x10a9   : > { %v3497_v12 = vpack.c.bf16 %v3225_v43, %v3225_v43  ;;  %v3499_v47 = vpack.c.bf16 %v3227_v44, %v3227_v44  ;;  %5316 = vmatpush3.bf16.msra.mxu1 %v5717_v38  ;;  %5338 = vmatpush3.bf16.msra.mxu0 %v5718_v39  ;;  %v2696_v38 = vrot.slane %v6672_v52, %v2663_v59  ;;  %v5741_v59 = vld [vmem:[%s6300_s1 + $0x138] sm:$0xff]  }
0x10aa   : > { %5317 = vmatprep.subr.bf16.mxu1 %v5719_v41  ;;  %5339 = vmatprep.subr.bf16.mxu0 %v5720_v42  ;;  %v3009_v39 = vadd.f32 %v6706_v29, %v2668_v31  ;;  %v5742_v43 = vld [vmem:[%s6300_s1 + $0x1b8] sm:$0xff]   ;;  %v5743_v29 = vld [vmem:[%s6300_s1 + $0x240] sm:$0xff]   ;;  %v2712_v31 = vrot.slane %v6672_v52, %v2679_v11 }
0x10ab   : > { %v3090_v62 = vpop.f32.mrb[48].mxu1  ;;  %v3131_v63 = vpop.f32.mrb[52].mxu0  ;;  %4388 = vmatprep.mubr.bf16.mxu1 %v3497_v12  ;;  %4428 = vmatprep.mubr.bf16.mxu0 %v3499_v47  ;;  %v5745_v47 = vld [vmem:[%s6300_s1 + $0x200] sm:$0xff]   ;;  %v5774_v11 = vld [vmem:[%s6300_s1 + $0x2b8] sm:$0xff]  }
0x10ac   : > { %v6720_v55 = vadd.f32 %v3090_v62, %v2684_v45  ;;  %v6722_v56 = vadd.f32 %v3131_v63, %v2692_v46  ;;  %v3092_v0 = vpop.f32.mrb[49].mxu1  ;;  %v3133_v1 = vpop.f32.mrb[53].mxu0  ;;  %v3224_v44 = vmax.f32 %v3009_v39, 0.0  ;;  %v5747_v62 = vld [vmem:[%s6300_s1 + $0x248] sm:$0xff]  }
0x10ad   : > { %5318 = vmatpush3.bf16.msra.mxu1 %v5721_v48  ;;  %5340 = vmatpush3.bf16.msra.mxu0 %v5722_v49  ;;  %v3094_v2 = vpop.f32.mrb[50].mxu1  ;;  %v3135_v3 = vpop.f32.mrb[54].mxu0  ;;  %v3093_v41 = vadd.f32 %v3092_v0, %v2688_v37  ;;  %v3134_v42 = vadd.f32 %v3133_v1, %v2696_v38  ;;  %v5748_v63 = vld [vmem:[%s6300_s1 + $0x2c8] sm:$0xff]   ;;  %v5775_v37 = vld [vmem:[%s6300_s1 + $0x340] sm:$0xff]  }
0x10ae   : > { %v3095_v7 = vpop.f32.mrb[51].mxu1  ;;  %v3136_v8 = vpop.f32.mrb[55].mxu0  ;;  %5319 = vmatprep.subr.bf16.mxu1 %v5723_v61  ;;  %5341 = vmatprep.subr.bf16.mxu0 %v5724_v23  ;;  %v3496_v48 = vpack.c.bf16 %v3224_v44, %v3224_v44  ;;  %v5746_v61 = vld [vmem:[%s6300_s1 + $0x280] sm:$0xff]   ;;  %v5749_v1 = vld [vmem:[%s6300_s1 + $0x208] sm:$0xff]   ;;  %v5751_v3 = vld [vmem:[%s6300_s1 + $0x250] sm:$0xff]   ;;  %v3230_v38 = vmax.f32 %v6722_v56, 0.0 }
0x10af   : > { %v3229_v46 = vmax.f32 %v3093_v41, 0.0  ;;  %v3231_v12 = vmax.f32 %v3134_v42, 0.0  ;;  %v5750_v2 = vld [vmem:[%s6300_s1 + $0x288] sm:$0xff]   ;;  %v5755_v7 = vld [vmem:[%s6300_s1 + $0x258] sm:$0xff]   ;;  %v5784_v44 = vld [vmem:[%s6300_s1 + $0x3d0] sm:$0xff]  }
0x10b0   : > { %v5756_v8 = vld [vmem:[%s6300_s1 + $0x2d8] sm:$0xff]   ;;  %v5780_v56 = vld [vmem:[%s6300_s1 + $0x3c8] sm:$0xff]  }
0x10b1   : > { %5320 = vmatpush3.bf16.msra.mxu1 %v5725_v4  ;;  %5342 = vmatpush3.bf16.msra.mxu0 %v5726_v5  ;;  %v3501_v23 = vpack.c.bf16 %v3229_v46, %v3229_v46  ;;  %v3503_v0 = vpack.c.bf16 %v3231_v12, %v3231_v12  ;;  %v5752_v4 = vld [vmem:[%s6300_s1 + $0x2d0] sm:$0xff]   ;;  %v5781_v42 = vld [vmem:[%s6300_s1 + $0x308] sm:$0xff]   ;;  %v5788_v46 = vld [vmem:[%s6300_s1 + $0x3d8] sm:$0xff]  }
0x10b2   : > { %5321 = vmatprep.subr.bf16.mxu1 %v5727_v9  ;;  %5343 = vmatprep.subr.bf16.mxu0 %v5728_v60  ;;  %v5753_v5 = vld [vmem:[%s6300_s1 + $0x210] sm:$0xff]   ;;  %v5757_v9 = vld [vmem:[%s6300_s1 + $0x218] sm:$0xff]  }
0x10b3   : > { %v3172_v19 = vpop.f32.mrb[52].mxu1  ;;  %v3213_v20 = vpop.f32.mrb[56].mxu0  ;;  %v5758_v60 = vld [vmem:[%s6300_s1 + $0x298] sm:$0xff]  }
0x10b4   : > { %v6734_v21 = vadd.f32 %v3172_v19, %v2700_v14  ;;  %v6737_v13 = vadd.f32 %v3213_v20, %v6677_v53  ;;  %v6739_v22 = vpop.f32.mrb[53].mxu1  ;;  %v6741_v24 = vpop.f32.mrb[57].mxu0  ;;  %v2676_v53 = vrot.slane %v6682_v57, %v2675_v51  ;;  %v5737_v51 = vld [vmem:[%s6300_s1 + $0x130] sm:$0xff]   ;;  %v5759_v14 = vld [vmem:[%s6300_s1 + $0x260] sm:$0xff]   ;;  %v5764_v19 = vld [vmem:[%s6300_s1 + $0x2e8] sm:$0xff]  }
0x10b5   : > { %5322 = vmatpush3.bf16.msra.mxu1 %v5729_v15  ;;  %5344 = vmatpush3.bf16.msra.mxu0 %v5730_v16  ;;  %v3176_v25 = vpop.f32.mrb[54].mxu1  ;;  %v3217_v26 = vpop.f32.mrb[58].mxu0  ;;  %v5738_v57 = vld [vmem:[%s6300_s1 + $0x1b0] sm:$0xff]   ;;  %v5760_v15 = vld [vmem:[%s6300_s1 + $0x2e0] sm:$0xff]   ;;  %v5765_v20 = vld [vmem:[%s6300_s1 + $0x228] sm:$0xff]  }
0x10b6   : > { %v3177_v32 = vpop.f32.mrb[55].mxu1  ;;  %v3218_v33 = vpop.f32.mrb[59].mxu0  ;;  %5323 = vmatprep.subr.bf16.mxu1 %v5731_v17  ;;  %5345 = vmatprep.subr.bf16.mxu0 %v5732_v18  ;;  %v3050_v40 = vadd.f32 %v6708_v30, %v2676_v53  ;;  %v5744_v30 = vld [vmem:[%s6300_s1 + $0x2c0] sm:$0xff]   ;;  %v5763_v18 = vld [vmem:[%s6300_s1 + $0x268] sm:$0xff]   ;;  %v5767_v26 = vld [vmem:[%s6300_s1 + $0x270] sm:$0xff]  }
0x10b7   : > { %v5761_v16 = vld [vmem:[%s6300_s1 + $0x220] sm:$0xff]   ;;  %v5766_v25 = vld [vmem:[%s6300_s1 + $0x2a8] sm:$0xff]   ;;  %v5769_v53 = vld [vmem:[%s6300_s1 + $0x230] sm:$0xff]  }
0x10b8   : > { %v3226_v45 = vmax.f32 %v3050_v40, 0.0  ;;  %v5762_v17 = vld [vmem:[%s6300_s1 + $0x2a0] sm:$0xff]   ;;  %v5770_v32 = vld [vmem:[%s6300_s1 + $0x2b0] sm:$0xff]   ;;  %v5771_v33 = vld [vmem:[%s6300_s1 + $0x278] sm:$0xff]   ;;  %v3502_v40 = vpack.c.bf16 %v3230_v38, %v3230_v38 }
0x10b9   : > { %5324 = vmatpush3.bf16.msra.mxu1 %v5733_v27  ;;  %5346 = vmatpush3.bf16.msra.mxu0 %v5734_v28  ;;  %v5768_v27 = vld [vmem:[%s6300_s1 + $0x2f0] sm:$0xff]   ;;  %v2704_v28 = vrot.slane %v6672_v52, %v2671_v10  ;;  %v3216_v10 = vadd.f32 %v6741_v24, %v2712_v31  ;;  %v3228_v52 = vmax.f32 %v6720_v55, 0.0  ;;  %v5778_v55 = vld [vmem:[%s6300_s1 + $0x380] sm:$0xff]   ;;  %v5789_v12 = vld [vmem:[%s6300_s1 + $0x318] sm:$0xff]  }
0x10ba   : > { %5325 = vmatprep.subr.bf16.mxu1 %v5735_v35  ;;  %5347 = vmatprep.subr.bf16.mxu0 %v5736_v36  ;;  %v3498_v49 = vpack.c.bf16 %v3226_v45, %v3226_v45  ;;  %v5772_v35 = vld [vmem:[%s6300_s1 + $0x2f8] sm:$0xff]   ;;  %v5785_v45 = vld [vmem:[%s6300_s1 + $0x310] sm:$0xff]  }
0x10bb   : > { %v3175_v36 = vadd.f32 %v6739_v22, %v2704_v28  ;;  %v3235_v39 = vmax.f32 %v3216_v10, 0.0  ;;  %v5777_v22 = vld [vmem:[%s6300_s1 + $0x300] sm:$0xff]   ;;  %v3500_v24 = vpack.c.bf16 %v3228_v52, %v3228_v52 }
0x10bd   : > { %5326 = vmatpush3.bf16.msra.mxu1 %v5737_v51  ;;  %5348 = vmatpush3.bf16.msra.mxu0 %v5738_v57  ;;  %v5776_v51 = vld [vmem:[%s6300_s1 + $0x3c0] sm:$0xff]   ;;  %v3233_v57 = vmax.f32 %v3175_v36, 0.0  ;;  %v3507_v41 = vpack.c.bf16 %v3235_v39, %v3235_v39 }
0x10be   : > { %5327 = vmatprep.subr.bf16.mxu1 %v5739_v34  ;;  %5349 = vmatprep.subr.bf16.mxu0 %v5740_v58  ;;  %v5779_v34 = vld [vmem:[%s6300_s1 + $0x348] sm:$0xff]  }
0x10bf   : > { %v3505_v58 = vpack.c.bf16 %v3233_v57, %v3233_v57 }
0x10c1   : > { %5328 = vmatpush3.bf16.msra.mxu1 %v5741_v59  ;;  %5350 = vmatpush3.bf16.msra.mxu0 %v5742_v43  ;;  %v5782_v59 = vld [vmem:[%s6300_s1 + $0x388] sm:$0xff]   ;;  %v5783_v43 = vld [vmem:[%s6300_s1 + $0x350] sm:$0xff]  }
0x10c2   : > { %5357 = vmatprep.subr.bf16.mxu1 %v5743_v29  ;;  %5379 = vmatprep.subr.bf16.mxu0 %v5744_v30  ;;  %v5786_v29 = vld [vmem:[%s6300_s1 + $0x390] sm:$0xff]   ;;  %v5787_v30 = vld [vmem:[%s6300_s1 + $0x358] sm:$0xff]  }
0x10c4   : > { %4389 = vmatmul.mubr.bf16.vlgmr.msra.gmra.mrb[60].mxu1 %v3496_v48  ;;  %4429 = vmatmul.mubr.bf16.vlgmr.msra.gmra.mrb[64].mxu0 %v3498_v49  ;;  %v5791_v48 = vld [vmem:[%s6300_s1 + $0x360] sm:$0xff]  }
0x10c5   : > { %5358 = vmatpush3.bf16.msra.mxu1 %v5745_v47  ;;  %4468 = vmatprep.mubr.bf16.mxu1 %v3501_v23  ;;  %v5790_v47 = vld [vmem:[%s6300_s1 + $0x398] sm:$0xff]   ;;  %v5792_v49 = vld [vmem:[%s6300_s1 + $0x3e0] sm:$0xff]  }
0x10c6   : > { %5380 = vmatpush3.bf16.msra.mxu0 %v5746_v61  ;;  %4508 = vmatprep.mubr.bf16.mxu0 %v3503_v0  ;;  %v5793_v61 = vld [vmem:[%s6300_s1 + $0x320] sm:$0xff]   ;;  %v5797_v0 = vld [vmem:[%s6300_s1 + $0x328] sm:$0xff]  }
0x10c7   : > { %5359 = vmatprep.subr.bf16.mxu1 %v5747_v62  ;;  %5381 = vmatprep.subr.bf16.mxu0 %v5748_v63  ;;  %v5794_v23 = vld [vmem:[%s6300_s1 + $0x3a0] sm:$0xff]   ;;  %v5795_v62 = vld [vmem:[%s6300_s1 + $0x368] sm:$0xff]  }
0x10c8   : > { %v5796_v63 = vld [vmem:[%s6300_s1 + $0x3e8] sm:$0xff]  }
0x10c9   : > { %5360 = vmatpush3.bf16.msra.mxu1 %v5749_v1  ;;  %v5798_v1 = vld [vmem:[%s6300_s1 + $0x3a8] sm:$0xff]  }
0x10ca   : > { %5382 = vmatpush3.bf16.msra.mxu0 %v5750_v2  ;;  %5361 = vmatprep.subr.bf16.mxu1 %v5751_v3  ;;  %v5799_v2 = vld [vmem:[%s6300_s1 + $0x370] sm:$0xff]  }
0x10cb   : > { %5383 = vmatprep.subr.bf16.mxu0 %v5752_v4  ;;  %v5800_v3 = vld [vmem:[%s6300_s1 + $0x3f0] sm:$0xff]  }
0x10cc   : > { %v5801_v4 = vld [vmem:[%s6300_s1 + $0x330] sm:$0xff]  }
0x10cd   : > { %5362 = vmatpush3.bf16.msra.mxu1 %v5753_v5  ;;  %v5802_v5 = vld [vmem:[%s6300_s1 + $0x3b0] sm:$0xff]  }
0x10ce   : > { %5384 = vmatpush3.bf16.msra.mxu0 %v5754_v6  ;;  %5363 = vmatprep.subr.bf16.mxu1 %v5755_v7  ;;  %v5803_v6 = vld [vmem:[%s6300_s1 + $0x378] sm:$0xff]  }
0x10cf   : > { %5385 = vmatprep.subr.bf16.mxu0 %v5756_v8  ;;  %v5804_v7 = vld [vmem:[%s6300_s1 + $0x3f8] sm:$0xff]  }
0x10d0   : > { %v5805_v8 = vld [vmem:[%s6300_s1 + $0x338] sm:$0xff]  }
0x10d1   : > { %5364 = vmatpush3.bf16.msra.mxu1 %v5757_v9  ;;  %v3232_v9 = vmax.f32 %v6734_v21, 0.0 }
0x10d2   : > { %5386 = vmatpush3.bf16.msra.mxu0 %v5758_v60  ;;  %5365 = vmatprep.subr.bf16.mxu1 %v5759_v14  ;;  %v5806_v60 = vld [vmem:[%s6300_s1 + $0x3b8] sm:$0xff]   ;;  %v3234_v14 = vmax.f32 %v6737_v13, 0.0 }
0x10d3   : > { %5387 = vmatprep.subr.bf16.mxu0 %v5760_v15  ;;  %v3504_v15 = vpack.c.bf16 %v3232_v9, %v3232_v9 }
0x10d5   : > { %5366 = vmatpush3.bf16.msra.mxu1 %v5761_v16  ;;  %v3506_v16 = vpack.c.bf16 %v3234_v14, %v3234_v14 }
0x10d6   : > { %5388 = vmatpush3.bf16.msra.mxu0 %v5762_v17  ;;  %5367 = vmatprep.subr.bf16.mxu1 %v5763_v18 }
0x10d7   : > { %5389 = vmatprep.subr.bf16.mxu0 %v5764_v19 }
0x10d9   : > { %5368 = vmatpush3.bf16.msra.mxu1 %v5765_v20 }
0x10da   : > { %5390 = vmatpush3.bf16.msra.mxu0 %v5766_v25  ;;  %5369 = vmatprep.subr.bf16.mxu1 %v5767_v26 }
0x10db   : > { %5391 = vmatprep.subr.bf16.mxu0 %v5768_v27 }
0x10dd   : > { %5370 = vmatpush3.bf16.msra.mxu1 %v5769_v53 }
0x10de   : > { %5392 = vmatpush3.bf16.msra.mxu0 %v5770_v32  ;;  %5371 = vmatprep.subr.bf16.mxu1 %v5771_v33 }
0x10df   : > { %5393 = vmatprep.subr.bf16.mxu0 %v5772_v35 }
0x10e1   : > { %5372 = vmatpush3.bf16.msra.mxu1 %v5773_v50 }
0x10e2   : > { %5394 = vmatpush3.bf16.msra.mxu0 %v5774_v11  ;;  %5401 = vmatprep.subr.bf16.mxu1 %v5775_v37 }
0x10e3   : > { %5423 = vmatprep.subr.bf16.mxu0 %v5776_v51 }
0x10e4   : > { %4469 = vmatmul.mubr.bf16.vlgmr.msra.gmra.mrb[64].mxu1 %v3500_v24 }
0x10e5   : > { %4509 = vmatmul.mubr.bf16.vlgmr.msra.gmra.mrb[68].mxu0 %v3502_v40  ;;  %5402 = vmatpush3.bf16.msra.mxu1 %v5777_v22 }
0x10e6   : > { %4548 = vmatprep.mubr.bf16.mxu1 %v3505_v58  ;;  %5424 = vmatpush3.bf16.msra.mxu0 %v5778_v55 }
0x10e7   : > { %4588 = vmatprep.mubr.bf16.mxu0 %v3507_v41  ;;  %5403 = vmatprep.subr.bf16.mxu1 %v5779_v34 }
0x10e8   : > { %5425 = vmatprep.subr.bf16.mxu0 %v5780_v56 }
0x10e9   : > { %5404 = vmatpush3.bf16.msra.mxu1 %v5781_v42 }
0x10ea   : > { %5426 = vmatpush3.bf16.msra.mxu0 %v5782_v59  ;;  %5405 = vmatprep.subr.bf16.mxu1 %v5783_v43 }
0x10eb   : > { %5427 = vmatprep.subr.bf16.mxu0 %v5784_v44 }
0x10ed   : > { %5406 = vmatpush3.bf16.msra.mxu1 %v5785_v45 }
0x10ee   : > { %5428 = vmatpush3.bf16.msra.mxu0 %v5786_v29  ;;  %5407 = vmatprep.subr.bf16.mxu1 %v5787_v30 }
0x10ef   : > { %5429 = vmatprep.subr.bf16.mxu0 %v5788_v46 }
0x10f1   : > { %5408 = vmatpush3.bf16.msra.mxu1 %v5789_v12 }
0x10f2   : > { %5430 = vmatpush3.bf16.msra.mxu0 %v5790_v47  ;;  %5409 = vmatprep.subr.bf16.mxu1 %v5791_v48 }
0x10f3   : > { %5431 = vmatprep.subr.bf16.mxu0 %v5792_v49 }
0x10f5   : > { %5410 = vmatpush3.bf16.msra.mxu1 %v5793_v61 }
0x10f6   : > { %5432 = vmatpush3.bf16.msra.mxu0 %v5794_v23  ;;  %5411 = vmatprep.subr.bf16.mxu1 %v5795_v62  ;;  %v5206_v62 = vld [vmem:[%s1201_s24] ss:$0 sm:$0xff] }
0x10f7   : > { %5433 = vmatprep.subr.bf16.mxu0 %v5796_v63 }
0x10f9   : > { %5412 = vmatpush3.bf16.msra.mxu1 %v5797_v0 }
0x10fa   : > { %5434 = vmatpush3.bf16.msra.mxu0 %v5798_v1  ;;  %5413 = vmatprep.subr.bf16.mxu1 %v5799_v2 }
0x10fb   : > { %5435 = vmatprep.subr.bf16.mxu0 %v5800_v3 }
0x10fd   : > { %5414 = vmatpush3.bf16.msra.mxu1 %v5801_v4 }
0x10fe   : > { %5436 = vmatpush3.bf16.msra.mxu0 %v5802_v5  ;;  %5415 = vmatprep.subr.bf16.mxu1 %v5803_v6 }
0x10ff   : > { %5437 = vmatprep.subr.bf16.mxu0 %v5804_v7 }
0x1101   : > { %5416 = vmatpush3.bf16.msra.mxu1 %v5805_v8 }
0x1102   : > { %5438 = vmatpush3.bf16.msra.mxu0 %v5806_v60 }
0x1104   : > { %4549 = vmatmul.mubr.bf16.vlgmr.msra.gmra.mrb[68].mxu1 %v3504_v15 }
0x1105   : > { %4589 = vmatmul.mubr.bf16.vlgmr.msra.gmra.mrb[72].mxu0 %v3506_v16 }
0x1177   : > { %v5285_v17 = vpop.f32.mrb[56].mxu1  ;;  %v5307_v18 = vpop.f32.mrb[60].mxu0 }
0x1178   : > { %v5286_v19 = vpop.f32.mrb[57].mxu1  ;;  %v5308_v20 = vpop.f32.mrb[61].mxu0 }
0x1179   : > { %v5287_v25 = vadd.f32 %v5286_v19, %v5285_v17  ;;  %v5309_v26 = vadd.f32 %v5308_v20, %v5307_v18  ;;  %v5288_v27 = vpop.f32.mrb[58].mxu1  ;;  %v5310_v21 = vpop.f32.mrb[62].mxu0  ;;  %v5208_v18 = vld [vmem:[%s7055_s7] ss:$0 sm:$0xff] (!%p5207_p1) }
0x117a   : > { %v5289_v28 = vpop.f32.mrb[59].mxu1  ;;  %v5311_v31 = vpop.f32.mrb[63].mxu0 }
0x117b   : > { %v4351_v53 = vadd.f32 %v5309_v26, %v5287_v25  ;;  %v5209_v25 = vld [vmem:[%s7056_s29] ss:$0 sm:$0xff] (!%p5207_p1) }
0x1197   : > { %v5329_v32 = vpop.f32.mrb[60].mxu1  ;;  %v5351_v13 = vpop.f32.mrb[64].mxu0 }
0x1198   : > { %v5330_v33 = vpop.f32.mrb[61].mxu1  ;;  %v5352_v35 = vpop.f32.mrb[65].mxu0 }
0x1199   : > { %v5331_v36 = vadd.f32 %v5330_v33, %v5329_v32  ;;  %v5353_v10 = vadd.f32 %v5352_v35, %v5351_v13  ;;  %v5332_v50 = vpop.f32.mrb[62].mxu1  ;;  %v5354_v52 = vpop.f32.mrb[66].mxu0 }
0x119a   : > { %v5333_v11 = vpop.f32.mrb[63].mxu1  ;;  %v5355_v37 = vpop.f32.mrb[67].mxu0 }
0x119b   : > { %v4391_v38 = vadd.f32 %v5331_v36, %v4351_v53 }
0x119d   : > { %v4431_v51 = vadd.f32 %v5353_v10, %v4391_v38 }
0x11b7   : > { %v5373_v57 = vpop.f32.mrb[64].mxu1 }
0x11b8   : > { %v5395_v39 = vpop.f32.mrb[68].mxu0  ;;  %v5374_v22 = vpop.f32.mrb[65].mxu1 }
0x11b9   : > { %v5375_v24 = vadd.f32 %v5374_v22, %v5373_v57  ;;  %v5396_v55 = vpop.f32.mrb[69].mxu0  ;;  %v5376_v40 = vpop.f32.mrb[66].mxu1 }
0x11ba   : > { %v5397_v34 = vadd.f32 %v5396_v55, %v5395_v39  ;;  %v5398_v58 = vpop.f32.mrb[70].mxu0  ;;  %v5377_v56 = vpop.f32.mrb[67].mxu1 }
0x11bb   : > { %v4471_v41 = vadd.f32 %v5375_v24, %v4431_v51  ;;  %v5399_v42 = vpop.f32.mrb[71].mxu0 }
0x11bd   : > { %v4511_v59 = vadd.f32 %v5397_v34, %v4471_v41 }
0x11d7   : > { %v5417_v43 = vpop.f32.mrb[68].mxu1 }
0x11d8   : > { %v5439_v44 = vpop.f32.mrb[72].mxu0  ;;  %v5418_v45 = vpop.f32.mrb[69].mxu1 }
0x11d9   : > { %v5419_v29 = vadd.f32 %v5418_v45, %v5417_v43  ;;  %v5440_v30 = vpop.f32.mrb[73].mxu0  ;;  %v5420_v46 = vpop.f32.mrb[70].mxu1 }
0x11da   : > { %v5441_v12 = vadd.f32 %v5440_v30, %v5439_v44  ;;  %v5442_v47 = vpop.f32.mrb[74].mxu0  ;;  %v5421_v48 = vpop.f32.mrb[71].mxu1 }
0x11db   : > { %v4551_v49 = vadd.f32 %v5419_v29, %v4511_v59  ;;  %v5443_v61 = vpop.f32.mrb[75].mxu0 }
0x11dd   : > { %v4591_v23 = vadd.f32 %v5441_v12, %v4551_v49  ;;  %4609 = sbr.rel (%p5207_p1) target bundleno = 4914 (0x1332), region = 136 }
0x11df   : > { %v4596_v63 = vadd.f32 %v4591_v23, %v6560_v54 }
0x11e1   : > { %v4604_v0 = vadd.f32 %v5206_v62, %v4596_v63 }
0x11e3   : > { %4605 = vst.msk [vmem:[%s6303_s28] sm:$0xff] %vm1220_vm1, %v4604_v0 }
0x11ea   : > { %v4610_v1 = vld [vmem:[%s6303_s28] sm:$0xff] }
0x11eb   : > { %v4613_v2 = vsel %vm1220_vm1, %v4610_v1, 0.0 }
0x11ec   : > { %4614 = vadd.xlane.f32.xlu0 %v4613_v2 }
0x1279   : > { %v4615_v3 = vpop.xlane.xlu0 %4614 }
0x127a   : > { %v4616_v4 = vmul.f32 0.03125, %v4615_v3 }
0x127c   : > { %v4617_v5 = vsub.f32 %v4610_v1, %v4616_v4 }
0x127e   : > { %v4618_v6 = vmul.f32 %v4617_v5, %v4617_v5  ;;  %v4629_v19 = vmul.f32 %v5208_v18, %v4617_v5 }
0x1280   : > { %v4619_v7 = vsel %vm1220_vm1, %v4618_v6, 0.0 }
0x1281   : > { %4620 = vadd.xlane.f32.xlu0 %v4619_v7 }
0x130e   : > { %v4621_v8 = vpop.xlane.xlu0 %4620 }
0x130f   : > { %v4622_v54 = vmul.f32 0.032258064, %v4621_v8 }
0x1311   : > { %5852 = vrsqrt.f32 %v4622_v54  ;;  %vm4632_vm0 = vcmp.eq.f32.partialorder %v4622_v54, inf  ;;  %v4635_v14 = vand.u32 2147483648, %v4622_v54  ;;  %vm4634_vm2 = vcmp.eq.f32.partialorder %v4622_v54, 0.0 }
0x131b   : > { %v5853_v9 = vpop.eup %5852 }
0x131c   : > { %v4631_v60 = vmul.f32 %v5853_v9, %v4622_v54 }
0x131e   : > { %v4633_v15 = vsel %vm4632_vm0, %v4622_v54, %v4631_v60 }
0x131f   : > { %v4636_v16 = vsel %vm4634_vm2, %v4635_v14, %v4633_v15 }
0x1320   : > { %v4637_v17 = vadd.f32 1e-06, %v4636_v16 }
0x1322   : > { %5854 = vrcp.f32 %v4637_v17 }
0x132c   : > { %v5855_v20 = vpop.eup %5854 }
0x132d   : > { %v4639_v26 = vmul.f32 %v5855_v20, %v4629_v19 }
0x132f   : > { %v4646_v27 = vadd.f32 %v5209_v25, %v4639_v26 }
0x1331   : > { %4647 = vst.msk [vmem:[%s6303_s28] sm:$0xff] %vm1220_vm1, %v4646_v27 }
0x1332 PF: > { %s7057_s10 = sld [smem:[#allocation10_spill]]  ;;  %s7058_s30 = sld [smem:[#allocation7_spill]] }
0x1333   : > { %s7060_s20 = sld [smem:[#allocation47_spill]]  ;;  %s4662_s11 = sshll.u32 %s6303_s28, 4  ;;  %s4663_s11 = int_to_ptr.vmem [resolvable:$true] %s4662_s11 }
0x1334   : > { %s5856_s23 = scalar_lea.vmem %s4663_s11, 128  ;;  %s5969_s6 = smov [#allocation3]  }
0x1335   : > { %p5857_p2 = scmp.ne.s32.totalorder %s4663_s11, %s5856_s23  ;;  %s5860_s0 = sshll.u32 %s5969_s6, 4  ;;  %s5861_s0 = int_to_ptr.vmem [resolvable:$false] %s5860_s0 }
0x1336   : > { %s5862_s8 = scalar_lea.vmem %s5861_s0, 256  ;;  %p5863_p6 = scmp.lt.s32.totalorder %s4663_s11, %s5861_s0 }
0x1337   : > { %p5858_p4 = pnand %p5857_p2, %p6159_p3  ;;  %p5864_p7 = scmp.lt.s32.totalorder %s5862_s8, %s5856_s23 }
0x1338   : > { %s5211_s16 = sshll.u32 %s7057_s10, 7  ;;  %s7061_s17 = sand.u32 1, %s7058_s30  }
0x1339   : > { %s6865_s21 = scalar_lea.hbm %s7060_s20, %s5211_s16  ;;  %s4649_s13 = scalar_lea.sflag [#allocation4], %s7061_s17 }
0x133a   : > { %p5859_p5 = pneg %p5858_p4  ;;  %p5865_p8 = por %p5864_p7, %p5863_p6 }
0x133c   : > { %p5866_p10 = pnand %p5865_p8, %p5859_p5 }
0x133e   : > { %5869 = shalt.err (!%p5866_p10)
}
0x133f   : > { %s5870_s28 = scalar_lea.hbm %s6865_s21, 128  ;;  %s5874_s4 = scalar_lea.hbm %s7060_s20, 256 }
0x1340   : > { %p5871_p11 = scmp.ne.s32.totalorder %s6865_s21, %s5870_s28  ;;  %p5875_p0 = scmp.lt.u32.totalorder %s6865_s21, %s7060_s20 }
0x1341   : > { %p5876_p1 = scmp.lt.u32.totalorder %s5874_s4, %s5870_s28  ;;  %p5878_p4 = scmp.lt.u32.totalorder %s5870_s28, %s6865_s21 }
0x1342   : > { %p5872_p12 = pnand %p5871_p11, %p6159_p3 }
0x1343   : > { %p5877_p2 = por %p5876_p1, %p5875_p0 }
0x1344   : > { %p5873_p13 = pneg %p5872_p12 }
0x1345   : > { %p5879_p5 = por %p5878_p4, %p5877_p2 }
0x1347   : > { %p5880_p6 = pnand %p5879_p5, %p5873_p13 }
0x1349   : > { %5883 = shalt.err (!%p5880_p6)
}
0x134a   : > { %5581 = dma.vmem_to_hbm [thread:$0]  (%p6159_p3), %s4663_s11, 128, %s6865_s21, %s4649_s13  }
0x134b PF: > { %s7062_s1 = sld [smem:[#allocation13_spill]]  ;;  %s7063_s19 = sld [smem:[#allocation6_spill]] }
0x1351   : > { %p5587_p7 = scmp.ge.s32.totalorder %s7062_s1, 2  ;;  %s4674_s24 = sand.u32 1, %s7063_s19  }
0x1352   : > { %s4675_s7 = scalar_lea.sflag [#allocation4], %s4674_s24 }
0x1353   : > { %p5584_p8 = pnand %p5587_p7, %p6169_p9 }
0x1355   : > { %5917 = dma.done.wait (!%p5584_p8), %s4675_s7, 128  }
0x1356   : > { %5919 = vsyncadd (!%p5584_p8), %s4675_s7, 4294967168  ;;  %s40_s0 = sadd.s32 1, %s7062_s1   ;;  %s7065_s7 = sld [smem:[#allocation7_spill]] }
0x1357   : > { %p37_p10 = scmp.ge.s32.totalorder %s40_s0, 6   ;;  %s7066_s4 = sld [smem:[#allocation8_spill]] }
0x1358   : > { %s7067_s8 = sld [smem:[#allocation18_spill]]  ;;  %s7068_s30 = sld [smem:[#allocation11_spill]] }
0x1359   : > { %s7069_s9 = sld [smem:[#allocation12_spill]]  ;;  %s7070_s5 = sld [smem:[#allocation14_spill]] }
0x135a   : > { %s7071_s28 = sld [smem:[#allocation16_spill]]  ;;  %39 = sbr.rel (!%p37_p10) target bundleno = 32 (0x20), region = 240 }
0x1361   :  { %4680 = vsyncpa [#allocation4], 1 }
0x1362   :  { %4682 = vsyncpa [#allocation4 + $0x1], 1 }

</bundles_post_ra>
